<compile_context>
chip_gen: v7x
topology: tpu7x:2x2x1
jax: 0.10.0
libtpu: 0.0.40
codegen_flags: <defaults>
</compile_context>

<pallas_src>
import functools
import math

import jax
import jax.numpy as jnp
from jax.experimental import pallas as pl
from jax.experimental.pallas import tpu as pltpu

_LN_EPS = 1e-5
_BN_EPS = 1e-5
_VMEM_LIMIT = 64 * 1024 * 1024  # safe on v5e/v6e (128 MiB phys) and v7x (64 MiB phys)


def _cparams(dim_sem):
    return pltpu.CompilerParams(dimension_semantics=dim_sem,
                                vmem_limit_bytes=_VMEM_LIMIT)


def _pick_tile(n, target):
    """Largest divisor of n that is a multiple of 8 and <= target (else n itself)."""
    best = None
    for c in range(8, min(n, target) + 1, 8):
        if n % c == 0:
            best = c
    return best if best is not None else n


def _layernorm_f32(x, gamma, beta):
    mean = jnp.mean(x, axis=-1, keepdims=True)
    var = jnp.mean(jnp.square(x - mean), axis=-1, keepdims=True)
    return (x - mean) * jax.lax.rsqrt(var + _LN_EPS) * gamma + beta


# ============================================================================ fused linear
# Used for: frontend projection, conv-module (LN -> pw1 -> GLU), final linear + log_softmax.
def _fused_linear_kernel(cfg, *refs):
    it = iter(refs[:-1])
    o_ref = refs[-1]

    x = next(it)[...].astype(jnp.float32)
    if cfg["ln_in"]:
        g = next(it)[...]
        b = next(it)[...]
        x = _layernorm_f32(x, g, b)
    x_mm = x.astype(jnp.bfloat16)

    if cfg["glu"]:
        w_val = next(it)
        w_gate = next(it)
        b_val = next(it)
        b_gate = next(it)
        val = jnp.dot(x_mm, w_val[...], preferred_element_type=jnp.float32) + b_val[...]
        gate = jnp.dot(x_mm, w_gate[...], preferred_element_type=jnp.float32) + b_gate[...]
        y = val * jax.nn.sigmoid(gate)
    else:
        w = next(it)
        bias = next(it)
        y = jnp.dot(x_mm, w[...], preferred_element_type=jnp.float32) + bias[...]
        if cfg["activation"] == "silu":
            y = y * jax.nn.sigmoid(y)

    if cfg["log_softmax"]:
        y = y - jnp.max(y, axis=-1, keepdims=True)
        y = y - jnp.log(jnp.sum(jnp.exp(y), axis=-1, keepdims=True))
    o_ref[...] = y.astype(o_ref.dtype)


def fused_linear(x2d, *, w=None, b=None, glu=None, ln_in=None, activation="none",
                 log_softmax=False, out_dtype=jnp.bfloat16, tm_target=256):
    m, kdim = x2d.shape
    if glu is not None:
        w_val, w_gate, b_val, b_gate = glu
        n = w_val.shape[1]
    else:
        n = w.shape[1]
    tm = _pick_tile(m, tm_target)

    operands = [x2d]
    in_specs = [pl.BlockSpec((tm, kdim), lambda i: (i, 0))]

    def add_full(arr, rows, cols, dtype):
        operands.append(arr.reshape(rows, cols).astype(dtype))
        in_specs.append(pl.BlockSpec((rows, cols), lambda i: (0, 0)))

    if ln_in is not None:
        add_full(ln_in[0], 1, kdim, jnp.float32)
        add_full(ln_in[1], 1, kdim, jnp.float32)
    if glu is not None:
        add_full(w_val, kdim, n, jnp.bfloat16)
        add_full(w_gate, kdim, n, jnp.bfloat16)
        add_full(b_val, 1, n, jnp.float32)
        add_full(b_gate, 1, n, jnp.float32)
    else:
        add_full(w, kdim, n, jnp.bfloat16)
        add_full(b, 1, n, jnp.float32)

    cfg = dict(ln_in=ln_in is not None, glu=glu is not None, activation=activation,
               log_softmax=log_softmax)

    return pl.pallas_call(
        functools.partial(_fused_linear_kernel, cfg),
        grid=(m // tm,),
        in_specs=in_specs,
        out_specs=pl.BlockSpec((tm, n), lambda i: (i, 0)),
        out_shape=jax.ShapeDtypeStruct((m, n), out_dtype),
        compiler_params=_cparams(("parallel",)),
    )(*operands)


# ============================================================================ fused FFN module
# LN -> Linear(D,FF) -> SiLU -> Linear(FF,D) -> *0.5 -> +input-residual [-> final LN].
# Both weights resident; the [tm, FF] hidden never leaves VMEM.
def _ffn_kernel(has_ln_out, *refs):
    o_ref = refs[-1]
    if has_ln_out:
        (x_ref, g_ref, b_ref, w1_ref, b1_ref, w2_ref, b2_ref,
         go_ref, bo_ref) = refs[:-1]
    else:
        x_ref, g_ref, b_ref, w1_ref, b1_ref, w2_ref, b2_ref = refs[:-1]

    x = x_ref[...].astype(jnp.float32)
    xn = _layernorm_f32(x, g_ref[...], b_ref[...]).astype(jnp.bfloat16)
    h = jnp.dot(xn, w1_ref[...], preferred_element_type=jnp.float32) + b1_ref[...]
    h = h * jax.nn.sigmoid(h)                                   # SiLU
    y = jnp.dot(h.astype(jnp.bfloat16), w2_ref[...],
                preferred_element_type=jnp.float32) + b2_ref[...]
    y = y * jnp.float32(0.5) + x                                # half-step residual
    if has_ln_out:
        y = _layernorm_f32(y, go_ref[...], bo_ref[...])
    o_ref[...] = y.astype(o_ref.dtype)


def fused_ffn(x2d, ff, ln_out=None, tm_target=256):
    m, D = x2d.shape
    FF = ff["w1"].shape[1]
    tm = _pick_tile(m, tm_target)

    operands = [x2d,
                ff["ln_g"].reshape(1, D).astype(jnp.float32),
                ff["ln_b"].reshape(1, D).astype(jnp.float32),
                ff["w1"].astype(jnp.bfloat16),
                ff["b1"].reshape(1, FF).astype(jnp.float32),
                ff["w2"].astype(jnp.bfloat16),
                ff["b2"].reshape(1, D).astype(jnp.float32)]
    in_specs = [pl.BlockSpec((tm, D), lambda i: (i, 0)),
                pl.BlockSpec((1, D), lambda i: (0, 0)),
                pl.BlockSpec((1, D), lambda i: (0, 0)),
                pl.BlockSpec((D, FF), lambda i: (0, 0)),
                pl.BlockSpec((1, FF), lambda i: (0, 0)),
                pl.BlockSpec((FF, D), lambda i: (0, 0)),
                pl.BlockSpec((1, D), lambda i: (0, 0))]
    if ln_out is not None:
        operands += [ln_out[0].reshape(1, D).astype(jnp.float32),
                     ln_out[1].reshape(1, D).astype(jnp.float32)]
        in_specs += [pl.BlockSpec((1, D), lambda i: (0, 0)),
                     pl.BlockSpec((1, D), lambda i: (0, 0))]

    return pl.pallas_call(
        functools.partial(_ffn_kernel, ln_out is not None),
        grid=(m // tm,),
        in_specs=in_specs,
        out_specs=pl.BlockSpec((tm, D), lambda i: (i, 0)),
        out_shape=jax.ShapeDtypeStruct((m, D), jnp.bfloat16),
        compiler_params=_cparams(("parallel",)),
    )(*operands)


# ============================================================================ LN + QKV (all heads)
def _ln_qkv_kernel(x_ref, g_ref, b_ref, wq_ref, wk_ref, wv_ref,
                   bq_ref, bk_ref, bv_ref, q_ref, k_ref, v_ref,
                   *, num_heads, q_scale):
    x = x_ref[0].astype(jnp.float32)                       # (tt, D)
    xn = _layernorm_f32(x, g_ref[...], b_ref[...]).astype(jnp.bfloat16)
    for h in range(num_heads):                             # static unroll; weights resident
        q = jnp.dot(xn, wq_ref[h], preferred_element_type=jnp.float32) + bq_ref[h]
        q_ref[0, h] = (q * jnp.float32(q_scale)).astype(q_ref.dtype)
        k = jnp.dot(xn, wk_ref[h], preferred_element_type=jnp.float32) + bk_ref[h]
        k_ref[0, h] = k.astype(k_ref.dtype)
        v = jnp.dot(xn, wv_ref[h], preferred_element_type=jnp.float32) + bv_ref[h]
        v_ref[0, h] = v.astype(v_ref.dtype)


def ln_qkv_heads(x3d, ln_g, ln_b, wq, wk, wv, bq, bk, bv, num_heads, *, scale,
                 tt_target=128):
    B, T, D = x3d.shape
    dh = D // num_heads
    tt = _pick_tile(T, tt_target)
    grid = (B, T // tt)

    x_spec = pl.BlockSpec((1, tt, D), lambda b, i: (b, i, 0))
    vec_spec = pl.BlockSpec((1, D), lambda b, i: (0, 0))
    w_spec = pl.BlockSpec((num_heads, D, dh), lambda b, i: (0, 0, 0))
    b_spec = pl.BlockSpec((num_heads, 1, dh), lambda b, i: (0, 0, 0))
    o_spec = pl.BlockSpec((1, num_heads, tt, dh), lambda b, i: (b, 0, i, 0))
    out_sds = jax.ShapeDtypeStruct((B, num_heads, T, dh), jnp.bfloat16)

    return pl.pallas_call(
        functools.partial(_ln_qkv_kernel, num_heads=num_heads, q_scale=scale),
        grid=grid,
        in_specs=[x_spec, vec_spec, vec_spec,
                  w_spec, w_spec, w_spec, b_spec, b_spec, b_spec],
        out_specs=(o_spec, o_spec, o_spec),
        out_shape=(out_sds, out_sds, out_sds),
        compiler_params=_cparams(("parallel", "parallel")),
    )(x3d,
      ln_g.reshape(1, D).astype(jnp.float32), ln_b.reshape(1, D).astype(jnp.float32),
      wq.astype(jnp.bfloat16), wk.astype(jnp.bfloat16), wv.astype(jnp.bfloat16),
      bq.astype(jnp.float32), bk.astype(jnp.float32), bv.astype(jnp.float32))


# ============================================================================ flash attention + out-proj + residual
def _mhsa_attn_kernel(lens_ref, q_ref, k_ref, v_ref, wo_ref, bo_ref, res_ref, o_ref,
                      m_sc, l_sc, acc_sc, out_sc, *, tk):
    b = pl.program_id(0)
    h = pl.program_id(2)
    ki = pl.program_id(3)
    nh = pl.num_programs(2)
    nk = pl.num_programs(3)

    @pl.when(jnp.logical_and(h == 0, ki == 0))
    def _():
        out_sc[...] = jnp.zeros(out_sc.shape, jnp.float32)

    @pl.when(ki == 0)
    def _():
        m_sc[...] = jnp.full(m_sc.shape, -jnp.inf, jnp.float32)
        l_sc[...] = jnp.zeros(l_sc.shape, jnp.float32)
        acc_sc[...] = jnp.zeros(acc_sc.shape, jnp.float32)

    q = q_ref[0, 0]                                        # (tq, dh) bf16, pre-scaled
    k = k_ref[0, 0]                                        # (tk, dh) bf16
    s = jax.lax.dot_general(q, k, (((1,), (1,)), ((), ())),
                            preferred_element_type=jnp.float32)
    kpos = ki * tk + jax.lax.broadcasted_iota(jnp.int32, s.shape, 1)
    valid = kpos < lens_ref[b]
    s = jnp.where(valid, s, jnp.float32(-1e30))

    m_prev = m_sc[...]
    m_new = jnp.maximum(m_prev, jnp.max(s, axis=-1, keepdims=True))
    alpha = jnp.exp(m_prev - m_new)
    p = jnp.where(valid, jnp.exp(s - m_new), jnp.float32(0.0))
    l_sc[...] = alpha * l_sc[...] + jnp.sum(p, axis=-1, keepdims=True)
    acc_sc[...] = alpha * acc_sc[...] + jnp.dot(
        p.astype(v_ref.dtype), v_ref[0, 0], preferred_element_type=jnp.float32)
    m_sc[...] = m_new

    @pl.when(ki == nk - 1)
    def _():
        attn = (acc_sc[...] *
                pl.reciprocal(l_sc[...], approx=True)).astype(jnp.bfloat16)
        out_sc[...] += jnp.dot(attn, wo_ref[h], preferred_element_type=jnp.float32)

    @pl.when(jnp.logical_and(h == nh - 1, ki == nk - 1))
    def _():
        o_ref[0] = (out_sc[...] + bo_ref[...] +
                    res_ref[0].astype(jnp.float32)).astype(o_ref.dtype)


def mhsa_attention(q, k, v, wo, bo, residual, lens, *, tq_target=128, tk_target=128):
    B, H, T, dh = q.shape
    D = wo.shape[2]
    tq = _pick_tile(T, tq_target)
    tk = _pick_tile(T, tk_target)
    grid = (B, T // tq, H, T // tk)

    q_spec = pl.BlockSpec((1, 1, tq, dh), lambda b, qi, h, ki, lr: (b, h, qi, 0))
    kv_spec = pl.BlockSpec((1, 1, tk, dh), lambda b, qi, h, ki, lr: (b, h, ki, 0))
    wo_spec = pl.BlockSpec((H, dh, D), lambda b, qi, h, ki, lr: (0, 0, 0))
    bo_spec = pl.BlockSpec((1, D), lambda b, qi, h, ki, lr: (0, 0))
    res_spec = pl.BlockSpec((1, tq, D), lambda b, qi, h, ki, lr: (b, qi, 0))
    o_spec = pl.BlockSpec((1, tq, D), lambda b, qi, h, ki, lr: (b, qi, 0))

    grid_spec = pltpu.PrefetchScalarGridSpec(
        num_scalar_prefetch=1,
        grid=grid,
        in_specs=[q_spec, kv_spec, kv_spec, wo_spec, bo_spec, res_spec],
        out_specs=o_spec,
        scratch_shapes=[pltpu.VMEM((tq, 1), jnp.float32),
                        pltpu.VMEM((tq, 1), jnp.float32),
                        pltpu.VMEM((tq, dh), jnp.float32),
                        pltpu.VMEM((tq, D), jnp.float32)],
    )
    return pl.pallas_call(
        functools.partial(_mhsa_attn_kernel, tk=tk),
        grid_spec=grid_spec,
        out_shape=jax.ShapeDtypeStruct((B, T, D), jnp.bfloat16),
        compiler_params=_cparams(("parallel", "parallel", "arbitrary", "arbitrary")),
    )(lens, q, k, v, wo.astype(jnp.bfloat16),
      bo.reshape(1, D).astype(jnp.float32), residual)


# ============================================================================ dwconv + BN + SiLU + pw2 + residual
def _conv_core_kernel(x_ref, dw_ref, db_ref, sc_ref, sh_ref, w2_ref, b2_ref, res_ref,
                      o_ref, *, ksize, t_len):
    x = x_ref[0].astype(jnp.float32)          # (T + K - 1, D)
    w = dw_ref[...]                           # (K, D) f32
    acc = jnp.zeros((t_len, x.shape[1]), jnp.float32)
    for kk in range(ksize):                   # K small & static -> unrolled
        acc = acc + x[kk:kk + t_len, :] * w[kk:kk + 1, :]
    y = acc + db_ref[...]
    y = y * sc_ref[...] + sh_ref[...]         # folded BatchNorm1d (eval, running stats)
    y = y * jax.nn.sigmoid(y)                 # SiLU
    y = jnp.dot(y.astype(jnp.bfloat16), w2_ref[...],
                preferred_element_type=jnp.float32) + b2_ref[...]
    y = y + res_ref[0].astype(jnp.float32)    # conv-module residual
    o_ref[0] = y.astype(o_ref.dtype)


def conv_core(x3d_glu, dw_w, dw_b, bn_scale, bn_shift, pw2_w, pw2_b, residual3d):
    B, T, D = x3d_glu.shape
    K = dw_w.shape[0]
    pad = (K - 1) // 2
    x_pad = jnp.pad(x3d_glu, ((0, 0), (pad, pad), (0, 0)))
    Tp = T + 2 * pad
    return pl.pallas_call(
        functools.partial(_conv_core_kernel, ksize=K, t_len=T),
        grid=(B,),
        in_specs=[
            pl.BlockSpec((1, Tp, D), lambda b: (b, 0, 0)),
            pl.BlockSpec((K, D), lambda b: (0, 0)),
            pl.BlockSpec((1, D), lambda b: (0, 0)),
            pl.BlockSpec((1, D), lambda b: (0, 0)),
            pl.BlockSpec((1, D), lambda b: (0, 0)),
            pl.BlockSpec((D, D), lambda b: (0, 0)),
            pl.BlockSpec((1, D), lambda b: (0, 0)),
            pl.BlockSpec((1, T, D), lambda b: (b, 0, 0)),
        ],
        out_specs=pl.BlockSpec((1, T, D), lambda b: (b, 0, 0)),
        out_shape=jax.ShapeDtypeStruct((B, T, D), jnp.bfloat16),
        compiler_params=_cparams(("parallel",)),
    )(x_pad, dw_w.astype(jnp.float32), dw_b.reshape(1, D).astype(jnp.float32),
      bn_scale.reshape(1, D).astype(jnp.float32),
      bn_shift.reshape(1, D).astype(jnp.float32),
      pw2_w.astype(jnp.bfloat16), pw2_b.reshape(1, D).astype(jnp.float32), residual3d)


# ============================================================================ conformer block
def conformer_block(x3d, lens, p, num_heads):
    B, T, D = x3d.shape
    x2 = x3d.reshape(B * T, D)

    # --- FF1 (one fused kernel incl. 0.5-residual) --------------------------------
    x2 = fused_ffn(x2, p["ff1"])

    # --- Conv module: (LN -> pw1 -> GLU), (dwconv -> BN -> SiLU -> pw2 -> +res) ---
    cv = p["conv"]
    g = fused_linear(x2, ln_in=(cv["ln_g"], cv["ln_b"]),
                     glu=(cv["pw1_wv"], cv["pw1_wg"], cv["pw1_bv"], cv["pw1_bg"]))
    x3 = conv_core(g.reshape(B, T, D), cv["dw_w"], cv["dw_b"],
                   cv["bn_scale"], cv["bn_shift"], cv["pw2_w"], cv["pw2_b"],
                   x2.reshape(B, T, D))

    # --- MHSA: (LN -> QKV all heads), flash-attn + out-proj + residual fused ------
    mh = p["mhsa"]
    dh = D // num_heads
    q, k, v = ln_qkv_heads(x3, mh["ln_g"], mh["ln_b"],
                           mh["wq"], mh["wk"], mh["wv"],
                           mh["bq"], mh["bk"], mh["bv"], num_heads,
                           scale=1.0 / math.sqrt(dh))
    x3 = mhsa_attention(q, k, v, mh["wo"], mh["bo"], x3, lens)
    x2 = x3.reshape(B * T, D)

    # --- FF2 + block-final LayerNorm (one fused kernel) ---------------------------
    x2 = fused_ffn(x2, p["ff2"], ln_out=(p["final_ln_g"], p["final_ln_b"]))
    return x2.reshape(B, T, D)


@functools.partial(jax.jit, static_argnames=("num_heads",))
def conformer_ctc_forward(params, audio_features, audio_features_len, *, num_heads):
    """Eval forward of ConformerCTCModel with recog_num_mods == 48 (-> output index 1)."""
    B, T, F_in = audio_features.shape
    lens = audio_features_len.astype(jnp.int32)
    sequence_mask = (jnp.arange(T)[None, :] < lens[:, None]).astype(jnp.float32)

    fe = params["frontend"]
    D = fe["w"].shape[1]
    x2 = fused_linear(audio_features.reshape(B * T, F_in).astype(jnp.bfloat16),
                      w=fe["w"], b=fe["b"])
    x3 = x2.reshape(B, T, D)
    for blk in params["blocks"]:
        x3 = conformer_block(x3, lens, blk, num_heads)

    w_fin, b_fin = params["final"][1]  # branch i == 1 for recog_num_mods == 48
    log_probs = fused_linear(x3.reshape(B * T, D), w=w_fin, b=b_fin,
                             log_softmax=True, out_dtype=jnp.float32, tm_target=128)
    return log_probs.reshape(B, T, -1), sequence_mask


# ============================================================================ params
def init_params(key, F_in, D, FF, H, K, V, num_layers):
    dh = D // H
    keys = jax.random.split(key, num_layers * 12 + 8)
    kit = iter(keys)

    def nrm(shape, dtype=jnp.bfloat16, scale=0.02):
        return (scale * jax.random.normal(next(kit), shape, jnp.float32)).astype(dtype)

    def zeros(shape, dtype=jnp.float32):
        return jnp.zeros(shape, dtype)

    def ones(shape, dtype=jnp.float32):
        return jnp.ones(shape, dtype)

    def ff_params():
        return {"ln_g": ones((D,)), "ln_b": zeros((D,)),
                "w1": nrm((D, FF)), "b1": zeros((FF,)),
                "w2": nrm((FF, D)), "b2": zeros((D,))}

    def mhsa_params():
        return {"ln_g": ones((D,)), "ln_b": zeros((D,)),
                "wq": nrm((H, D, dh)), "wk": nrm((H, D, dh)), "wv": nrm((H, D, dh)),
                "bq": zeros((H, 1, dh)), "bk": zeros((H, 1, dh)), "bv": zeros((H, 1, dh)),
                "wo": nrm((H, dh, D)), "bo": zeros((D,))}

    def conv_params():
        bn_g, bn_b = ones((D,)), zeros((D,))
        bn_mean, bn_var = zeros((D,)), ones((D,))
        bn_scale = bn_g / jnp.sqrt(bn_var + _BN_EPS)
        bn_shift = bn_b - bn_mean * bn_scale
        return {"ln_g": ones((D,)), "ln_b": zeros((D,)),
                "pw1_wv": nrm((D, D)), "pw1_wg": nrm((D, D)),
                "pw1_bv": zeros((D,)), "pw1_bg": zeros((D,)),
                "dw_w": nrm((K, D), jnp.float32), "dw_b": zeros((D,)),
                "bn_scale": bn_scale, "bn_shift": bn_shift,
                "pw2_w": nrm((D, D)), "pw2_b": zeros((D,))}

    params = {
        "frontend": {"w": nrm((F_in, D)), "b": zeros((D,))},
        "blocks": [],
        "final": [(nrm((D, V)), zeros((V,))) for _ in range(3)],
        # only used by the training-time Gumbel top-k module selection (not executed here)
        "gates": jnp.full((num_layers * 4,), 0.5, jnp.float32),
    }
    for _ in range(num_layers):
        params["blocks"].append({
            "ff1": ff_params(), "ff2": ff_params(),
            "mhsa": mhsa_params(), "conv": conv_params(),
            "final_ln_g": ones((D,)), "final_ln_b": zeros((D,)),
        })
    return params


# ============================================================================ main
if __name__ == "__main__":
    B, T, F_IN, D, FF, H, KCONV, VOCAB, LAYERS = 2, 8, 16, 32, 64, 4, 7, 16, 2
    key = jax.random.PRNGKey(0)
    pkey, dkey = jax.random.split(key)
    params = init_params(pkey, F_IN, D, FF, H, KCONV, VOCAB, LAYERS)
    audio_features = jax.random.normal(dkey, (B, T, F_IN), jnp.float32)
    audio_features_len = jnp.array([8, 6], dtype=jnp.int32)

    log_probs, seq_mask = conformer_ctc_forward(
        params, audio_features, audio_features_len, num_heads=H)
    jax.block_until_ready(log_probs)

    assert log_probs.shape == (B, T, VOCAB)
    assert seq_mask.shape == (B, T)
    assert bool(jnp.all(jnp.isfinite(log_probs)))
    # log_softmax sanity: probabilities sum to ~1 per frame
    assert bool(jnp.allclose(jnp.exp(log_probs).sum(-1), 1.0, atol=2e-3))
    print("KERNEL_OK")
</pallas_src>

<mosaic_0001>
module attributes {stable_mosaic.version = 11 : i64} {
  func.func @_fused_linear_kernel(%arg0: i32, %arg1: memref<16x16xbf16, #tpu.memory_space<vmem>>, %arg2: memref<16x32xbf16, #tpu.memory_space<vmem>>, %arg3: memref<1x32xf32, #tpu.memory_space<vmem>>, %arg4: memref<16x32xbf16, #tpu.memory_space<vmem>>) attributes {dimension_semantics = [#tpu.dimension_semantics<parallel>], iteration_bounds = array<i64: 1>, scalar_prefetch = 0 : i64, scratch_operands = 0 : i64, tpu.core_type = #tpu.core_type<tc>, window_params = [{transform_indices = @transform_0, window_bounds = array<i64: 16, 16>}, {pipeline_mode = #tpu.pipeline_mode<synchronous>, transform_indices = @transform_1, window_bounds = array<i64: 16, 32>}, {pipeline_mode = #tpu.pipeline_mode<synchronous>, transform_indices = @transform_2, window_bounds = array<i64: 1, 32>}, {transform_indices = @transform_3, window_bounds = array<i64: 16, 32>}]} {
    %c0 = arith.constant 0 : index
    %c0_0 = arith.constant 0 : index
    %0 = vector.load %arg1[%c0, %c0_0] : memref<16x16xbf16, #tpu.memory_space<vmem>>, vector<16x16xbf16>
    %1 = arith.extf %0 : vector<16x16xbf16> to vector<16x16xf32>
    %2 = arith.truncf %1 : vector<16x16xf32> to vector<16x16xbf16>
    %c0_1 = arith.constant 0 : index
    %c0_2 = arith.constant 0 : index
    %3 = vector.load %arg2[%c0_1, %c0_2] : memref<16x32xbf16, #tpu.memory_space<vmem>>, vector<16x32xbf16>
    %cst = arith.constant dense<0.000000e+00> : vector<16x32xf32>
    %4 = tpu.matmul %2, %3, %cst {dimension_numbers = #tpu.dot_dimension_numbers<[1], [0], [0], [1], [0, 0, 1, 1], [], []>} : vector<16x16xbf16>, vector<16x32xbf16>, vector<16x32xf32> -> vector<16x32xf32>
    %c0_3 = arith.constant 0 : index
    %c0_4 = arith.constant 0 : index
    %5 = vector.load %arg3[%c0_3, %c0_4] : memref<1x32xf32, #tpu.memory_space<vmem>>, vector<1x32xf32>
    %6 = vector.broadcast %5 : vector<1x32xf32> to vector<16x32xf32>
    %7 = arith.addf %4, %6 : vector<16x32xf32>
    %8 = arith.truncf %7 : vector<16x32xf32> to vector<16x32xbf16>
    %c0_5 = arith.constant 0 : index
    %c0_6 = arith.constant 0 : index
    %9 = vector.load %arg4[%c0_5, %c0_6] : memref<16x32xbf16, #tpu.memory_space<vmem>>, vector<16x32xbf16>
    tpu.vector_store %arg4[%c0_5, %c0_6], %8 {strides = array<i32>} : memref<16x32xbf16, #tpu.memory_space<vmem>>, vector<16x32xbf16>,
    return
  }
  func.func @transform_0(%arg0: i32) -> (i32, i32) {
    %c0_i32 = arith.constant 0 : i32
    %c0_i32_0 = arith.constant 0 : i32
    return %arg0, %c0_i32 : i32, i32
  }
  func.func @transform_1(%arg0: i32) -> (i32, i32) {
    %c0_i32 = arith.constant 0 : i32
    %c0_i32_0 = arith.constant 0 : i32
    %c0_i32_1 = arith.constant 0 : i32
    return %c0_i32, %c0_i32_0 : i32, i32
  }
  func.func @transform_2(%arg0: i32) -> (i32, i32) {
    %c0_i32 = arith.constant 0 : i32
    %c0_i32_0 = arith.constant 0 : i32
    %c0_i32_1 = arith.constant 0 : i32
    return %c0_i32, %c0_i32_0 : i32, i32
  }
  func.func @transform_3(%arg0: i32) -> (i32, i32) {
    %c0_i32 = arith.constant 0 : i32
    %c0_i32_0 = arith.constant 0 : i32
    return %arg0, %c0_i32 : i32, i32
  }
}

module attributes {stable_mosaic.version = 11 : i64} {
  func.func @_ffn_kernel(%arg0: i32, %arg1: memref<16x32xbf16, #tpu.memory_space<vmem>>, %arg2: memref<1x32xf32, #tpu.memory_space<vmem>>, %arg3: memref<1x32xf32, #tpu.memory_space<vmem>>, %arg4: memref<32x64xbf16, #tpu.memory_space<vmem>>, %arg5: memref<1x64xf32, #tpu.memory_space<vmem>>, %arg6: memref<64x32xbf16, #tpu.memory_space<vmem>>, %arg7: memref<1x32xf32, #tpu.memory_space<vmem>>, %arg8: memref<16x32xbf16, #tpu.memory_space<vmem>>) attributes {dimension_semantics = [#tpu.dimension_semantics<parallel>], iteration_bounds = array<i64: 1>, scalar_prefetch = 0 : i64, scratch_operands = 0 : i64, tpu.core_type = #tpu.core_type<tc>, window_params = [{transform_indices = @transform_0, window_bounds = array<i64: 16, 32>}, {pipeline_mode = #tpu.pipeline_mode<synchronous>, transform_indices = @transform_1, window_bounds = array<i64: 1, 32>}, {pipeline_mode = #tpu.pipeline_mode<synchronous>, transform_indices = @transform_2, window_bounds = array<i64: 1, 32>}, {pipeline_mode = #tpu.pipeline_mode<synchronous>, transform_indices = @transform_3, window_bounds = array<i64: 32, 64>}, {pipeline_mode = #tpu.pipeline_mode<synchronous>, transform_indices = @transform_4, window_bounds = array<i64: 1, 64>}, {pipeline_mode = #tpu.pipeline_mode<synchronous>, transform_indices = @transform_5, window_bounds = array<i64: 64, 32>}, {pipeline_mode = #tpu.pipeline_mode<synchronous>, transform_indices = @transform_6, window_bounds = array<i64: 1, 32>}, {transform_indices = @transform_7, window_bounds = array<i64: 16, 32>}]} {
    %c0 = arith.constant 0 : index
    %c0_0 = arith.constant 0 : index
    %0 = vector.load %arg1[%c0, %c0_0] : memref<16x32xbf16, #tpu.memory_space<vmem>>, vector<16x32xbf16>
    %1 = arith.extf %0 : vector<16x32xbf16> to vector<16x32xf32>
    %c0_1 = arith.constant 0 : index
    %c0_2 = arith.constant 0 : index
    %2 = vector.load %arg2[%c0_1, %c0_2] : memref<1x32xf32, #tpu.memory_space<vmem>>, vector<1x32xf32>
    %c0_3 = arith.constant 0 : index
    %c0_4 = arith.constant 0 : index
    %3 = vector.load %arg3[%c0_3, %c0_4] : memref<1x32xf32, #tpu.memory_space<vmem>>, vector<1x32xf32>
    %cst = arith.constant dense<0.000000e+00> : vector<16xf32>
    %4 = vector.multi_reduction <add>, %1, %cst [1] : vector<16x32xf32> to vector<16xf32>
    %5 = vector.shape_cast %4 : vector<16xf32> to vector<16x1xf32>
    %cst_5 = arith.constant 3.200000e+01 : f32
    %6 = vector.broadcast %cst_5 : f32 to vector<16x1xf32>
    %7 = arith.divf %5, %6 : vector<16x1xf32>
    %8 = vector.broadcast %7 : vector<16x1xf32> to vector<16x32xf32>
    %9 = arith.subf %1, %8 : vector<16x32xf32>
    %10 = arith.mulf %9, %9 : vector<16x32xf32>
    %cst_6 = arith.constant dense<0.000000e+00> : vector<16xf32>
    %11 = vector.multi_reduction <add>, %10, %cst_6 [1] : vector<16x32xf32> to vector<16xf32>
    %12 = vector.shape_cast %11 : vector<16xf32> to vector<16x1xf32>
    %cst_7 = arith.constant 3.200000e+01 : f32
    %13 = vector.broadcast %cst_7 : f32 to vector<16x1xf32>
    %14 = arith.divf %12, %13 : vector<16x1xf32>
    %15 = vector.broadcast %7 : vector<16x1xf32> to vector<16x32xf32>
    %16 = arith.subf %1, %15 : vector<16x32xf32>
    %cst_8 = arith.constant 9.99999974E-6 : f32
    %17 = vector.broadcast %cst_8 : f32 to vector<16x1xf32>
    %18 = arith.addf %14, %17 : vector<16x1xf32>
    %19 = math.rsqrt %18 : vector<16x1xf32>
    %20 = vector.broadcast %19 : vector<16x1xf32> to vector<16x32xf32>
    %21 = arith.mulf %16, %20 : vector<16x32xf32>
    %22 = vector.broadcast %2 : vector<1x32xf32> to vector<16x32xf32>
    %23 = arith.mulf %21, %22 : vector<16x32xf32>
    %24 = vector.broadcast %3 : vector<1x32xf32> to vector<16x32xf32>
    %25 = arith.addf %23, %24 : vector<16x32xf32>
    %26 = arith.truncf %25 : vector<16x32xf32> to vector<16x32xbf16>
    %c0_9 = arith.constant 0 : index
    %c0_10 = arith.constant 0 : index
    %27 = vector.load %arg4[%c0_9, %c0_10] : memref<32x64xbf16, #tpu.memory_space<vmem>>, vector<32x64xbf16>
    %cst_11 = arith.constant dense<0.000000e+00> : vector<16x64xf32>
    %28 = tpu.matmul %26, %27, %cst_11 {dimension_numbers = #tpu.dot_dimension_numbers<[1], [0], [0], [1], [0, 0, 1, 1], [], []>} : vector<16x32xbf16>, vector<32x64xbf16>, vector<16x64xf32> -> vector<16x64xf32>
    %c0_12 = arith.constant 0 : index
    %c0_13 = arith.constant 0 : index
    %29 = vector.load %arg5[%c0_12, %c0_13] : memref<1x64xf32, #tpu.memory_space<vmem>>, vector<1x64xf32>
    %30 = vector.broadcast %29 : vector<1x64xf32> to vector<16x64xf32>
    %31 = arith.addf %28, %30 : vector<16x64xf32>
    %32 = arith.negf %31 : vector<16x64xf32>
    %33 = math.exp %32 : vector<16x64xf32>
    %cst_14 = arith.constant 1.000000e+00 : f32
    %34 = vector.broadcast %cst_14 : f32 to vector<16x64xf32>
    %35 = arith.addf %34, %33 : vector<16x64xf32>
    %36 = arith.divf %34, %35 : vector<16x64xf32>
    %37 = arith.mulf %31, %36 : vector<16x64xf32>
    %38 = arith.truncf %37 : vector<16x64xf32> to vector<16x64xbf16>
    %c0_15 = arith.constant 0 : index
    %c0_16 = arith.constant 0 : index
    %39 = vector.load %arg6[%c0_15, %c0_16] : memref<64x32xbf16, #tpu.memory_space<vmem>>, vector<64x32xbf16>
    %cst_17 = arith.constant dense<0.000000e+00> : vector<16x32xf32>
    %40 = tpu.matmul %38, %39, %cst_17 {dimension_numbers = #tpu.dot_dimension_numbers<[1], [0], [0], [1], [0, 0, 1, 1], [], []>} : vector<16x64xbf16>, vector<64x32xbf16>, vector<16x32xf32> -> vector<16x32xf32>
    %c0_18 = arith.constant 0 : index
    %c0_19 = arith.constant 0 : index
    %41 = vector.load %arg7[%c0_18, %c0_19] : memref<1x32xf32, #tpu.memory_space<vmem>>, vector<1x32xf32>
    %42 = vector.broadcast %41 : vector<1x32xf32> to vector<16x32xf32>
    %43 = arith.addf %40, %42 : vector<16x32xf32>
    %cst_20 = arith.constant 5.000000e-01 : f32
    %44 = vector.broadcast %cst_20 : f32 to vector<16x32xf32>
    %45 = arith.mulf %43, %44 : vector<16x32xf32>
    %46 = arith.addf %45, %1 : vector<16x32xf32>
    %47 = arith.truncf %46 : vector<16x32xf32> to vector<16x32xbf16>
    %c0_21 = arith.constant 0 : index
    %c0_22 = arith.constant 0 : index
    %48 = vector.load %arg8[%c0_21, %c0_22] : memref<16x32xbf16, #tpu.memory_space<vmem>>, vector<16x32xbf16>
    tpu.vector_store %arg8[%c0_21, %c0_22], %47 {strides = array<i32>} : memref<16x32xbf16, #tpu.memory_space<vmem>>, vector<16x32xbf16>,
    return
  }
  func.func @transform_0(%arg0: i32) -> (i32, i32) {
    %c0_i32 = arith.constant 0 : i32
    %c0_i32_0 = arith.constant 0 : i32
    return %arg0, %c0_i32 : i32, i32
  }
  func.func @transform_1(%arg0: i32) -> (i32, i32) {
    %c0_i32 = arith.constant 0 : i32
    %c0_i32_0 = arith.constant 0 : i32
    %c0_i32_1 = arith.constant 0 : i32
    return %c0_i32, %c0_i32_0 : i32, i32
  }
  func.func @transform_2(%arg0: i32) -> (i32, i32) {
    %c0_i32 = arith.constant 0 : i32
    %c0_i32_0 = arith.constant 0 : i32
    %c0_i32_1 = arith.constant 0 : i32
    return %c0_i32, %c0_i32_0 : i32, i32
  }
  func.func @transform_3(%arg0: i32) -> (i32, i32) {
    %c0_i32 = arith.constant 0 : i32
    %c0_i32_0 = arith.constant 0 : i32
    %c0_i32_1 = arith.constant 0 : i32
    return %c0_i32, %c0_i32_0 : i32, i32
  }
  func.func @transform_4(%arg0: i32) -> (i32, i32) {
    %c0_i32 = arith.constant 0 : i32
    %c0_i32_0 = arith.constant 0 : i32
    %c0_i32_1 = arith.constant 0 : i32
    return %c0_i32, %c0_i32_0 : i32, i32
  }
  func.func @transform_5(%arg0: i32) -> (i32, i32) {
    %c0_i32 = arith.constant 0 : i32
    %c0_i32_0 = arith.constant 0 : i32
    %c0_i32_1 = arith.constant 0 : i32
    return %c0_i32, %c0_i32_0 : i32, i32
  }
  func.func @transform_6(%arg0: i32) -> (i32, i32) {
    %c0_i32 = arith.constant 0 : i32
    %c0_i32_0 = arith.constant 0 : i32
    %c0_i32_1 = arith.constant 0 : i32
    return %c0_i32, %c0_i32_0 : i32, i32
  }
  func.func @transform_7(%arg0: i32) -> (i32, i32) {
    %c0_i32 = arith.constant 0 : i32
    %c0_i32_0 = arith.constant 0 : i32
    return %arg0, %c0_i32 : i32, i32
  }
}

module attributes {stable_mosaic.version = 11 : i64} {
  func.func @_fused_linear_kernel(%arg0: i32, %arg1: memref<16x32xbf16, #tpu.memory_space<vmem>>, %arg2: memref<1x32xf32, #tpu.memory_space<vmem>>, %arg3: memref<1x32xf32, #tpu.memory_space<vmem>>, %arg4: memref<32x32xbf16, #tpu.memory_space<vmem>>, %arg5: memref<32x32xbf16, #tpu.memory_space<vmem>>, %arg6: memref<1x32xf32, #tpu.memory_space<vmem>>, %arg7: memref<1x32xf32, #tpu.memory_space<vmem>>, %arg8: memref<16x32xbf16, #tpu.memory_space<vmem>>) attributes {dimension_semantics = [#tpu.dimension_semantics<parallel>], iteration_bounds = array<i64: 1>, scalar_prefetch = 0 : i64, scratch_operands = 0 : i64, tpu.core_type = #tpu.core_type<tc>, window_params = [{transform_indices = @transform_0, window_bounds = array<i64: 16, 32>}, {pipeline_mode = #tpu.pipeline_mode<synchronous>, transform_indices = @transform_1, window_bounds = array<i64: 1, 32>}, {pipeline_mode = #tpu.pipeline_mode<synchronous>, transform_indices = @transform_2, window_bounds = array<i64: 1, 32>}, {pipeline_mode = #tpu.pipeline_mode<synchronous>, transform_indices = @transform_3, window_bounds = array<i64: 32, 32>}, {pipeline_mode = #tpu.pipeline_mode<synchronous>, transform_indices = @transform_4, window_bounds = array<i64: 32, 32>}, {pipeline_mode = #tpu.pipeline_mode<synchronous>, transform_indices = @transform_5, window_bounds = array<i64: 1, 32>}, {pipeline_mode = #tpu.pipeline_mode<synchronous>, transform_indices = @transform_6, window_bounds = array<i64: 1, 32>}, {transform_indices = @transform_7, window_bounds = array<i64: 16, 32>}]} {
    %c0 = arith.constant 0 : index
    %c0_0 = arith.constant 0 : index
    %0 = vector.load %arg1[%c0, %c0_0] : memref<16x32xbf16, #tpu.memory_space<vmem>>, vector<16x32xbf16>
    %1 = arith.extf %0 : vector<16x32xbf16> to vector<16x32xf32>
    %c0_1 = arith.constant 0 : index
    %c0_2 = arith.constant 0 : index
    %2 = vector.load %arg2[%c0_1, %c0_2] : memref<1x32xf32, #tpu.memory_space<vmem>>, vector<1x32xf32>
    %c0_3 = arith.constant 0 : index
    %c0_4 = arith.constant 0 : index
    %3 = vector.load %arg3[%c0_3, %c0_4] : memref<1x32xf32, #tpu.memory_space<vmem>>, vector<1x32xf32>
    %cst = arith.constant dense<0.000000e+00> : vector<16xf32>
    %4 = vector.multi_reduction <add>, %1, %cst [1] : vector<16x32xf32> to vector<16xf32>
    %5 = vector.shape_cast %4 : vector<16xf32> to vector<16x1xf32>
    %cst_5 = arith.constant 3.200000e+01 : f32
    %6 = vector.broadcast %cst_5 : f32 to vector<16x1xf32>
    %7 = arith.divf %5, %6 : vector<16x1xf32>
    %8 = vector.broadcast %7 : vector<16x1xf32> to vector<16x32xf32>
    %9 = arith.subf %1, %8 : vector<16x32xf32>
    %10 = arith.mulf %9, %9 : vector<16x32xf32>
    %cst_6 = arith.constant dense<0.000000e+00> : vector<16xf32>
    %11 = vector.multi_reduction <add>, %10, %cst_6 [1] : vector<16x32xf32> to vector<16xf32>
    %12 = vector.shape_cast %11 : vector<16xf32> to vector<16x1xf32>
    %cst_7 = arith.constant 3.200000e+01 : f32
    %13 = vector.broadcast %cst_7 : f32 to vector<16x1xf32>
    %14 = arith.divf %12, %13 : vector<16x1xf32>
    %15 = vector.broadcast %7 : vector<16x1xf32> to vector<16x32xf32>
    %16 = arith.subf %1, %15 : vector<16x32xf32>
    %cst_8 = arith.constant 9.99999974E-6 : f32
    %17 = vector.broadcast %cst_8 : f32 to vector<16x1xf32>
    %18 = arith.addf %14, %17 : vector<16x1xf32>
    %19 = math.rsqrt %18 : vector<16x1xf32>
    %20 = vector.broadcast %19 : vector<16x1xf32> to vector<16x32xf32>
    %21 = arith.mulf %16, %20 : vector<16x32xf32>
    %22 = vector.broadcast %2 : vector<1x32xf32> to vector<16x32xf32>
    %23 = arith.mulf %21, %22 : vector<16x32xf32>
    %24 = vector.broadcast %3 : vector<1x32xf32> to vector<16x32xf32>
    %25 = arith.addf %23, %24 : vector<16x32xf32>
    %26 = arith.truncf %25 : vector<16x32xf32> to vector<16x32xbf16>
    %c0_9 = arith.constant 0 : index
    %c0_10 = arith.constant 0 : index
    %27 = vector.load %arg4[%c0_9, %c0_10] : memref<32x32xbf16, #tpu.memory_space<vmem>>, vector<32x32xbf16>
    %cst_11 = arith.constant dense<0.000000e+00> : vector<16x32xf32>
    %28 = tpu.matmul %26, %27, %cst_11 {dimension_numbers = #tpu.dot_dimension_numbers<[1], [0], [0], [1], [0, 0, 1, 1], [], []>} : vector<16x32xbf16>, vector<32x32xbf16>, vector<16x32xf32> -> vector<16x32xf32>
    %c0_12 = arith.constant 0 : index
    %c0_13 = arith.constant 0 : index
    %29 = vector.load %arg6[%c0_12, %c0_13] : memref<1x32xf32, #tpu.memory_space<vmem>>, vector<1x32xf32>
    %30 = vector.broadcast %29 : vector<1x32xf32> to vector<16x32xf32>
    %31 = arith.addf %28, %30 : vector<16x32xf32>
    %c0_14 = arith.constant 0 : index
    %c0_15 = arith.constant 0 : index
    %32 = vector.load %arg5[%c0_14, %c0_15] : memref<32x32xbf16, #tpu.memory_space<vmem>>, vector<32x32xbf16>
    %cst_16 = arith.constant dense<0.000000e+00> : vector<16x32xf32>
    %33 = tpu.matmul %26, %32, %cst_16 {dimension_numbers = #tpu.dot_dimension_numbers<[1], [0], [0], [1], [0, 0, 1, 1], [], []>} : vector<16x32xbf16>, vector<32x32xbf16>, vector<16x32xf32> -> vector<16x32xf32>
    %c0_17 = arith.constant 0 : index
    %c0_18 = arith.constant 0 : index
    %34 = vector.load %arg7[%c0_17, %c0_18] : memref<1x32xf32, #tpu.memory_space<vmem>>, vector<1x32xf32>
    %35 = vector.broadcast %34 : vector<1x32xf32> to vector<16x32xf32>
    %36 = arith.addf %33, %35 : vector<16x32xf32>
    %37 = arith.negf %36 : vector<16x32xf32>
    %38 = math.exp %37 : vector<16x32xf32>
    %cst_19 = arith.constant 1.000000e+00 : f32
    %39 = vector.broadcast %cst_19 : f32 to vector<16x32xf32>
    %40 = arith.addf %39, %38 : vector<16x32xf32>
    %41 = arith.divf %39, %40 : vector<16x32xf32>
    %42 = arith.mulf %31, %41 : vector<16x32xf32>
    %43 = arith.truncf %42 : vector<16x32xf32> to vector<16x32xbf16>
    %c0_20 = arith.constant 0 : index
    %c0_21 = arith.constant 0 : index
    %44 = vector.load %arg8[%c0_20, %c0_21] : memref<16x32xbf16, #tpu.memory_space<vmem>>, vector<16x32xbf16>
    tpu.vector_store %arg8[%c0_20, %c0_21], %43 {strides = array<i32>} : memref<16x32xbf16, #tpu.memory_space<vmem>>, vector<16x32xbf16>,
    return
  }
  func.func @transform_0(%arg0: i32) -> (i32, i32) {
    %c0_i32 = arith.constant 0 : i32
    %c0_i32_0 = arith.constant 0 : i32
    return %arg0, %c0_i32 : i32, i32
  }
  func.func @transform_1(%arg0: i32) -> (i32, i32) {
    %c0_i32 = arith.constant 0 : i32
    %c0_i32_0 = arith.constant 0 : i32
    %c0_i32_1 = arith.constant 0 : i32
    return %c0_i32, %c0_i32_0 : i32, i32
  }
  func.func @transform_2(%arg0: i32) -> (i32, i32) {
    %c0_i32 = arith.constant 0 : i32
    %c0_i32_0 = arith.constant 0 : i32
    %c0_i32_1 = arith.constant 0 : i32
    return %c0_i32, %c0_i32_0 : i32, i32
  }
  func.func @transform_3(%arg0: i32) -> (i32, i32) {
    %c0_i32 = arith.constant 0 : i32
    %c0_i32_0 = arith.constant 0 : i32
    %c0_i32_1 = arith.constant 0 : i32
    return %c0_i32, %c0_i32_0 : i32, i32
  }
  func.func @transform_4(%arg0: i32) -> (i32, i32) {
    %c0_i32 = arith.constant 0 : i32
    %c0_i32_0 = arith.constant 0 : i32
    %c0_i32_1 = arith.constant 0 : i32
    return %c0_i32, %c0_i32_0 : i32, i32
  }
  func.func @transform_5(%arg0: i32) -> (i32, i32) {
    %c0_i32 = arith.constant 0 : i32
    %c0_i32_0 = arith.constant 0 : i32
    %c0_i32_1 = arith.constant 0 : i32
    return %c0_i32, %c0_i32_0 : i32, i32
  }
  func.func @transform_6(%arg0: i32) -> (i32, i32) {
    %c0_i32 = arith.constant 0 : i32
    %c0_i32_0 = arith.constant 0 : i32
    %c0_i32_1 = arith.constant 0 : i32
    return %c0_i32, %c0_i32_0 : i32, i32
  }
  func.func @transform_7(%arg0: i32) -> (i32, i32) {
    %c0_i32 = arith.constant 0 : i32
    %c0_i32_0 = arith.constant 0 : i32
    return %arg0, %c0_i32 : i32, i32
  }
}

module attributes {stable_mosaic.version = 11 : i64} {
  func.func @_conv_core_kernel(%arg0: i32, %arg1: memref<1x14x32xbf16, #tpu.memory_space<vmem>>, %arg2: memref<7x32xf32, #tpu.memory_space<vmem>>, %arg3: memref<1x32xf32, #tpu.memory_space<vmem>>, %arg4: memref<1x32xf32, #tpu.memory_space<vmem>>, %arg5: memref<1x32xf32, #tpu.memory_space<vmem>>, %arg6: memref<32x32xbf16, #tpu.memory_space<vmem>>, %arg7: memref<1x32xf32, #tpu.memory_space<vmem>>, %arg8: memref<1x8x32xbf16, #tpu.memory_space<vmem>>, %arg9: memref<1x8x32xbf16, #tpu.memory_space<vmem>>) attributes {dimension_semantics = [#tpu.dimension_semantics<parallel>], iteration_bounds = array<i64: 2>, scalar_prefetch = 0 : i64, scratch_operands = 0 : i64, tpu.core_type = #tpu.core_type<tc>, window_params = [{transform_indices = @transform_0, window_bounds = array<i64: 1, 14, 32>}, {pipeline_mode = #tpu.pipeline_mode<synchronous>, transform_indices = @transform_1, window_bounds = array<i64: 7, 32>}, {pipeline_mode = #tpu.pipeline_mode<synchronous>, transform_indices = @transform_2, window_bounds = array<i64: 1, 32>}, {pipeline_mode = #tpu.pipeline_mode<synchronous>, transform_indices = @transform_3, window_bounds = array<i64: 1, 32>}, {pipeline_mode = #tpu.pipeline_mode<synchronous>, transform_indices = @transform_4, window_bounds = array<i64: 1, 32>}, {pipeline_mode = #tpu.pipeline_mode<synchronous>, transform_indices = @transform_5, window_bounds = array<i64: 32, 32>}, {pipeline_mode = #tpu.pipeline_mode<synchronous>, transform_indices = @transform_6, window_bounds = array<i64: 1, 32>}, {transform_indices = @transform_7, window_bounds = array<i64: 1, 8, 32>}, {transform_indices = @transform_8, window_bounds = array<i64: 1, 8, 32>}]} {
    %c0 = arith.constant 0 : index
    %c0_0 = arith.constant 0 : index
    %c0_1 = arith.constant 0 : index
    %0 = vector.load %arg1[%c0, %c0_0, %c0_1] : memref<1x14x32xbf16, #tpu.memory_space<vmem>>, vector<1x14x32xbf16>
    %1 = vector.shape_cast %0 : vector<1x14x32xbf16> to vector<14x32xbf16>
    %2 = arith.extf %1 : vector<14x32xbf16> to vector<14x32xf32>
    %c0_2 = arith.constant 0 : index
    %c0_3 = arith.constant 0 : index
    %3 = vector.load %arg2[%c0_2, %c0_3] : memref<7x32xf32, #tpu.memory_space<vmem>>, vector<7x32xf32>
    %cst = arith.constant 0.000000e+00 : f32
    %4 = vector.broadcast %cst : f32 to vector<8x32xf32>
    %5 = vector.extract_strided_slice %2 {offsets = [0, 0], sizes = [8, 32], strides = [1, 1]} : vector<14x32xf32> to vector<8x32xf32>
    %6 = vector.extract_strided_slice %3 {offsets = [0, 0], sizes = [1, 32], strides = [1, 1]} : vector<7x32xf32> to vector<1x32xf32>
    %7 = vector.broadcast %6 : vector<1x32xf32> to vector<8x32xf32>
    %8 = arith.mulf %5, %7 : vector<8x32xf32>
    %9 = arith.addf %4, %8 : vector<8x32xf32>
    %10 = vector.extract_strided_slice %2 {offsets = [1, 0], sizes = [8, 32], strides = [1, 1]} : vector<14x32xf32> to vector<8x32xf32>
    %11 = vector.extract_strided_slice %3 {offsets = [1, 0], sizes = [1, 32], strides = [1, 1]} : vector<7x32xf32> to vector<1x32xf32>
    %12 = vector.broadcast %11 : vector<1x32xf32> to vector<8x32xf32>
    %13 = arith.mulf %10, %12 : vector<8x32xf32>
    %14 = arith.addf %9, %13 : vector<8x32xf32>
    %15 = vector.extract_strided_slice %2 {offsets = [2, 0], sizes = [8, 32], strides = [1, 1]} : vector<14x32xf32> to vector<8x32xf32>
    %16 = vector.extract_strided_slice %3 {offsets = [2, 0], sizes = [1, 32], strides = [1, 1]} : vector<7x32xf32> to vector<1x32xf32>
    %17 = vector.broadcast %16 : vector<1x32xf32> to vector<8x32xf32>
    %18 = arith.mulf %15, %17 : vector<8x32xf32>
    %19 = arith.addf %14, %18 : vector<8x32xf32>
    %20 = vector.extract_strided_slice %2 {offsets = [3, 0], sizes = [8, 32], strides = [1, 1]} : vector<14x32xf32> to vector<8x32xf32>
    %21 = vector.extract_strided_slice %3 {offsets = [3, 0], sizes = [1, 32], strides = [1, 1]} : vector<7x32xf32> to vector<1x32xf32>
    %22 = vector.broadcast %21 : vector<1x32xf32> to vector<8x32xf32>
    %23 = arith.mulf %20, %22 : vector<8x32xf32>
    %24 = arith.addf %19, %23 : vector<8x32xf32>
    %25 = vector.extract_strided_slice %2 {offsets = [4, 0], sizes = [8, 32], strides = [1, 1]} : vector<14x32xf32> to vector<8x32xf32>
    %26 = vector.extract_strided_slice %3 {offsets = [4, 0], sizes = [1, 32], strides = [1, 1]} : vector<7x32xf32> to vector<1x32xf32>
    %27 = vector.broadcast %26 : vector<1x32xf32> to vector<8x32xf32>
    %28 = arith.mulf %25, %27 : vector<8x32xf32>
    %29 = arith.addf %24, %28 : vector<8x32xf32>
    %30 = vector.extract_strided_slice %2 {offsets = [5, 0], sizes = [8, 32], strides = [1, 1]} : vector<14x32xf32> to vector<8x32xf32>
    %31 = vector.extract_strided_slice %3 {offsets = [5, 0], sizes = [1, 32], strides = [1, 1]} : vector<7x32xf32> to vector<1x32xf32>
    %32 = vector.broadcast %31 : vector<1x32xf32> to vector<8x32xf32>
    %33 = arith.mulf %30, %32 : vector<8x32xf32>
    %34 = arith.addf %29, %33 : vector<8x32xf32>
    %35 = vector.extract_strided_slice %2 {offsets = [6, 0], sizes = [8, 32], strides = [1, 1]} : vector<14x32xf32> to vector<8x32xf32>
    %36 = vector.extract_strided_slice %3 {offsets = [6, 0], sizes = [1, 32], strides = [1, 1]} : vector<7x32xf32> to vector<1x32xf32>
    %37 = vector.broadcast %36 : vector<1x32xf32> to vector<8x32xf32>
    %38 = arith.mulf %35, %37 : vector<8x32xf32>
    %39 = arith.addf %34, %38 : vector<8x32xf32>
    %c0_4 = arith.constant 0 : index
    %c0_5 = arith.constant 0 : index
    %40 = vector.load %arg3[%c0_4, %c0_5] : memref<1x32xf32, #tpu.memory_space<vmem>>, vector<1x32xf32>
    %41 = vector.broadcast %40 : vector<1x32xf32> to vector<8x32xf32>
    %42 = arith.addf %39, %41 : vector<8x32xf32>
    %c0_6 = arith.constant 0 : index
    %c0_7 = arith.constant 0 : index
    %43 = vector.load %arg4[%c0_6, %c0_7] : memref<1x32xf32, #tpu.memory_space<vmem>>, vector<1x32xf32>
    %44 = vector.broadcast %43 : vector<1x32xf32> to vector<8x32xf32>
    %45 = arith.mulf %42, %44 : vector<8x32xf32>
    %c0_8 = arith.constant 0 : index
    %c0_9 = arith.constant 0 : index
    %46 = vector.load %arg5[%c0_8, %c0_9] : memref<1x32xf32, #tpu.memory_space<vmem>>, vector<1x32xf32>
    %47 = vector.broadcast %46 : vector<1x32xf32> to vector<8x32xf32>
    %48 = arith.addf %45, %47 : vector<8x32xf32>
    %49 = arith.negf %48 : vector<8x32xf32>
    %50 = math.exp %49 : vector<8x32xf32>
    %cst_10 = arith.constant 1.000000e+00 : f32
    %51 = vector.broadcast %cst_10 : f32 to vector<8x32xf32>
    %52 = arith.addf %51, %50 : vector<8x32xf32>
    %53 = arith.divf %51, %52 : vector<8x32xf32>
    %54 = arith.mulf %48, %53 : vector<8x32xf32>
    %55 = arith.truncf %54 : vector<8x32xf32> to vector<8x32xbf16>
    %c0_11 = arith.constant 0 : index
    %c0_12 = arith.constant 0 : index
    %56 = vector.load %arg6[%c0_11, %c0_12] : memref<32x32xbf16, #tpu.memory_space<vmem>>, vector<32x32xbf16>
    %cst_13 = arith.constant dense<0.000000e+00> : vector<8x32xf32>
    %57 = tpu.matmul %55, %56, %cst_13 {dimension_numbers = #tpu.dot_dimension_numbers<[1], [0], [0], [1], [0, 0, 1, 1], [], []>} : vector<8x32xbf16>, vector<32x32xbf16>, vector<8x32xf32> -> vector<8x32xf32>
    %c0_14 = arith.constant 0 : index
    %c0_15 = arith.constant 0 : index
    %58 = vector.load %arg7[%c0_14, %c0_15] : memref<1x32xf32, #tpu.memory_space<vmem>>, vector<1x32xf32>
    %59 = vector.broadcast %58 : vector<1x32xf32> to vector<8x32xf32>
    %60 = arith.addf %57, %59 : vector<8x32xf32>
    %c0_16 = arith.constant 0 : index
    %c0_17 = arith.constant 0 : index
    %c0_18 = arith.constant 0 : index
    %61 = vector.load %arg8[%c0_16, %c0_17, %c0_18] : memref<1x8x32xbf16, #tpu.memory_space<vmem>>, vector<1x8x32xbf16>
    %62 = vector.shape_cast %61 : vector<1x8x32xbf16> to vector<8x32xbf16>
    %63 = arith.extf %62 : vector<8x32xbf16> to vector<8x32xf32>
    %64 = arith.addf %60, %63 : vector<8x32xf32>
    %65 = arith.truncf %64 : vector<8x32xf32> to vector<8x32xbf16>
    %c0_19 = arith.constant 0 : index
    %c0_20 = arith.constant 0 : index
    %c0_21 = arith.constant 0 : index
    %66 = vector.load %arg9[%c0_19, %c0_20, %c0_21] : memref<1x8x32xbf16, #tpu.memory_space<vmem>>, vector<1x8x32xbf16>
    %67 = vector.shape_cast %66 : vector<1x8x32xbf16> to vector<8x32xbf16>
    %68 = vector.shape_cast %65 : vector<8x32xbf16> to vector<1x8x32xbf16>
    tpu.vector_store %arg9[%c0_19, %c0_20, %c0_21], %68 {strides = array<i32>} : memref<1x8x32xbf16, #tpu.memory_space<vmem>>, vector<1x8x32xbf16>,
    return
  }
  func.func @transform_0(%arg0: i32) -> (i32, i32, i32) {
    %c0_i32 = arith.constant 0 : i32
    %c0_i32_0 = arith.constant 0 : i32
    %c0_i32_1 = arith.constant 0 : i32
    return %arg0, %c0_i32, %c0_i32_0 : i32, i32, i32
  }
  func.func @transform_1(%arg0: i32) -> (i32, i32) {
    %c0_i32 = arith.constant 0 : i32
    %c0_i32_0 = arith.constant 0 : i32
    %c0_i32_1 = arith.constant 0 : i32
    return %c0_i32, %c0_i32_0 : i32, i32
  }
  func.func @transform_2(%arg0: i32) -> (i32, i32) {
    %c0_i32 = arith.constant 0 : i32
    %c0_i32_0 = arith.constant 0 : i32
    %c0_i32_1 = arith.constant 0 : i32
    return %c0_i32, %c0_i32_0 : i32, i32
  }
  func.func @transform_3(%arg0: i32) -> (i32, i32) {
    %c0_i32 = arith.constant 0 : i32
    %c0_i32_0 = arith.constant 0 : i32
    %c0_i32_1 = arith.constant 0 : i32
    return %c0_i32, %c0_i32_0 : i32, i32
  }
  func.func @transform_4(%arg0: i32) -> (i32, i32) {
    %c0_i32 = arith.constant 0 : i32
    %c0_i32_0 = arith.constant 0 : i32
    %c0_i32_1 = arith.constant 0 : i32
    return %c0_i32, %c0_i32_0 : i32, i32
  }
  func.func @transform_5(%arg0: i32) -> (i32, i32) {
    %c0_i32 = arith.constant 0 : i32
    %c0_i32_0 = arith.constant 0 : i32
    %c0_i32_1 = arith.constant 0 : i32
    return %c0_i32, %c0_i32_0 : i32, i32
  }
  func.func @transform_6(%arg0: i32) -> (i32, i32) {
    %c0_i32 = arith.constant 0 : i32
    %c0_i32_0 = arith.constant 0 : i32
    %c0_i32_1 = arith.constant 0 : i32
    return %c0_i32, %c0_i32_0 : i32, i32
  }
  func.func @transform_7(%arg0: i32) -> (i32, i32, i32) {
    %c0_i32 = arith.constant 0 : i32
    %c0_i32_0 = arith.constant 0 : i32
    %c0_i32_1 = arith.constant 0 : i32
    return %arg0, %c0_i32, %c0_i32_0 : i32, i32, i32
  }
  func.func @transform_8(%arg0: i32) -> (i32, i32, i32) {
    %c0_i32 = arith.constant 0 : i32
    %c0_i32_0 = arith.constant 0 : i32
    %c0_i32_1 = arith.constant 0 : i32
    return %arg0, %c0_i32, %c0_i32_0 : i32, i32, i32
  }
}

module attributes {stable_mosaic.version = 11 : i64} {
  func.func @_ln_qkv_kernel(%arg0: i32, %arg1: i32, %arg2: memref<1x8x32xbf16, #tpu.memory_space<vmem>>, %arg3: memref<1x32xf32, #tpu.memory_space<vmem>>, %arg4: memref<1x32xf32, #tpu.memory_space<vmem>>, %arg5: memref<4x32x8xbf16, #tpu.memory_space<vmem>>, %arg6: memref<4x32x8xbf16, #tpu.memory_space<vmem>>, %arg7: memref<4x32x8xbf16, #tpu.memory_space<vmem>>, %arg8: memref<4x1x8xf32, #tpu.memory_space<vmem>>, %arg9: memref<4x1x8xf32, #tpu.memory_space<vmem>>, %arg10: memref<4x1x8xf32, #tpu.memory_space<vmem>>, %arg11: memref<1x4x8x8xbf16, #tpu.memory_space<vmem>>, %arg12: memref<1x4x8x8xbf16, #tpu.memory_space<vmem>>, %arg13: memref<1x4x8x8xbf16, #tpu.memory_space<vmem>>) attributes {dimension_semantics = [#tpu.dimension_semantics<parallel>, #tpu.dimension_semantics<parallel>], iteration_bounds = array<i64: 2, 1>, scalar_prefetch = 0 : i64, scratch_operands = 0 : i64, tpu.core_type = #tpu.core_type<tc>, window_params = [{transform_indices = @transform_0, window_bounds = array<i64: 1, 8, 32>}, {pipeline_mode = #tpu.pipeline_mode<synchronous>, transform_indices = @transform_1, window_bounds = array<i64: 1, 32>}, {pipeline_mode = #tpu.pipeline_mode<synchronous>, transform_indices = @transform_2, window_bounds = array<i64: 1, 32>}, {pipeline_mode = #tpu.pipeline_mode<synchronous>, transform_indices = @transform_3, window_bounds = array<i64: 4, 32, 8>}, {pipeline_mode = #tpu.pipeline_mode<synchronous>, transform_indices = @transform_4, window_bounds = array<i64: 4, 32, 8>}, {pipeline_mode = #tpu.pipeline_mode<synchronous>, transform_indices = @transform_5, window_bounds = array<i64: 4, 32, 8>}, {pipeline_mode = #tpu.pipeline_mode<synchronous>, transform_indices = @transform_6, window_bounds = array<i64: 4, 1, 8>}, {pipeline_mode = #tpu.pipeline_mode<synchronous>, transform_indices = @transform_7, window_bounds = array<i64: 4, 1, 8>}, {pipeline_mode = #tpu.pipeline_mode<synchronous>, transform_indices = @transform_8, window_bounds = array<i64: 4, 1, 8>}, {transform_indices = @transform_9, window_bounds = array<i64: 1, 4, 8, 8>}, {transform_indices = @transform_10, window_bounds = array<i64: 1, 4, 8, 8>}, {transform_indices = @transform_11, window_bounds = array<i64: 1, 4, 8, 8>}]} {
    %c0 = arith.constant 0 : index
    %c0_0 = arith.constant 0 : index
    %c0_1 = arith.constant 0 : index
    %0 = vector.load %arg2[%c0, %c0_0, %c0_1] : memref<1x8x32xbf16, #tpu.memory_space<vmem>>, vector<1x8x32xbf16>
    %1 = vector.shape_cast %0 : vector<1x8x32xbf16> to vector<8x32xbf16>
    %2 = arith.extf %1 : vector<8x32xbf16> to vector<8x32xf32>
    %c0_2 = arith.constant 0 : index
    %c0_3 = arith.constant 0 : index
    %3 = vector.load %arg3[%c0_2, %c0_3] : memref<1x32xf32, #tpu.memory_space<vmem>>, vector<1x32xf32>
    %c0_4 = arith.constant 0 : index
    %c0_5 = arith.constant 0 : index
    %4 = vector.load %arg4[%c0_4, %c0_5] : memref<1x32xf32, #tpu.memory_space<vmem>>, vector<1x32xf32>
    %cst = arith.constant dense<0.000000e+00> : vector<8xf32>
    %5 = vector.multi_reduction <add>, %2, %cst [1] : vector<8x32xf32> to vector<8xf32>
    %6 = vector.shape_cast %5 : vector<8xf32> to vector<8x1xf32>
    %cst_6 = arith.constant 3.200000e+01 : f32
    %7 = vector.broadcast %cst_6 : f32 to vector<8x1xf32>
    %8 = arith.divf %6, %7 : vector<8x1xf32>
    %9 = vector.broadcast %8 : vector<8x1xf32> to vector<8x32xf32>
    %10 = arith.subf %2, %9 : vector<8x32xf32>
    %11 = arith.mulf %10, %10 : vector<8x32xf32>
    %cst_7 = arith.constant dense<0.000000e+00> : vector<8xf32>
    %12 = vector.multi_reduction <add>, %11, %cst_7 [1] : vector<8x32xf32> to vector<8xf32>
    %13 = vector.shape_cast %12 : vector<8xf32> to vector<8x1xf32>
    %cst_8 = arith.constant 3.200000e+01 : f32
    %14 = vector.broadcast %cst_8 : f32 to vector<8x1xf32>
    %15 = arith.divf %13, %14 : vector<8x1xf32>
    %16 = vector.broadcast %8 : vector<8x1xf32> to vector<8x32xf32>
    %17 = arith.subf %2, %16 : vector<8x32xf32>
    %cst_9 = arith.constant 9.99999974E-6 : f32
    %18 = vector.broadcast %cst_9 : f32 to vector<8x1xf32>
    %19 = arith.addf %15, %18 : vector<8x1xf32>
    %20 = math.rsqrt %19 : vector<8x1xf32>
    %21 = vector.broadcast %20 : vector<8x1xf32> to vector<8x32xf32>
    %22 = arith.mulf %17, %21 : vector<8x32xf32>
    %23 = vector.broadcast %3 : vector<1x32xf32> to vector<8x32xf32>
    %24 = arith.mulf %22, %23 : vector<8x32xf32>
    %25 = vector.broadcast %4 : vector<1x32xf32> to vector<8x32xf32>
    %26 = arith.addf %24, %25 : vector<8x32xf32>
    %27 = arith.truncf %26 : vector<8x32xf32> to vector<8x32xbf16>
    %c0_10 = arith.constant 0 : index
    %c0_11 = arith.constant 0 : index
    %c0_12 = arith.constant 0 : index
    %28 = vector.load %arg5[%c0_10, %c0_11, %c0_12] : memref<4x32x8xbf16, #tpu.memory_space<vmem>>, vector<1x32x8xbf16>
    %29 = vector.shape_cast %28 : vector<1x32x8xbf16> to vector<32x8xbf16>
    %cst_13 = arith.constant dense<0.000000e+00> : vector<8x8xf32>
    %30 = tpu.matmul %27, %29, %cst_13 {dimension_numbers = #tpu.dot_dimension_numbers<[1], [0], [0], [1], [0, 0, 1, 1], [], []>} : vector<8x32xbf16>, vector<32x8xbf16>, vector<8x8xf32> -> vector<8x8xf32>
    %c0_14 = arith.constant 0 : index
    %c0_15 = arith.constant 0 : index
    %c0_16 = arith.constant 0 : index
    %31 = vector.load %arg8[%c0_14, %c0_15, %c0_16] : memref<4x1x8xf32, #tpu.memory_space<vmem>>, vector<1x1x8xf32>
    %32 = vector.shape_cast %31 : vector<1x1x8xf32> to vector<1x8xf32>
    %33 = vector.broadcast %32 : vector<1x8xf32> to vector<8x8xf32>
    %34 = arith.addf %30, %33 : vector<8x8xf32>
    %cst_17 = arith.constant 0.353553385 : f32
    %35 = vector.broadcast %cst_17 : f32 to vector<8x8xf32>
    %36 = arith.mulf %34, %35 : vector<8x8xf32>
    %37 = arith.truncf %36 : vector<8x8xf32> to vector<8x8xbf16>
    %c0_18 = arith.constant 0 : index
    %c0_19 = arith.constant 0 : index
    %c0_20 = arith.constant 0 : index
    %c0_21 = arith.constant 0 : index
    %38 = vector.load %arg11[%c0_18, %c0_19, %c0_20, %c0_21] : memref<1x4x8x8xbf16, #tpu.memory_space<vmem>>, vector<1x1x8x8xbf16>
    %39 = vector.shape_cast %38 : vector<1x1x8x8xbf16> to vector<8x8xbf16>
    %40 = vector.shape_cast %37 : vector<8x8xbf16> to vector<1x1x8x8xbf16>
    tpu.vector_store %arg11[%c0_18, %c0_19, %c0_20, %c0_21], %40 {strides = array<i32>} : memref<1x4x8x8xbf16, #tpu.memory_space<vmem>>, vector<1x1x8x8xbf16>,
    %c0_22 = arith.constant 0 : index
    %c0_23 = arith.constant 0 : index
    %c0_24 = arith.constant 0 : index
    %41 = vector.load %arg6[%c0_22, %c0_23, %c0_24] : memref<4x32x8xbf16, #tpu.memory_space<vmem>>, vector<1x32x8xbf16>
    %42 = vector.shape_cast %41 : vector<1x32x8xbf16> to vector<32x8xbf16>
    %cst_25 = arith.constant dense<0.000000e+00> : vector<8x8xf32>
    %43 = tpu.matmul %27, %42, %cst_25 {dimension_numbers = #tpu.dot_dimension_numbers<[1], [0], [0], [1], [0, 0, 1, 1], [], []>} : vector<8x32xbf16>, vector<32x8xbf16>, vector<8x8xf32> -> vector<8x8xf32>
    %c0_26 = arith.constant 0 : index
    %c0_27 = arith.constant 0 : index
    %c0_28 = arith.constant 0 : index
    %44 = vector.load %arg9[%c0_26, %c0_27, %c0_28] : memref<4x1x8xf32, #tpu.memory_space<vmem>>, vector<1x1x8xf32>
    %45 = vector.shape_cast %44 : vector<1x1x8xf32> to vector<1x8xf32>
    %46 = vector.broadcast %45 : vector<1x8xf32> to vector<8x8xf32>
    %47 = arith.addf %43, %46 : vector<8x8xf32>
    %48 = arith.truncf %47 : vector<8x8xf32> to vector<8x8xbf16>
    %c0_29 = arith.constant 0 : index
    %c0_30 = arith.constant 0 : index
    %c0_31 = arith.constant 0 : index
    %c0_32 = arith.constant 0 : index
    %49 = vector.load %arg12[%c0_29, %c0_30, %c0_31, %c0_32] : memref<1x4x8x8xbf16, #tpu.memory_space<vmem>>, vector<1x1x8x8xbf16>
    %50 = vector.shape_cast %49 : vector<1x1x8x8xbf16> to vector<8x8xbf16>
    %51 = vector.shape_cast %48 : vector<8x8xbf16> to vector<1x1x8x8xbf16>
    tpu.vector_store %arg12[%c0_29, %c0_30, %c0_31, %c0_32], %51 {strides = array<i32>} : memref<1x4x8x8xbf16, #tpu.memory_space<vmem>>, vector<1x1x8x8xbf16>,
    %c0_33 = arith.constant 0 : index
    %c0_34 = arith.constant 0 : index
    %c0_35 = arith.constant 0 : index
    %52 = vector.load %arg7[%c0_33, %c0_34, %c0_35] : memref<4x32x8xbf16, #tpu.memory_space<vmem>>, vector<1x32x8xbf16>
    %53 = vector.shape_cast %52 : vector<1x32x8xbf16> to vector<32x8xbf16>
    %cst_36 = arith.constant dense<0.000000e+00> : vector<8x8xf32>
    %54 = tpu.matmul %27, %53, %cst_36 {dimension_numbers = #tpu.dot_dimension_numbers<[1], [0], [0], [1], [0, 0, 1, 1], [], []>} : vector<8x32xbf16>, vector<32x8xbf16>, vector<8x8xf32> -> vector<8x8xf32>
    %c0_37 = arith.constant 0 : index
    %c0_38 = arith.constant 0 : index
    %c0_39 = arith.constant 0 : index
    %55 = vector.load %arg10[%c0_37, %c0_38, %c0_39] : memref<4x1x8xf32, #tpu.memory_space<vmem>>, vector<1x1x8xf32>
    %56 = vector.shape_cast %55 : vector<1x1x8xf32> to vector<1x8xf32>
    %57 = vector.broadcast %56 : vector<1x8xf32> to vector<8x8xf32>
    %58 = arith.addf %54, %57 : vector<8x8xf32>
    %59 = arith.truncf %58 : vector<8x8xf32> to vector<8x8xbf16>
    %c0_40 = arith.constant 0 : index
    %c0_41 = arith.constant 0 : index
    %c0_42 = arith.constant 0 : index
    %c0_43 = arith.constant 0 : index
    %60 = vector.load %arg13[%c0_40, %c0_41, %c0_42, %c0_43] : memref<1x4x8x8xbf16, #tpu.memory_space<vmem>>, vector<1x1x8x8xbf16>
    %61 = vector.shape_cast %60 : vector<1x1x8x8xbf16> to vector<8x8xbf16>
    %62 = vector.shape_cast %59 : vector<8x8xbf16> to vector<1x1x8x8xbf16>
    tpu.vector_store %arg13[%c0_40, %c0_41, %c0_42, %c0_43], %62 {strides = array<i32>} : memref<1x4x8x8xbf16, #tpu.memory_space<vmem>>, vector<1x1x8x8xbf16>,
    %c1 = arith.constant 1 : index
    %c0_44 = arith.constant 0 : index
    %c0_45 = arith.constant 0 : index
    %63 = vector.load %arg5[%c1, %c0_44, %c0_45] : memref<4x32x8xbf16, #tpu.memory_space<vmem>>, vector<1x32x8xbf16>
    %64 = vector.shape_cast %63 : vector<1x32x8xbf16> to vector<32x8xbf16>
    %cst_46 = arith.constant dense<0.000000e+00> : vector<8x8xf32>
    %65 = tpu.matmul %27, %64, %cst_46 {dimension_numbers = #tpu.dot_dimension_numbers<[1], [0], [0], [1], [0, 0, 1, 1], [], []>} : vector<8x32xbf16>, vector<32x8xbf16>, vector<8x8xf32> -> vector<8x8xf32>
    %c1_47 = arith.constant 1 : index
    %c0_48 = arith.constant 0 : index
    %c0_49 = arith.constant 0 : index
    %66 = vector.load %arg8[%c1_47, %c0_48, %c0_49] : memref<4x1x8xf32, #tpu.memory_space<vmem>>, vector<1x1x8xf32>
    %67 = vector.shape_cast %66 : vector<1x1x8xf32> to vector<1x8xf32>
    %68 = vector.broadcast %67 : vector<1x8xf32> to vector<8x8xf32>
    %69 = arith.addf %65, %68 : vector<8x8xf32>
    %cst_50 = arith.constant 0.353553385 : f32
    %70 = vector.broadcast %cst_50 : f32 to vector<8x8xf32>
    %71 = arith.mulf %69, %70 : vector<8x8xf32>
    %72 = arith.truncf %71 : vector<8x8xf32> to vector<8x8xbf16>
    %c0_51 = arith.constant 0 : index
    %c1_52 = arith.constant 1 : index
    %c0_53 = arith.constant 0 : index
    %c0_54 = arith.constant 0 : index
    %73 = vector.load %arg11[%c0_51, %c1_52, %c0_53, %c0_54] : memref<1x4x8x8xbf16, #tpu.memory_space<vmem>>, vector<1x1x8x8xbf16>
    %74 = vector.shape_cast %73 : vector<1x1x8x8xbf16> to vector<8x8xbf16>
    %75 = vector.shape_cast %72 : vector<8x8xbf16> to vector<1x1x8x8xbf16>
    tpu.vector_store %arg11[%c0_51, %c1_52, %c0_53, %c0_54], %75 {strides = array<i32>} : memref<1x4x8x8xbf16, #tpu.memory_space<vmem>>, vector<1x1x8x8xbf16>,
    %c1_55 = arith.constant 1 : index
    %c0_56 = arith.constant 0 : index
    %c0_57 = arith.constant 0 : index
    %76 = vector.load %arg6[%c1_55, %c0_56, %c0_57] : memref<4x32x8xbf16, #tpu.memory_space<vmem>>, vector<1x32x8xbf16>
    %77 = vector.shape_cast %76 : vector<1x32x8xbf16> to vector<32x8xbf16>
    %cst_58 = arith.constant dense<0.000000e+00> : vector<8x8xf32>
    %78 = tpu.matmul %27, %77, %cst_58 {dimension_numbers = #tpu.dot_dimension_numbers<[1], [0], [0], [1], [0, 0, 1, 1], [], []>} : vector<8x32xbf16>, vector<32x8xbf16>, vector<8x8xf32> -> vector<8x8xf32>
    %c1_59 = arith.constant 1 : index
    %c0_60 = arith.constant 0 : index
    %c0_61 = arith.constant 0 : index
    %79 = vector.load %arg9[%c1_59, %c0_60, %c0_61] : memref<4x1x8xf32, #tpu.memory_space<vmem>>, vector<1x1x8xf32>
    %80 = vector.shape_cast %79 : vector<1x1x8xf32> to vector<1x8xf32>
    %81 = vector.broadcast %80 : vector<1x8xf32> to vector<8x8xf32>
    %82 = arith.addf %78, %81 : vector<8x8xf32>
    %83 = arith.truncf %82 : vector<8x8xf32> to vector<8x8xbf16>
    %c0_62 = arith.constant 0 : index
    %c1_63 = arith.constant 1 : index
    %c0_64 = arith.constant 0 : index
    %c0_65 = arith.constant 0 : index
    %84 = vector.load %arg12[%c0_62, %c1_63, %c0_64, %c0_65] : memref<1x4x8x8xbf16, #tpu.memory_space<vmem>>, vector<1x1x8x8xbf16>
    %85 = vector.shape_cast %84 : vector<1x1x8x8xbf16> to vector<8x8xbf16>
    %86 = vector.shape_cast %83 : vector<8x8xbf16> to vector<1x1x8x8xbf16>
    tpu.vector_store %arg12[%c0_62, %c1_63, %c0_64, %c0_65], %86 {strides = array<i32>} : memref<1x4x8x8xbf16, #tpu.memory_space<vmem>>, vector<1x1x8x8xbf16>,
    %c1_66 = arith.constant 1 : index
    %c0_67 = arith.constant 0 : index
    %c0_68 = arith.constant 0 : index
    %87 = vector.load %arg7[%c1_66, %c0_67, %c0_68] : memref<4x32x8xbf16, #tpu.memory_space<vmem>>, vector<1x32x8xbf16>
    %88 = vector.shape_cast %87 : vector<1x32x8xbf16> to vector<32x8xbf16>
    %cst_69 = arith.constant dense<0.000000e+00> : vector<8x8xf32>
    %89 = tpu.matmul %27, %88, %cst_69 {dimension_numbers = #tpu.dot_dimension_numbers<[1], [0], [0], [1], [0, 0, 1, 1], [], []>} : vector<8x32xbf16>, vector<32x8xbf16>, vector<8x8xf32> -> vector<8x8xf32>
    %c1_70 = arith.constant 1 : index
    %c0_71 = arith.constant 0 : index
    %c0_72 = arith.constant 0 : index
    %90 = vector.load %arg10[%c1_70, %c0_71, %c0_72] : memref<4x1x8xf32, #tpu.memory_space<vmem>>, vector<1x1x8xf32>
    %91 = vector.shape_cast %90 : vector<1x1x8xf32> to vector<1x8xf32>
    %92 = vector.broadcast %91 : vector<1x8xf32> to vector<8x8xf32>
    %93 = arith.addf %89, %92 : vector<8x8xf32>
    %94 = arith.truncf %93 : vector<8x8xf32> to vector<8x8xbf16>
    %c0_73 = arith.constant 0 : index
    %c1_74 = arith.constant 1 : index
    %c0_75 = arith.constant 0 : index
    %c0_76 = arith.constant 0 : index
    %95 = vector.load %arg13[%c0_73, %c1_74, %c0_75, %c0_76] : memref<1x4x8x8xbf16, #tpu.memory_space<vmem>>, vector<1x1x8x8xbf16>
    %96 = vector.shape_cast %95 : vector<1x1x8x8xbf16> to vector<8x8xbf16>
    %97 = vector.shape_cast %94 : vector<8x8xbf16> to vector<1x1x8x8xbf16>
    tpu.vector_store %arg13[%c0_73, %c1_74, %c0_75, %c0_76], %97 {strides = array<i32>} : memref<1x4x8x8xbf16, #tpu.memory_space<vmem>>, vector<1x1x8x8xbf16>,
    %c2 = arith.constant 2 : index
    %c0_77 = arith.constant 0 : index
    %c0_78 = arith.constant 0 : index
    %98 = vector.load %arg5[%c2, %c0_77, %c0_78] : memref<4x32x8xbf16, #tpu.memory_space<vmem>>, vector<1x32x8xbf16>
    %99 = vector.shape_cast %98 : vector<1x32x8xbf16> to vector<32x8xbf16>
    %cst_79 = arith.constant dense<0.000000e+00> : vector<8x8xf32>
    %100 = tpu.matmul %27, %99, %cst_79 {dimension_numbers = #tpu.dot_dimension_numbers<[1], [0], [0], [1], [0, 0, 1, 1], [], []>} : vector<8x32xbf16>, vector<32x8xbf16>, vector<8x8xf32> -> vector<8x8xf32>
    %c2_80 = arith.constant 2 : index
    %c0_81 = arith.constant 0 : index
    %c0_82 = arith.constant 0 : index
    %101 = vector.load %arg8[%c2_80, %c0_81, %c0_82] : memref<4x1x8xf32, #tpu.memory_space<vmem>>, vector<1x1x8xf32>
    %102 = vector.shape_cast %101 : vector<1x1x8xf32> to vector<1x8xf32>
    %103 = vector.broadcast %102 : vector<1x8xf32> to vector<8x8xf32>
    %104 = arith.addf %100, %103 : vector<8x8xf32>
    %cst_83 = arith.constant 0.353553385 : f32
    %105 = vector.broadcast %cst_83 : f32 to vector<8x8xf32>
    %106 = arith.mulf %104, %105 : vector<8x8xf32>
    %107 = arith.truncf %106 : vector<8x8xf32> to vector<8x8xbf16>
    %c0_84 = arith.constant 0 : index
    %c2_85 = arith.constant 2 : index
    %c0_86 = arith.constant 0 : index
    %c0_87 = arith.constant 0 : index
    %108 = vector.load %arg11[%c0_84, %c2_85, %c0_86, %c0_87] : memref<1x4x8x8xbf16, #tpu.memory_space<vmem>>, vector<1x1x8x8xbf16>
    %109 = vector.shape_cast %108 : vector<1x1x8x8xbf16> to vector<8x8xbf16>
    %110 = vector.shape_cast %107 : vector<8x8xbf16> to vector<1x1x8x8xbf16>
    tpu.vector_store %arg11[%c0_84, %c2_85, %c0_86, %c0_87], %110 {strides = array<i32>} : memref<1x4x8x8xbf16, #tpu.memory_space<vmem>>, vector<1x1x8x8xbf16>,
    %c2_88 = arith.constant 2 : index
    %c0_89 = arith.constant 0 : index
    %c0_90 = arith.constant 0 : index
    %111 = vector.load %arg6[%c2_88, %c0_89, %c0_90] : memref<4x32x8xbf16, #tpu.memory_space<vmem>>, vector<1x32x8xbf16>
    %112 = vector.shape_cast %111 : vector<1x32x8xbf16> to vector<32x8xbf16>
    %cst_91 = arith.constant dense<0.000000e+00> : vector<8x8xf32>
    %113 = tpu.matmul %27, %112, %cst_91 {dimension_numbers = #tpu.dot_dimension_numbers<[1], [0], [0], [1], [0, 0, 1, 1], [], []>} : vector<8x32xbf16>, vector<32x8xbf16>, vector<8x8xf32> -> vector<8x8xf32>
    %c2_92 = arith.constant 2 : index
    %c0_93 = arith.constant 0 : index
    %c0_94 = arith.constant 0 : index
    %114 = vector.load %arg9[%c2_92, %c0_93, %c0_94] : memref<4x1x8xf32, #tpu.memory_space<vmem>>, vector<1x1x8xf32>
    %115 = vector.shape_cast %114 : vector<1x1x8xf32> to vector<1x8xf32>
    %116 = vector.broadcast %115 : vector<1x8xf32> to vector<8x8xf32>
    %117 = arith.addf %113, %116 : vector<8x8xf32>
    %118 = arith.truncf %117 : vector<8x8xf32> to vector<8x8xbf16>
    %c0_95 = arith.constant 0 : index
    %c2_96 = arith.constant 2 : index
    %c0_97 = arith.constant 0 : index
    %c0_98 = arith.constant 0 : index
    %119 = vector.load %arg12[%c0_95, %c2_96, %c0_97, %c0_98] : memref<1x4x8x8xbf16, #tpu.memory_space<vmem>>, vector<1x1x8x8xbf16>
    %120 = vector.shape_cast %119 : vector<1x1x8x8xbf16> to vector<8x8xbf16>
    %121 = vector.shape_cast %118 : vector<8x8xbf16> to vector<1x1x8x8xbf16>
    tpu.vector_store %arg12[%c0_95, %c2_96, %c0_97, %c0_98], %121 {strides = array<i32>} : memref<1x4x8x8xbf16, #tpu.memory_space<vmem>>, vector<1x1x8x8xbf16>,
    %c2_99 = arith.constant 2 : index
    %c0_100 = arith.constant 0 : index
    %c0_101 = arith.constant 0 : index
    %122 = vector.load %arg7[%c2_99, %c0_100, %c0_101] : memref<4x32x8xbf16, #tpu.memory_space<vmem>>, vector<1x32x8xbf16>
    %123 = vector.shape_cast %122 : vector<1x32x8xbf16> to vector<32x8xbf16>
    %cst_102 = arith.constant dense<0.000000e+00> : vector<8x8xf32>
    %124 = tpu.matmul %27, %123, %cst_102 {dimension_numbers = #tpu.dot_dimension_numbers<[1], [0], [0], [1], [0, 0, 1, 1], [], []>} : vector<8x32xbf16>, vector<32x8xbf16>, vector<8x8xf32> -> vector<8x8xf32>
    %c2_103 = arith.constant 2 : index
    %c0_104 = arith.constant 0 : index
    %c0_105 = arith.constant 0 : index
    %125 = vector.load %arg10[%c2_103, %c0_104, %c0_105] : memref<4x1x8xf32, #tpu.memory_space<vmem>>, vector<1x1x8xf32>
    %126 = vector.shape_cast %125 : vector<1x1x8xf32> to vector<1x8xf32>
    %127 = vector.broadcast %126 : vector<1x8xf32> to vector<8x8xf32>
    %128 = arith.addf %124, %127 : vector<8x8xf32>
    %129 = arith.truncf %128 : vector<8x8xf32> to vector<8x8xbf16>
    %c0_106 = arith.constant 0 : index
    %c2_107 = arith.constant 2 : index
    %c0_108 = arith.constant 0 : index
    %c0_109 = arith.constant 0 : index
    %130 = vector.load %arg13[%c0_106, %c2_107, %c0_108, %c0_109] : memref<1x4x8x8xbf16, #tpu.memory_space<vmem>>, vector<1x1x8x8xbf16>
    %131 = vector.shape_cast %130 : vector<1x1x8x8xbf16> to vector<8x8xbf16>
    %132 = vector.shape_cast %129 : vector<8x8xbf16> to vector<1x1x8x8xbf16>
    tpu.vector_store %arg13[%c0_106, %c2_107, %c0_108, %c0_109], %132 {strides = array<i32>} : memref<1x4x8x8xbf16, #tpu.memory_space<vmem>>, vector<1x1x8x8xbf16>,
    %c3 = arith.constant 3 : index
    %c0_110 = arith.constant 0 : index
    %c0_111 = arith.constant 0 : index
    %133 = vector.load %arg5[%c3, %c0_110, %c0_111] : memref<4x32x8xbf16, #tpu.memory_space<vmem>>, vector<1x32x8xbf16>
    %134 = vector.shape_cast %133 : vector<1x32x8xbf16> to vector<32x8xbf16>
    %cst_112 = arith.constant dense<0.000000e+00> : vector<8x8xf32>
    %135 = tpu.matmul %27, %134, %cst_112 {dimension_numbers = #tpu.dot_dimension_numbers<[1], [0], [0], [1], [0, 0, 1, 1], [], []>} : vector<8x32xbf16>, vector<32x8xbf16>, vector<8x8xf32> -> vector<8x8xf32>
    %c3_113 = arith.constant 3 : index
    %c0_114 = arith.constant 0 : index
    %c0_115 = arith.constant 0 : index
    %136 = vector.load %arg8[%c3_113, %c0_114, %c0_115] : memref<4x1x8xf32, #tpu.memory_space<vmem>>, vector<1x1x8xf32>
    %137 = vector.shape_cast %136 : vector<1x1x8xf32> to vector<1x8xf32>
    %138 = vector.broadcast %137 : vector<1x8xf32> to vector<8x8xf32>
    %139 = arith.addf %135, %138 : vector<8x8xf32>
    %cst_116 = arith.constant 0.353553385 : f32
    %140 = vector.broadcast %cst_116 : f32 to vector<8x8xf32>
    %141 = arith.mulf %139, %140 : vector<8x8xf32>
    %142 = arith.truncf %141 : vector<8x8xf32> to vector<8x8xbf16>
    %c0_117 = arith.constant 0 : index
    %c3_118 = arith.constant 3 : index
    %c0_119 = arith.constant 0 : index
    %c0_120 = arith.constant 0 : index
    %143 = vector.load %arg11[%c0_117, %c3_118, %c0_119, %c0_120] : memref<1x4x8x8xbf16, #tpu.memory_space<vmem>>, vector<1x1x8x8xbf16>
    %144 = vector.shape_cast %143 : vector<1x1x8x8xbf16> to vector<8x8xbf16>
    %145 = vector.shape_cast %142 : vector<8x8xbf16> to vector<1x1x8x8xbf16>
    tpu.vector_store %arg11[%c0_117, %c3_118, %c0_119, %c0_120], %145 {strides = array<i32>} : memref<1x4x8x8xbf16, #tpu.memory_space<vmem>>, vector<1x1x8x8xbf16>,
    %c3_121 = arith.constant 3 : index
    %c0_122 = arith.constant 0 : index
    %c0_123 = arith.constant 0 : index
    %146 = vector.load %arg6[%c3_121, %c0_122, %c0_123] : memref<4x32x8xbf16, #tpu.memory_space<vmem>>, vector<1x32x8xbf16>
    %147 = vector.shape_cast %146 : vector<1x32x8xbf16> to vector<32x8xbf16>
    %cst_124 = arith.constant dense<0.000000e+00> : vector<8x8xf32>
    %148 = tpu.matmul %27, %147, %cst_124 {dimension_numbers = #tpu.dot_dimension_numbers<[1], [0], [0], [1], [0, 0, 1, 1], [], []>} : vector<8x32xbf16>, vector<32x8xbf16>, vector<8x8xf32> -> vector<8x8xf32>
    %c3_125 = arith.constant 3 : index
    %c0_126 = arith.constant 0 : index
    %c0_127 = arith.constant 0 : index
    %149 = vector.load %arg9[%c3_125, %c0_126, %c0_127] : memref<4x1x8xf32, #tpu.memory_space<vmem>>, vector<1x1x8xf32>
    %150 = vector.shape_cast %149 : vector<1x1x8xf32> to vector<1x8xf32>
    %151 = vector.broadcast %150 : vector<1x8xf32> to vector<8x8xf32>
    %152 = arith.addf %148, %151 : vector<8x8xf32>
    %153 = arith.truncf %152 : vector<8x8xf32> to vector<8x8xbf16>
    %c0_128 = arith.constant 0 : index
    %c3_129 = arith.constant 3 : index
    %c0_130 = arith.constant 0 : index
    %c0_131 = arith.constant 0 : index
    %154 = vector.load %arg12[%c0_128, %c3_129, %c0_130, %c0_131] : memref<1x4x8x8xbf16, #tpu.memory_space<vmem>>, vector<1x1x8x8xbf16>
    %155 = vector.shape_cast %154 : vector<1x1x8x8xbf16> to vector<8x8xbf16>
    %156 = vector.shape_cast %153 : vector<8x8xbf16> to vector<1x1x8x8xbf16>
    tpu.vector_store %arg12[%c0_128, %c3_129, %c0_130, %c0_131], %156 {strides = array<i32>} : memref<1x4x8x8xbf16, #tpu.memory_space<vmem>>, vector<1x1x8x8xbf16>,
    %c3_132 = arith.constant 3 : index
    %c0_133 = arith.constant 0 : index
    %c0_134 = arith.constant 0 : index
    %157 = vector.load %arg7[%c3_132, %c0_133, %c0_134] : memref<4x32x8xbf16, #tpu.memory_space<vmem>>, vector<1x32x8xbf16>
    %158 = vector.shape_cast %157 : vector<1x32x8xbf16> to vector<32x8xbf16>
    %cst_135 = arith.constant dense<0.000000e+00> : vector<8x8xf32>
    %159 = tpu.matmul %27, %158, %cst_135 {dimension_numbers = #tpu.dot_dimension_numbers<[1], [0], [0], [1], [0, 0, 1, 1], [], []>} : vector<8x32xbf16>, vector<32x8xbf16>, vector<8x8xf32> -> vector<8x8xf32>
    %c3_136 = arith.constant 3 : index
    %c0_137 = arith.constant 0 : index
    %c0_138 = arith.constant 0 : index
    %160 = vector.load %arg10[%c3_136, %c0_137, %c0_138] : memref<4x1x8xf32, #tpu.memory_space<vmem>>, vector<1x1x8xf32>
    %161 = vector.shape_cast %160 : vector<1x1x8xf32> to vector<1x8xf32>
    %162 = vector.broadcast %161 : vector<1x8xf32> to vector<8x8xf32>
    %163 = arith.addf %159, %162 : vector<8x8xf32>
    %164 = arith.truncf %163 : vector<8x8xf32> to vector<8x8xbf16>
    %c0_139 = arith.constant 0 : index
    %c3_140 = arith.constant 3 : index
    %c0_141 = arith.constant 0 : index
    %c0_142 = arith.constant 0 : index
    %165 = vector.load %arg13[%c0_139, %c3_140, %c0_141, %c0_142] : memref<1x4x8x8xbf16, #tpu.memory_space<vmem>>, vector<1x1x8x8xbf16>
    %166 = vector.shape_cast %165 : vector<1x1x8x8xbf16> to vector<8x8xbf16>
    %167 = vector.shape_cast %164 : vector<8x8xbf16> to vector<1x1x8x8xbf16>
    tpu.vector_store %arg13[%c0_139, %c3_140, %c0_141, %c0_142], %167 {strides = array<i32>} : memref<1x4x8x8xbf16, #tpu.memory_space<vmem>>, vector<1x1x8x8xbf16>,
    return
  }
  func.func @transform_0(%arg0: i32, %arg1: i32) -> (i32, i32, i32) {
    %c0_i32 = arith.constant 0 : i32
    %c0_i32_0 = arith.constant 0 : i32
    return %arg0, %arg1, %c0_i32 : i32, i32, i32
  }
  func.func @transform_1(%arg0: i32, %arg1: i32) -> (i32, i32) {
    %c0_i32 = arith.constant 0 : i32
    %c0_i32_0 = arith.constant 0 : i32
    %c0_i32_1 = arith.constant 0 : i32
    return %c0_i32, %c0_i32_0 : i32, i32
  }
  func.func @transform_2(%arg0: i32, %arg1: i32) -> (i32, i32) {
    %c0_i32 = arith.constant 0 : i32
    %c0_i32_0 = arith.constant 0 : i32
    %c0_i32_1 = arith.constant 0 : i32
    return %c0_i32, %c0_i32_0 : i32, i32
  }
  func.func @transform_3(%arg0: i32, %arg1: i32) -> (i32, i32, i32) {
    %c0_i32 = arith.constant 0 : i32
    %c0_i32_0 = arith.constant 0 : i32
    %c0_i32_1 = arith.constant 0 : i32
    %c0_i32_2 = arith.constant 0 : i32
    return %c0_i32, %c0_i32_0, %c0_i32_1 : i32, i32, i32
  }
  func.func @transform_4(%arg0: i32, %arg1: i32) -> (i32, i32, i32) {
    %c0_i32 = arith.constant 0 : i32
    %c0_i32_0 = arith.constant 0 : i32
    %c0_i32_1 = arith.constant 0 : i32
    %c0_i32_2 = arith.constant 0 : i32
    return %c0_i32, %c0_i32_0, %c0_i32_1 : i32, i32, i32
  }
  func.func @transform_5(%arg0: i32, %arg1: i32) -> (i32, i32, i32) {
    %c0_i32 = arith.constant 0 : i32
    %c0_i32_0 = arith.constant 0 : i32
    %c0_i32_1 = arith.constant 0 : i32
    %c0_i32_2 = arith.constant 0 : i32
    return %c0_i32, %c0_i32_0, %c0_i32_1 : i32, i32, i32
  }
  func.func @transform_6(%arg0: i32, %arg1: i32) -> (i32, i32, i32) {
    %c0_i32 = arith.constant 0 : i32
    %c0_i32_0 = arith.constant 0 : i32
    %c0_i32_1 = arith.constant 0 : i32
    %c0_i32_2 = arith.constant 0 : i32
    return %c0_i32, %c0_i32_0, %c0_i32_1 : i32, i32, i32
  }
  func.func @transform_7(%arg0: i32, %arg1: i32) -> (i32, i32, i32) {
    %c0_i32 = arith.constant 0 : i32
    %c0_i32_0 = arith.constant 0 : i32
    %c0_i32_1 = arith.constant 0 : i32
    %c0_i32_2 = arith.constant 0 : i32
    return %c0_i32, %c0_i32_0, %c0_i32_1 : i32, i32, i32
  }
  func.func @transform_8(%arg0: i32, %arg1: i32) -> (i32, i32, i32) {
    %c0_i32 = arith.constant 0 : i32
    %c0_i32_0 = arith.constant 0 : i32
    %c0_i32_1 = arith.constant 0 : i32
    %c0_i32_2 = arith.constant 0 : i32
    return %c0_i32, %c0_i32_0, %c0_i32_1 : i32, i32, i32
  }
  func.func @transform_9(%arg0: i32, %arg1: i32) -> (i32, i32, i32, i32) {
    %c0_i32 = arith.constant 0 : i32
    %c0_i32_0 = arith.constant 0 : i32
    %c0_i32_1 = arith.constant 0 : i32
    return %arg0, %c0_i32, %arg1, %c0_i32_0 : i32, i32, i32, i32
  }
  func.func @transform_10(%arg0: i32, %arg1: i32) -> (i32, i32, i32, i32) {
    %c0_i32 = arith.constant 0 : i32
    %c0_i32_0 = arith.constant 0 : i32
    %c0_i32_1 = arith.constant 0 : i32
    return %arg0, %c0_i32, %arg1, %c0_i32_0 : i32, i32, i32, i32
  }
  func.func @transform_11(%arg0: i32, %arg1: i32) -> (i32, i32, i32, i32) {
    %c0_i32 = arith.constant 0 : i32
    %c0_i32_0 = arith.constant 0 : i32
    %c0_i32_1 = arith.constant 0 : i32
    return %arg0, %c0_i32, %arg1, %c0_i32_0 : i32, i32, i32, i32
  }
}

module attributes {stable_mosaic.version = 11 : i64} {
  func.func @_mhsa_attn_kernel(%arg0: i32, %arg1: i32, %arg2: i32, %arg3: i32, %arg4: memref<2xi32, #tpu.memory_space<smem>>, %arg5: memref<1x1x8x8xbf16, #tpu.memory_space<vmem>>, %arg6: memref<1x1x8x8xbf16, #tpu.memory_space<vmem>>, %arg7: memref<1x1x8x8xbf16, #tpu.memory_space<vmem>>, %arg8: memref<4x8x32xbf16, #tpu.memory_space<vmem>>, %arg9: memref<1x32xf32, #tpu.memory_space<vmem>>, %arg10: memref<1x8x32xbf16, #tpu.memory_space<vmem>>, %arg11: memref<1x8x32xbf16, #tpu.memory_space<vmem>>, %arg12: memref<8x1xf32, #tpu.memory_space<vmem>>, %arg13: memref<8x1xf32, #tpu.memory_space<vmem>>, %arg14: memref<8x8xf32, #tpu.memory_space<vmem>>, %arg15: memref<8x32xf32, #tpu.memory_space<vmem>>) attributes {dimension_semantics = [#tpu.dimension_semantics<parallel>, #tpu.dimension_semantics<parallel>, #tpu.dimension_semantics<arbitrary>, #tpu.dimension_semantics<arbitrary>], iteration_bounds = array<i64: 2, 1, 4, 1>, scalar_prefetch = 1 : i64, scratch_operands = 4 : i64, tpu.core_type = #tpu.core_type<tc>, window_params = [{transform_indices = @transform_0, window_bounds = array<i64: 1, 1, 8, 8>}, {transform_indices = @transform_1, window_bounds = array<i64: 1, 1, 8, 8>}, {transform_indices = @transform_2, window_bounds = array<i64: 1, 1, 8, 8>}, {pipeline_mode = #tpu.pipeline_mode<synchronous>, transform_indices = @transform_3, window_bounds = array<i64: 4, 8, 32>}, {pipeline_mode = #tpu.pipeline_mode<synchronous>, transform_indices = @transform_4, window_bounds = array<i64: 1, 32>}, {transform_indices = @transform_5, window_bounds = array<i64: 1, 8, 32>}, {transform_indices = @transform_6, window_bounds = array<i64: 1, 8, 32>}]} {
    %c0_i32 = arith.constant 0 : i32
    %0 = arith.cmpi eq, %arg2, %c0_i32 : i32
    %c0_i32_0 = arith.constant 0 : i32
    %1 = arith.cmpi eq, %arg3, %c0_i32_0 : i32
    %2 = arith.andi %0, %1 : i1
    %3 = arith.extui %2 : i1 to i32
    %c0_i32_1 = arith.constant 0 : i32
    %4 = arith.cmpi ne, %3, %c0_i32_1 : i32
    scf.if %4 {
      %cst_36 = arith.constant 0.000000e+00 : f32
      %58 = vector.broadcast %cst_36 : f32 to vector<8x32xf32>
      %c0_37 = arith.constant 0 : index
      %c0_38 = arith.constant 0 : index
      %59 = vector.load %arg15[%c0_37, %c0_38] : memref<8x32xf32, #tpu.memory_space<vmem>>, vector<8x32xf32>
      tpu.vector_store %arg15[%c0_37, %c0_38], %58 {strides = array<i32>} : memref<8x32xf32, #tpu.memory_space<vmem>>, vector<8x32xf32>,
    } else {
    }
    %c0_i32_2 = arith.constant 0 : i32
    %5 = arith.cmpi eq, %arg3, %c0_i32_2 : i32
    %6 = arith.extui %5 : i1 to i32
    %c0_i32_3 = arith.constant 0 : i32
    %7 = arith.cmpi ne, %6, %c0_i32_3 : i32
    scf.if %7 {
      %cst_36 = arith.constant 0xFF800000 : f32
      %58 = vector.broadcast %cst_36 : f32 to vector<8x1xf32>
      %c0_37 = arith.constant 0 : index
      %c0_38 = arith.constant 0 : index
      %59 = vector.load %arg12[%c0_37, %c0_38] : memref<8x1xf32, #tpu.memory_space<vmem>>, vector<8x1xf32>
      tpu.vector_store %arg12[%c0_37, %c0_38], %58 {strides = array<i32>} : memref<8x1xf32, #tpu.memory_space<vmem>>, vector<8x1xf32>,
      %cst_39 = arith.constant 0.000000e+00 : f32
      %60 = vector.broadcast %cst_39 : f32 to vector<8x1xf32>
      %c0_40 = arith.constant 0 : index
      %c0_41 = arith.constant 0 : index
      %61 = vector.load %arg13[%c0_40, %c0_41] : memref<8x1xf32, #tpu.memory_space<vmem>>, vector<8x1xf32>
      tpu.vector_store %arg13[%c0_40, %c0_41], %60 {strides = array<i32>} : memref<8x1xf32, #tpu.memory_space<vmem>>, vector<8x1xf32>,
      %cst_42 = arith.constant 0.000000e+00 : f32
      %62 = vector.broadcast %cst_42 : f32 to vector<8x8xf32>
      %c0_43 = arith.constant 0 : index
      %c0_44 = arith.constant 0 : index
      %63 = vector.load %arg14[%c0_43, %c0_44] : memref<8x8xf32, #tpu.memory_space<vmem>>, vector<8x8xf32>
      tpu.vector_store %arg14[%c0_43, %c0_44], %62 {strides = array<i32>} : memref<8x8xf32, #tpu.memory_space<vmem>>, vector<8x8xf32>,
    } else {
    }
    %c0 = arith.constant 0 : index
    %c0_4 = arith.constant 0 : index
    %c0_5 = arith.constant 0 : index
    %c0_6 = arith.constant 0 : index
    %8 = vector.load %arg5[%c0, %c0_4, %c0_5, %c0_6] : memref<1x1x8x8xbf16, #tpu.memory_space<vmem>>, vector<1x1x8x8xbf16>
    %9 = vector.shape_cast %8 : vector<1x1x8x8xbf16> to vector<8x8xbf16>
    %c0_7 = arith.constant 0 : index
    %c0_8 = arith.constant 0 : index
    %c0_9 = arith.constant 0 : index
    %c0_10 = arith.constant 0 : index
    %10 = vector.load %arg6[%c0_7, %c0_8, %c0_9, %c0_10] : memref<1x1x8x8xbf16, #tpu.memory_space<vmem>>, vector<1x1x8x8xbf16>
    %11 = vector.shape_cast %10 : vector<1x1x8x8xbf16> to vector<8x8xbf16>
    %cst = arith.constant dense<0.000000e+00> : vector<8x8xf32>
    %12 = tpu.matmul %9, %11, %cst {dimension_numbers = #tpu.dot_dimension_numbers<[1], [1], [0], [0], [0, 0, 1, 0], [], []>} : vector<8x8xbf16>, vector<8x8xbf16>, vector<8x8xf32> -> vector<8x8xf32>
    %c8_i32 = arith.constant 8 : i32
    %13 = arith.muli %arg3, %c8_i32 : i32
    %14 = tpu.iota {dimensions = array<i32: 1>} : vector<8x8xi32>
    %15 = vector.broadcast %13 : i32 to vector<8x8xi32>
    %16 = arith.addi %15, %14 : vector<8x8xi32>
    %17 = arith.index_cast %arg0 : i32 to index
    %18 = memref.load %arg4[%17] : memref<2xi32, #tpu.memory_space<smem>>
    %19 = vector.broadcast %18 : i32 to vector<8x8xi32>
    %20 = arith.cmpi slt, %16, %19 : vector<8x8xi32>
    %cst_11 = arith.constant -1.000000e+30 : f32
    %21 = vector.broadcast %cst_11 : f32 to vector<8x8xf32>
    %22 = arith.select %20, %12, %21 : vector<8x8xi1>, vector<8x8xf32>
    %c0_12 = arith.constant 0 : index
    %c0_13 = arith.constant 0 : index
    %23 = vector.load %arg12[%c0_12, %c0_13] : memref<8x1xf32, #tpu.memory_space<vmem>>, vector<8x1xf32>
    %cst_14 = arith.constant dense<0xFF800000> : vector<8xf32>
    %24 = vector.multi_reduction <maximumf>, %22, %cst_14 [1] : vector<8x8xf32> to vector<8xf32>
    %25 = vector.shape_cast %24 : vector<8xf32> to vector<8x1xf32>
    %26 = arith.maximumf %23, %25 : vector<8x1xf32>
    %27 = arith.subf %23, %26 : vector<8x1xf32>
    %28 = math.exp %27 : vector<8x1xf32>
    %29 = vector.broadcast %26 : vector<8x1xf32> to vector<8x8xf32>
    %30 = arith.subf %22, %29 : vector<8x8xf32>
    %31 = math.exp %30 : vector<8x8xf32>
    %cst_15 = arith.constant 0.000000e+00 : f32
    %32 = vector.broadcast %cst_15 : f32 to vector<8x8xf32>
    %33 = arith.select %20, %31, %32 : vector<8x8xi1>, vector<8x8xf32>
    %c0_16 = arith.constant 0 : index
    %c0_17 = arith.constant 0 : index
    %34 = vector.load %arg13[%c0_16, %c0_17] : memref<8x1xf32, #tpu.memory_space<vmem>>, vector<8x1xf32>
    %35 = arith.mulf %28, %34 : vector<8x1xf32>
    %cst_18 = arith.constant dense<0.000000e+00> : vector<8xf32>
    %36 = vector.multi_reduction <add>, %33, %cst_18 [1] : vector<8x8xf32> to vector<8xf32>
    %37 = vector.shape_cast %36 : vector<8xf32> to vector<8x1xf32>
    %38 = arith.addf %35, %37 : vector<8x1xf32>
    %c0_19 = arith.constant 0 : index
    %c0_20 = arith.constant 0 : index
    %39 = vector.load %arg13[%c0_19, %c0_20] : memref<8x1xf32, #tpu.memory_space<vmem>>, vector<8x1xf32>
    tpu.vector_store %arg13[%c0_19, %c0_20], %38 {strides = array<i32>} : memref<8x1xf32, #tpu.memory_space<vmem>>, vector<8x1xf32>,
    %c0_21 = arith.constant 0 : index
    %c0_22 = arith.constant 0 : index
    %40 = vector.load %arg14[%c0_21, %c0_22] : memref<8x8xf32, #tpu.memory_space<vmem>>, vector<8x8xf32>
    %41 = vector.broadcast %28 : vector<8x1xf32> to vector<8x8xf32>
    %42 = arith.mulf %41, %40 : vector<8x8xf32>
    %43 = arith.truncf %33 : vector<8x8xf32> to vector<8x8xbf16>
    %c0_23 = arith.constant 0 : index
    %c0_24 = arith.constant 0 : index
    %c0_25 = arith.constant 0 : index
    %c0_26 = arith.constant 0 : index
    %44 = vector.load %arg7[%c0_23, %c0_24, %c0_25, %c0_26] : memref<1x1x8x8xbf16, #tpu.memory_space<vmem>>, vector<1x1x8x8xbf16>
    %45 = vector.shape_cast %44 : vector<1x1x8x8xbf16> to vector<8x8xbf16>
    %cst_27 = arith.constant dense<0.000000e+00> : vector<8x8xf32>
    %46 = tpu.matmul %43, %45, %cst_27 {dimension_numbers = #tpu.dot_dimension_numbers<[1], [0], [0], [1], [0, 0, 1, 1], [], []>} : vector<8x8xbf16>, vector<8x8xbf16>, vector<8x8xf32> -> vector<8x8xf32>
    %47 = arith.addf %42, %46 : vector<8x8xf32>
    %c0_28 = arith.constant 0 : index
    %c0_29 = arith.constant 0 : index
    %48 = vector.load %arg14[%c0_28, %c0_29] : memref<8x8xf32, #tpu.memory_space<vmem>>, vector<8x8xf32>
    tpu.vector_store %arg14[%c0_28, %c0_29], %47 {strides = array<i32>} : memref<8x8xf32, #tpu.memory_space<vmem>>, vector<8x8xf32>,
    %c0_30 = arith.constant 0 : index
    %c0_31 = arith.constant 0 : index
    %49 = vector.load %arg12[%c0_30, %c0_31] : memref<8x1xf32, #tpu.memory_space<vmem>>, vector<8x1xf32>
    tpu.vector_store %arg12[%c0_30, %c0_31], %26 {strides = array<i32>} : memref<8x1xf32, #tpu.memory_space<vmem>>, vector<8x1xf32>,
    %c0_i32_32 = arith.constant 0 : i32
    %50 = arith.cmpi eq, %arg3, %c0_i32_32 : i32
    %51 = arith.extui %50 : i1 to i32
    %c0_i32_33 = arith.constant 0 : i32
    %52 = arith.cmpi ne, %51, %c0_i32_33 : i32
    scf.if %52 {
      %c0_36 = arith.constant 0 : index
      %c0_37 = arith.constant 0 : index
      %58 = vector.load %arg14[%c0_36, %c0_37] : memref<8x8xf32, #tpu.memory_space<vmem>>, vector<8x8xf32>
      %c0_38 = arith.constant 0 : index
      %c0_39 = arith.constant 0 : index
      %59 = vector.load %arg13[%c0_38, %c0_39] : memref<8x1xf32, #tpu.memory_space<vmem>>, vector<8x1xf32>
      %60 = tpu.reciprocal %59 {approx = true} : vector<8x1xf32> -> vector<8x1xf32>
      %61 = vector.broadcast %60 : vector<8x1xf32> to vector<8x8xf32>
      %62 = arith.mulf %58, %61 : vector<8x8xf32>
      %63 = arith.truncf %62 : vector<8x8xf32> to vector<8x8xbf16>
      %c0_40 = arith.constant 0 : index
      %c0_41 = arith.constant 0 : index
      %64 = vector.load %arg15[%c0_40, %c0_41] : memref<8x32xf32, #tpu.memory_space<vmem>>, vector<8x32xf32>
      %65 = arith.index_cast %arg2 : i32 to index
      %c0_42 = arith.constant 0 : index
      %c0_43 = arith.constant 0 : index
      %66 = vector.load %arg8[%65, %c0_42, %c0_43] : memref<4x8x32xbf16, #tpu.memory_space<vmem>>, vector<1x8x32xbf16>
      %67 = vector.shape_cast %66 : vector<1x8x32xbf16> to vector<8x32xbf16>
      %cst_44 = arith.constant dense<0.000000e+00> : vector<8x32xf32>
      %68 = tpu.matmul %63, %67, %cst_44 {dimension_numbers = #tpu.dot_dimension_numbers<[1], [0], [0], [1], [0, 0, 1, 1], [], []>} : vector<8x8xbf16>, vector<8x32xbf16>, vector<8x32xf32> -> vector<8x32xf32>
      %69 = arith.addf %64, %68 : vector<8x32xf32>
      %c0_45 = arith.constant 0 : index
      %c0_46 = arith.constant 0 : index
      %70 = vector.load %arg15[%c0_45, %c0_46] : memref<8x32xf32, #tpu.memory_space<vmem>>, vector<8x32xf32>
      tpu.vector_store %arg15[%c0_45, %c0_46], %69 {strides = array<i32>} : memref<8x32xf32, #tpu.memory_space<vmem>>, vector<8x32xf32>,
    } else {
    }
    %c3_i32 = arith.constant 3 : i32
    %53 = arith.cmpi eq, %arg2, %c3_i32 : i32
    %c0_i32_34 = arith.constant 0 : i32
    %54 = arith.cmpi eq, %arg3, %c0_i32_34 : i32
    %55 = arith.andi %53, %54 : i1
    %56 = arith.extui %55 : i1 to i32
    %c0_i32_35 = arith.constant 0 : i32
    %57 = arith.cmpi ne, %56, %c0_i32_35 : i32
    scf.if %57 {
      %c0_36 = arith.constant 0 : index
      %c0_37 = arith.constant 0 : index
      %58 = vector.load %arg15[%c0_36, %c0_37] : memref<8x32xf32, #tpu.memory_space<vmem>>, vector<8x32xf32>
      %c0_38 = arith.constant 0 : index
      %c0_39 = arith.constant 0 : index
      %59 = vector.load %arg9[%c0_38, %c0_39] : memref<1x32xf32, #tpu.memory_space<vmem>>, vector<1x32xf32>
      %60 = vector.broadcast %59 : vector<1x32xf32> to vector<8x32xf32>
      %61 = arith.addf %58, %60 : vector<8x32xf32>
      %c0_40 = arith.constant 0 : index
      %c0_41 = arith.constant 0 : index
      %c0_42 = arith.constant 0 : index
      %62 = vector.load %arg10[%c0_40, %c0_41, %c0_42] : memref<1x8x32xbf16, #tpu.memory_space<vmem>>, vector<1x8x32xbf16>
      %63 = vector.shape_cast %62 : vector<1x8x32xbf16> to vector<8x32xbf16>
      %64 = arith.extf %63 : vector<8x32xbf16> to vector<8x32xf32>
      %65 = arith.addf %61, %64 : vector<8x32xf32>
      %66 = arith.truncf %65 : vector<8x32xf32> to vector<8x32xbf16>
      %c0_43 = arith.constant 0 : index
      %c0_44 = arith.constant 0 : index
      %c0_45 = arith.constant 0 : index
      %67 = vector.load %arg11[%c0_43, %c0_44, %c0_45] : memref<1x8x32xbf16, #tpu.memory_space<vmem>>, vector<1x8x32xbf16>
      %68 = vector.shape_cast %67 : vector<1x8x32xbf16> to vector<8x32xbf16>
      %69 = vector.shape_cast %66 : vector<8x32xbf16> to vector<1x8x32xbf16>
      tpu.vector_store %arg11[%c0_43, %c0_44, %c0_45], %69 {strides = array<i32>} : memref<1x8x32xbf16, #tpu.memory_space<vmem>>, vector<1x8x32xbf16>,
    } else {
    }
    return
  }
  func.func @transform_0(%arg0: i32, %arg1: i32, %arg2: i32, %arg3: i32, %arg4: memref<2xi32, #tpu.memory_space<smem>>) -> (i32, i32, i32, i32) {
    %c0_i32 = arith.constant 0 : i32
    %c0_i32_0 = arith.constant 0 : i32
    return %arg0, %arg2, %arg1, %c0_i32 : i32, i32, i32, i32
  }
  func.func @transform_1(%arg0: i32, %arg1: i32, %arg2: i32, %arg3: i32, %arg4: memref<2xi32, #tpu.memory_space<smem>>) -> (i32, i32, i32, i32) {
    %c0_i32 = arith.constant 0 : i32
    %c0_i32_0 = arith.constant 0 : i32
    return %arg0, %arg2, %arg3, %c0_i32 : i32, i32, i32, i32
  }
  func.func @transform_2(%arg0: i32, %arg1: i32, %arg2: i32, %arg3: i32, %arg4: memref<2xi32, #tpu.memory_space<smem>>) -> (i32, i32, i32, i32) {
    %c0_i32 = arith.constant 0 : i32
    %c0_i32_0 = arith.constant 0 : i32
    return %arg0, %arg2, %arg3, %c0_i32 : i32, i32, i32, i32
  }
  func.func @transform_3(%arg0: i32, %arg1: i32, %arg2: i32, %arg3: i32, %arg4: memref<2xi32, #tpu.memory_space<smem>>) -> (i32, i32, i32) {
    %c0_i32 = arith.constant 0 : i32
    %c0_i32_0 = arith.constant 0 : i32
    %c0_i32_1 = arith.constant 0 : i32
    %c0_i32_2 = arith.constant 0 : i32
    return %c0_i32, %c0_i32_0, %c0_i32_1 : i32, i32, i32
  }
  func.func @transform_4(%arg0: i32, %arg1: i32, %arg2: i32, %arg3: i32, %arg4: memref<2xi32, #tpu.memory_space<smem>>) -> (i32, i32) {
    %c0_i32 = arith.constant 0 : i32
    %c0_i32_0 = arith.constant 0 : i32
    %c0_i32_1 = arith.constant 0 : i32
    return %c0_i32, %c0_i32_0 : i32, i32
  }
  func.func @transform_5(%arg0: i32, %arg1: i32, %arg2: i32, %arg3: i32, %arg4: memref<2xi32, #tpu.memory_space<smem>>) -> (i32, i32, i32) {
    %c0_i32 = arith.constant 0 : i32
    %c0_i32_0 = arith.constant 0 : i32
    return %arg0, %arg1, %c0_i32 : i32, i32, i32
  }
  func.func @transform_6(%arg0: i32, %arg1: i32, %arg2: i32, %arg3: i32, %arg4: memref<2xi32, #tpu.memory_space<smem>>) -> (i32, i32, i32) {
    %c0_i32 = arith.constant 0 : i32
    %c0_i32_0 = arith.constant 0 : i32
    return %arg0, %arg1, %c0_i32 : i32, i32, i32
  }
}

module attributes {stable_mosaic.version = 11 : i64} {
  func.func @_ffn_kernel(%arg0: i32, %arg1: memref<16x32xbf16, #tpu.memory_space<vmem>>, %arg2: memref<1x32xf32, #tpu.memory_space<vmem>>, %arg3: memref<1x32xf32, #tpu.memory_space<vmem>>, %arg4: memref<32x64xbf16, #tpu.memory_space<vmem>>, %arg5: memref<1x64xf32, #tpu.memory_space<vmem>>, %arg6: memref<64x32xbf16, #tpu.memory_space<vmem>>, %arg7: memref<1x32xf32, #tpu.memory_space<vmem>>, %arg8: memref<1x32xf32, #tpu.memory_space<vmem>>, %arg9: memref<1x32xf32, #tpu.memory_space<vmem>>, %arg10: memref<16x32xbf16, #tpu.memory_space<vmem>>) attributes {dimension_semantics = [#tpu.dimension_semantics<parallel>], iteration_bounds = array<i64: 1>, scalar_prefetch = 0 : i64, scratch_operands = 0 : i64, tpu.core_type = #tpu.core_type<tc>, window_params = [{transform_indices = @transform_0, window_bounds = array<i64: 16, 32>}, {pipeline_mode = #tpu.pipeline_mode<synchronous>, transform_indices = @transform_1, window_bounds = array<i64: 1, 32>}, {pipeline_mode = #tpu.pipeline_mode<synchronous>, transform_indices = @transform_2, window_bounds = array<i64: 1, 32>}, {pipeline_mode = #tpu.pipeline_mode<synchronous>, transform_indices = @transform_3, window_bounds = array<i64: 32, 64>}, {pipeline_mode = #tpu.pipeline_mode<synchronous>, transform_indices = @transform_4, window_bounds = array<i64: 1, 64>}, {pipeline_mode = #tpu.pipeline_mode<synchronous>, transform_indices = @transform_5, window_bounds = array<i64: 64, 32>}, {pipeline_mode = #tpu.pipeline_mode<synchronous>, transform_indices = @transform_6, window_bounds = array<i64: 1, 32>}, {pipeline_mode = #tpu.pipeline_mode<synchronous>, transform_indices = @transform_7, window_bounds = array<i64: 1, 32>}, {pipeline_mode = #tpu.pipeline_mode<synchronous>, transform_indices = @transform_8, window_bounds = array<i64: 1, 32>}, {transform_indices = @transform_9, window_bounds = array<i64: 16, 32>}]} {
    %c0 = arith.constant 0 : index
    %c0_0 = arith.constant 0 : index
    %0 = vector.load %arg1[%c0, %c0_0] : memref<16x32xbf16, #tpu.memory_space<vmem>>, vector<16x32xbf16>
    %1 = arith.extf %0 : vector<16x32xbf16> to vector<16x32xf32>
    %c0_1 = arith.constant 0 : index
    %c0_2 = arith.constant 0 : index
    %2 = vector.load %arg2[%c0_1, %c0_2] : memref<1x32xf32, #tpu.memory_space<vmem>>, vector<1x32xf32>
    %c0_3 = arith.constant 0 : index
    %c0_4 = arith.constant 0 : index
    %3 = vector.load %arg3[%c0_3, %c0_4] : memref<1x32xf32, #tpu.memory_space<vmem>>, vector<1x32xf32>
    %cst = arith.constant dense<0.000000e+00> : vector<16xf32>
    %4 = vector.multi_reduction <add>, %1, %cst [1] : vector<16x32xf32> to vector<16xf32>
    %5 = vector.shape_cast %4 : vector<16xf32> to vector<16x1xf32>
    %cst_5 = arith.constant 3.200000e+01 : f32
    %6 = vector.broadcast %cst_5 : f32 to vector<16x1xf32>
    %7 = arith.divf %5, %6 : vector<16x1xf32>
    %8 = vector.broadcast %7 : vector<16x1xf32> to vector<16x32xf32>
    %9 = arith.subf %1, %8 : vector<16x32xf32>
    %10 = arith.mulf %9, %9 : vector<16x32xf32>
    %cst_6 = arith.constant dense<0.000000e+00> : vector<16xf32>
    %11 = vector.multi_reduction <add>, %10, %cst_6 [1] : vector<16x32xf32> to vector<16xf32>
    %12 = vector.shape_cast %11 : vector<16xf32> to vector<16x1xf32>
    %cst_7 = arith.constant 3.200000e+01 : f32
    %13 = vector.broadcast %cst_7 : f32 to vector<16x1xf32>
    %14 = arith.divf %12, %13 : vector<16x1xf32>
    %15 = vector.broadcast %7 : vector<16x1xf32> to vector<16x32xf32>
    %16 = arith.subf %1, %15 : vector<16x32xf32>
    %cst_8 = arith.constant 9.99999974E-6 : f32
    %17 = vector.broadcast %cst_8 : f32 to vector<16x1xf32>
    %18 = arith.addf %14, %17 : vector<16x1xf32>
    %19 = math.rsqrt %18 : vector<16x1xf32>
    %20 = vector.broadcast %19 : vector<16x1xf32> to vector<16x32xf32>
    %21 = arith.mulf %16, %20 : vector<16x32xf32>
    %22 = vector.broadcast %2 : vector<1x32xf32> to vector<16x32xf32>
    %23 = arith.mulf %21, %22 : vector<16x32xf32>
    %24 = vector.broadcast %3 : vector<1x32xf32> to vector<16x32xf32>
    %25 = arith.addf %23, %24 : vector<16x32xf32>
    %26 = arith.truncf %25 : vector<16x32xf32> to vector<16x32xbf16>
    %c0_9 = arith.constant 0 : index
    %c0_10 = arith.constant 0 : index
    %27 = vector.load %arg4[%c0_9, %c0_10] : memref<32x64xbf16, #tpu.memory_space<vmem>>, vector<32x64xbf16>
    %cst_11 = arith.constant dense<0.000000e+00> : vector<16x64xf32>
    %28 = tpu.matmul %26, %27, %cst_11 {dimension_numbers = #tpu.dot_dimension_numbers<[1], [0], [0], [1], [0, 0, 1, 1], [], []>} : vector<16x32xbf16>, vector<32x64xbf16>, vector<16x64xf32> -> vector<16x64xf32>
    %c0_12 = arith.constant 0 : index
    %c0_13 = arith.constant 0 : index
    %29 = vector.load %arg5[%c0_12, %c0_13] : memref<1x64xf32, #tpu.memory_space<vmem>>, vector<1x64xf32>
    %30 = vector.broadcast %29 : vector<1x64xf32> to vector<16x64xf32>
    %31 = arith.addf %28, %30 : vector<16x64xf32>
    %32 = arith.negf %31 : vector<16x64xf32>
    %33 = math.exp %32 : vector<16x64xf32>
    %cst_14 = arith.constant 1.000000e+00 : f32
    %34 = vector.broadcast %cst_14 : f32 to vector<16x64xf32>
    %35 = arith.addf %34, %33 : vector<16x64xf32>
    %36 = arith.divf %34, %35 : vector<16x64xf32>
    %37 = arith.mulf %31, %36 : vector<16x64xf32>
    %38 = arith.truncf %37 : vector<16x64xf32> to vector<16x64xbf16>
    %c0_15 = arith.constant 0 : index
    %c0_16 = arith.constant 0 : index
    %39 = vector.load %arg6[%c0_15, %c0_16] : memref<64x32xbf16, #tpu.memory_space<vmem>>, vector<64x32xbf16>
    %cst_17 = arith.constant dense<0.000000e+00> : vector<16x32xf32>
    %40 = tpu.matmul %38, %39, %cst_17 {dimension_numbers = #tpu.dot_dimension_numbers<[1], [0], [0], [1], [0, 0, 1, 1], [], []>} : vector<16x64xbf16>, vector<64x32xbf16>, vector<16x32xf32> -> vector<16x32xf32>
    %c0_18 = arith.constant 0 : index
    %c0_19 = arith.constant 0 : index
    %41 = vector.load %arg7[%c0_18, %c0_19] : memref<1x32xf32, #tpu.memory_space<vmem>>, vector<1x32xf32>
    %42 = vector.broadcast %41 : vector<1x32xf32> to vector<16x32xf32>
    %43 = arith.addf %40, %42 : vector<16x32xf32>
    %cst_20 = arith.constant 5.000000e-01 : f32
    %44 = vector.broadcast %cst_20 : f32 to vector<16x32xf32>
    %45 = arith.mulf %43, %44 : vector<16x32xf32>
    %46 = arith.addf %45, %1 : vector<16x32xf32>
    %c0_21 = arith.constant 0 : index
    %c0_22 = arith.constant 0 : index
    %47 = vector.load %arg8[%c0_21, %c0_22] : memref<1x32xf32, #tpu.memory_space<vmem>>, vector<1x32xf32>
    %c0_23 = arith.constant 0 : index
    %c0_24 = arith.constant 0 : index
    %48 = vector.load %arg9[%c0_23, %c0_24] : memref<1x32xf32, #tpu.memory_space<vmem>>, vector<1x32xf32>
    %cst_25 = arith.constant dense<0.000000e+00> : vector<16xf32>
    %49 = vector.multi_reduction <add>, %46, %cst_25 [1] : vector<16x32xf32> to vector<16xf32>
    %50 = vector.shape_cast %49 : vector<16xf32> to vector<16x1xf32>
    %cst_26 = arith.constant 3.200000e+01 : f32
    %51 = vector.broadcast %cst_26 : f32 to vector<16x1xf32>
    %52 = arith.divf %50, %51 : vector<16x1xf32>
    %53 = vector.broadcast %52 : vector<16x1xf32> to vector<16x32xf32>
    %54 = arith.subf %46, %53 : vector<16x32xf32>
    %55 = arith.mulf %54, %54 : vector<16x32xf32>
    %cst_27 = arith.constant dense<0.000000e+00> : vector<16xf32>
    %56 = vector.multi_reduction <add>, %55, %cst_27 [1] : vector<16x32xf32> to vector<16xf32>
    %57 = vector.shape_cast %56 : vector<16xf32> to vector<16x1xf32>
    %cst_28 = arith.constant 3.200000e+01 : f32
    %58 = vector.broadcast %cst_28 : f32 to vector<16x1xf32>
    %59 = arith.divf %57, %58 : vector<16x1xf32>
    %60 = vector.broadcast %52 : vector<16x1xf32> to vector<16x32xf32>
    %61 = arith.subf %46, %60 : vector<16x32xf32>
    %cst_29 = arith.constant 9.99999974E-6 : f32
    %62 = vector.broadcast %cst_29 : f32 to vector<16x1xf32>
    %63 = arith.addf %59, %62 : vector<16x1xf32>
    %64 = math.rsqrt %63 : vector<16x1xf32>
    %65 = vector.broadcast %64 : vector<16x1xf32> to vector<16x32xf32>
    %66 = arith.mulf %61, %65 : vector<16x32xf32>
    %67 = vector.broadcast %47 : vector<1x32xf32> to vector<16x32xf32>
    %68 = arith.mulf %66, %67 : vector<16x32xf32>
    %69 = vector.broadcast %48 : vector<1x32xf32> to vector<16x32xf32>
    %70 = arith.addf %68, %69 : vector<16x32xf32>
    %71 = arith.truncf %70 : vector<16x32xf32> to vector<16x32xbf16>
    %c0_30 = arith.constant 0 : index
    %c0_31 = arith.constant 0 : index
    %72 = vector.load %arg10[%c0_30, %c0_31] : memref<16x32xbf16, #tpu.memory_space<vmem>>, vector<16x32xbf16>
    tpu.vector_store %arg10[%c0_30, %c0_31], %71 {strides = array<i32>} : memref<16x32xbf16, #tpu.memory_space<vmem>>, vector<16x32xbf16>,
    return
  }
  func.func @transform_0(%arg0: i32) -> (i32, i32) {
    %c0_i32 = arith.constant 0 : i32
    %c0_i32_0 = arith.constant 0 : i32
    return %arg0, %c0_i32 : i32, i32
  }
  func.func @transform_1(%arg0: i32) -> (i32, i32) {
    %c0_i32 = arith.constant 0 : i32
    %c0_i32_0 = arith.constant 0 : i32
    %c0_i32_1 = arith.constant 0 : i32
    return %c0_i32, %c0_i32_0 : i32, i32
  }
  func.func @transform_2(%arg0: i32) -> (i32, i32) {
    %c0_i32 = arith.constant 0 : i32
    %c0_i32_0 = arith.constant 0 : i32
    %c0_i32_1 = arith.constant 0 : i32
    return %c0_i32, %c0_i32_0 : i32, i32
  }
  func.func @transform_3(%arg0: i32) -> (i32, i32) {
    %c0_i32 = arith.constant 0 : i32
    %c0_i32_0 = arith.constant 0 : i32
    %c0_i32_1 = arith.constant 0 : i32
    return %c0_i32, %c0_i32_0 : i32, i32
  }
  func.func @transform_4(%arg0: i32) -> (i32, i32) {
    %c0_i32 = arith.constant 0 : i32
    %c0_i32_0 = arith.constant 0 : i32
    %c0_i32_1 = arith.constant 0 : i32
    return %c0_i32, %c0_i32_0 : i32, i32
  }
  func.func @transform_5(%arg0: i32) -> (i32, i32) {
    %c0_i32 = arith.constant 0 : i32
    %c0_i32_0 = arith.constant 0 : i32
    %c0_i32_1 = arith.constant 0 : i32
    return %c0_i32, %c0_i32_0 : i32, i32
  }
  func.func @transform_6(%arg0: i32) -> (i32, i32) {
    %c0_i32 = arith.constant 0 : i32
    %c0_i32_0 = arith.constant 0 : i32
    %c0_i32_1 = arith.constant 0 : i32
    return %c0_i32, %c0_i32_0 : i32, i32
  }
  func.func @transform_7(%arg0: i32) -> (i32, i32) {
    %c0_i32 = arith.constant 0 : i32
    %c0_i32_0 = arith.constant 0 : i32
    %c0_i32_1 = arith.constant 0 : i32
    return %c0_i32, %c0_i32_0 : i32, i32
  }
  func.func @transform_8(%arg0: i32) -> (i32, i32) {
    %c0_i32 = arith.constant 0 : i32
    %c0_i32_0 = arith.constant 0 : i32
    %c0_i32_1 = arith.constant 0 : i32
    return %c0_i32, %c0_i32_0 : i32, i32
  }
  func.func @transform_9(%arg0: i32) -> (i32, i32) {
    %c0_i32 = arith.constant 0 : i32
    %c0_i32_0 = arith.constant 0 : i32
    return %arg0, %c0_i32 : i32, i32
  }
}

module attributes {stable_mosaic.version = 11 : i64} {
  func.func @_fused_linear_kernel(%arg0: i32, %arg1: memref<16x32xbf16, #tpu.memory_space<vmem>>, %arg2: memref<32x16xbf16, #tpu.memory_space<vmem>>, %arg3: memref<1x16xf32, #tpu.memory_space<vmem>>, %arg4: memref<16x16xf32, #tpu.memory_space<vmem>>) attributes {dimension_semantics = [#tpu.dimension_semantics<parallel>], iteration_bounds = array<i64: 1>, scalar_prefetch = 0 : i64, scratch_operands = 0 : i64, tpu.core_type = #tpu.core_type<tc>, window_params = [{transform_indices = @transform_0, window_bounds = array<i64: 16, 32>}, {pipeline_mode = #tpu.pipeline_mode<synchronous>, transform_indices = @transform_1, window_bounds = array<i64: 32, 16>}, {pipeline_mode = #tpu.pipeline_mode<synchronous>, transform_indices = @transform_2, window_bounds = array<i64: 1, 16>}, {transform_indices = @transform_3, window_bounds = array<i64: 16, 16>}]} {
    %c0 = arith.constant 0 : index
    %c0_0 = arith.constant 0 : index
    %0 = vector.load %arg1[%c0, %c0_0] : memref<16x32xbf16, #tpu.memory_space<vmem>>, vector<16x32xbf16>
    %1 = arith.extf %0 : vector<16x32xbf16> to vector<16x32xf32>
    %2 = arith.truncf %1 : vector<16x32xf32> to vector<16x32xbf16>
    %c0_1 = arith.constant 0 : index
    %c0_2 = arith.constant 0 : index
    %3 = vector.load %arg2[%c0_1, %c0_2] : memref<32x16xbf16, #tpu.memory_space<vmem>>, vector<32x16xbf16>
    %cst = arith.constant dense<0.000000e+00> : vector<16x16xf32>
    %4 = tpu.matmul %2, %3, %cst {dimension_numbers = #tpu.dot_dimension_numbers<[1], [0], [0], [1], [0, 0, 1, 1], [], []>} : vector<16x32xbf16>, vector<32x16xbf16>, vector<16x16xf32> -> vector<16x16xf32>
    %c0_3 = arith.constant 0 : index
    %c0_4 = arith.constant 0 : index
    %5 = vector.load %arg3[%c0_3, %c0_4] : memref<1x16xf32, #tpu.memory_space<vmem>>, vector<1x16xf32>
    %6 = vector.broadcast %5 : vector<1x16xf32> to vector<16x16xf32>
    %7 = arith.addf %4, %6 : vector<16x16xf32>
    %cst_5 = arith.constant dense<0xFF800000> : vector<16xf32>
    %8 = vector.multi_reduction <maximumf>, %7, %cst_5 [1] : vector<16x16xf32> to vector<16xf32>
    %9 = vector.shape_cast %8 : vector<16xf32> to vector<16x1xf32>
    %10 = vector.broadcast %9 : vector<16x1xf32> to vector<16x16xf32>
    %11 = arith.subf %7, %10 : vector<16x16xf32>
    %12 = math.exp %11 : vector<16x16xf32>
    %cst_6 = arith.constant dense<0.000000e+00> : vector<16xf32>
    %13 = vector.multi_reduction <add>, %12, %cst_6 [1] : vector<16x16xf32> to vector<16xf32>
    %14 = vector.shape_cast %13 : vector<16xf32> to vector<16x1xf32>
    %15 = math.log %14 : vector<16x1xf32>
    %16 = vector.broadcast %15 : vector<16x1xf32> to vector<16x16xf32>
    %17 = arith.subf %11, %16 : vector<16x16xf32>
    %c0_7 = arith.constant 0 : index
    %c0_8 = arith.constant 0 : index
    %18 = vector.load %arg4[%c0_7, %c0_8] : memref<16x16xf32, #tpu.memory_space<vmem>>, vector<16x16xf32>
    tpu.vector_store %arg4[%c0_7, %c0_8], %17 {strides = array<i32>} : memref<16x16xf32, #tpu.memory_space<vmem>>, vector<16x16xf32>,
    return
  }
  func.func @transform_0(%arg0: i32) -> (i32, i32) {
    %c0_i32 = arith.constant 0 : i32
    %c0_i32_0 = arith.constant 0 : i32
    return %arg0, %c0_i32 : i32, i32
  }
  func.func @transform_1(%arg0: i32) -> (i32, i32) {
    %c0_i32 = arith.constant 0 : i32
    %c0_i32_0 = arith.constant 0 : i32
    %c0_i32_1 = arith.constant 0 : i32
    return %c0_i32, %c0_i32_0 : i32, i32
  }
  func.func @transform_2(%arg0: i32) -> (i32, i32) {
    %c0_i32 = arith.constant 0 : i32
    %c0_i32_0 = arith.constant 0 : i32
    %c0_i32_1 = arith.constant 0 : i32
    return %c0_i32, %c0_i32_0 : i32, i32
  }
  func.func @transform_3(%arg0: i32) -> (i32, i32) {
    %c0_i32 = arith.constant 0 : i32
    %c0_i32_0 = arith.constant 0 : i32
    return %arg0, %c0_i32 : i32, i32
  }
}

</mosaic_0001>

<bundles_post_ra>
// kernel: conformer_ctc_forward.14
= control target key start
LH: loop header
LB: loop body
LE: loop exit
PB: predicated region body
PF: predicated region fallthrough
CT: control target
= control target key end

     0   :  { %8 = vsyncpa [#allocation3], 0  ;;  %s363_s0 = inlined_call_operand.hbm [shape: bf16[16,16], index: 0, kind: input, shape index: {}]   ;;  %s364_s1 = inlined_call_operand.hbm [shape: bf16[16,32], index: 1, kind: input, shape index: {}]   ;;  %s365_s2 = inlined_call_operand.hbm [shape: f32[1,32], index: 2, kind: input, shape index: {}]   ;;  %s366_s3 = inlined_call_operand.hbm [shape: bf16[16,32], index: 3, kind: output, shape index: {}]  }
   0x1   :  { %9 = vsyncpa [#allocation6], 0 }
   0x2   :  { %10 = vsyncpa [#allocation4], 0  ;;  %s271_s12 = smov [#allocation5]   ;;  %s272_s14 = smov [#allocation2]  }
   0x3   :  { %s28_s13 = sshll.u32 %s271_s12, 4  ;;  %s16_s15 = sshll.u32 %s272_s14, 4  ;;  %s29_s13 = int_to_ptr.vmem [resolvable:$true] %s28_s13  ;;  %s299_s15 = int_to_ptr.vmem [resolvable:$true] %s16_s15 }
   0x4   :  { %s177_s18 = scalar_lea.hbm %s364_s1, 128 }
   0x5   :  { %p178_p0 = scmp.ne.s32.totalorder %s364_s1, %s177_s18  ;;  %p181_p1 = scmp.lt.u32.totalorder %s177_s18, %s364_s1 }
   0x7   :  { %p183_p2 = pnand %p181_p1, %p178_p0 }
   0x9   :  { %186 = shalt.err (!%p183_p2)
}
   0xa   :  { %s187_s23 = scalar_lea.vmem %s29_s13, 128  ;;  %p192_p4 = scmp.lt.s32.totalorder %s29_s13, %s29_s13 }
   0xb   :  { %p188_p3 = scmp.ne.s32.totalorder %s29_s13, %s187_s23  ;;  %p193_p5 = scmp.lt.s32.totalorder %s187_s23, %s187_s23 }
   0xd   :  { %p194_p6 = por %p193_p5, %p192_p4 }
   0xf   :  { %p195_p7 = pnand %p194_p6, %p188_p3 }
  0x11   :  { %198 = shalt.err (!%p195_p7)
}
  0x12   :  { %s273_s24 = smov 64   ;;  %s274_s25 = smov 4  }
  0x13   :  { %34 = dma.hbm_to_vmem [thread:$0]  %s364_s1, 128, %s29_s13, [#allocation6], %s273_s24, %s273_s24, %s274_s25  }
  0x14   :  { %s199_s30 = scalar_lea.hbm %s363_s0, 128 }
  0x15   :  { %p200_p8 = scmp.ne.s32.totalorder %s363_s0, %s199_s30  ;;  %p203_p9 = scmp.lt.u32.totalorder %s199_s30, %s363_s0 }
  0x17   :  { %p205_p10 = pnand %p203_p9, %p200_p8 }
  0x19   :  { %208 = shalt.err (!%p205_p10)
}
  0x1a   :  { %s209_s8 = scalar_lea.vmem %s299_s15, 128  ;;  %p214_p12 = scmp.lt.s32.totalorder %s299_s15, %s299_s15 }
  0x1b   :  { %p210_p11 = scmp.ne.s32.totalorder %s299_s15, %s209_s8  ;;  %p215_p13 = scmp.lt.s32.totalorder %s209_s8, %s209_s8 }
  0x1d   :  { %p216_p0 = por %p215_p13, %p214_p12 }
  0x1f   :  { %p217_p1 = pnand %p216_p0, %p210_p11 }
  0x21   :  { %220 = shalt.err (!%p217_p1)
}
  0x22   :  { %22 = dma.hbm_to_vmem [thread:$0]  %s363_s0, 128, %s299_s15, [#allocation3], %s273_s24, %s273_s24, %s274_s25  }
  0x23   :  { %s275_s10 = smov [#allocation7]   ;;  %s221_s14 = scalar_lea.hbm %s365_s2, 16 }
  0x24   :  { %s41_s11 = sshll.u32 %s275_s10, 4  ;;  %p222_p2 = scmp.ne.s32.totalorder %s365_s2, %s221_s14  ;;  %s42_s11 = int_to_ptr.vmem [resolvable:$true] %s41_s11 }
  0x25   :  { %p225_p3 = scmp.lt.u32.totalorder %s221_s14, %s365_s2 }
  0x27   :  { %p227_p4 = pnand %p225_p3, %p222_p2 }
  0x29   :  { %230 = shalt.err (!%p227_p4)
}
  0x2a   :  { %s231_s20 = scalar_lea.vmem %s42_s11, 16  ;;  %s235_s0 = scalar_lea.vmem %s42_s11, 32 }
  0x2b   :  { %p232_p5 = scmp.ne.s32.totalorder %s42_s11, %s231_s20  ;;  %p236_p6 = scmp.lt.s32.totalorder %s42_s11, %s42_s11 }
  0x2c   :  { %p237_p7 = scmp.lt.s32.totalorder %s235_s0, %s231_s20 }
  0x2e   :  { %p238_p8 = por %p237_p7, %p236_p6 }
  0x30   :  { %p239_p9 = pnand %p238_p8, %p232_p5 }
  0x32   :  { %242 = shalt.err (!%p239_p9)
}
  0x33   :  { %44 = dma.hbm_to_vmem [thread:$0]  %s365_s2, 16, %s42_s11, [#allocation6]  }
  0x34   :  { %265 = dma.done.wait [#allocation3], 128  }
  0x35   :  { %266 = vsyncadd [#allocation3], 4294967168 }
  0x36   :  { %267 = dma.done.wait [#allocation6], 144  }
  0x37   :  { %268 = vsyncadd [#allocation6], 4294967152  ;;  %v276_v0 = vmov 0.0   ;;  %vm277_vm0 = vmmov 0   ;;  %v175_v1 = vld [vmem:[#allocation5] sm:$0xff]   ;;  %v176_v2 = vld [vmem:[#allocation2] sm:$0xff]  }
  0x38   :  { %161 = vmatprep.subr.bf16.mxu0 %v276_v0  ;;  %163 = vmatprep.mubr.msk.bf16.mxu0 %vm277_vm0, %v276_v0  ;;  %vm77_vm1 = vcmask 130048   ;;  %v151_v3 = vld [vmem:[#allocation7] ss:$0 sm:$0xff]  ;;  %vm130_vm2 = vcmask 257024   ;;  %s278_s2 = smov [#allocation8]  }
  0x39   :  { %162 = vmatpush3.bf16.msra.mxu0 %v175_v1  ;;  %s138_s22 = sshll.u32 %s278_s2, 4  ;;  %s139_s22 = int_to_ptr.vmem [resolvable:$true] %s138_s22 }
  0x3a   :  { %s243_s23 = scalar_lea.vmem %s139_s22, 128  ;;  %p248_p11 = scmp.lt.s32.totalorder %s139_s22, %s139_s22 }
  0x3b   :  { %p244_p10 = scmp.ne.s32.totalorder %s139_s22, %s243_s23  ;;  %p249_p12 = scmp.lt.s32.totalorder %s243_s23, %s243_s23 }
  0x3c   :  { %164 = vmatmul.mubr.msk.bf16.vlgmr.msra.gmra.mrb[0].mxu0 %vm77_vm1, %v176_v2 }
  0x3d   :  { %p250_p13 = por %p249_p12, %p248_p11 }
  0x3f   :  { %p251_p0 = pnand %p250_p13, %p244_p10 }
 0x10f   :  { %v115_v4 = vpop.f32.mrb[0].mxu0 }
 0x110   :  { %v116_v5 = vadd.f32 %v151_v3, %v115_v4  ;;  %v165_v6 = vpop.f32.mrb[1].mxu0 }
 0x111   :  { %v118_v7 = vpop.f32.mrb[2].mxu0 }
 0x112   :  { %v157_v8 = vpack.c.bf16 %v116_v5, %v116_v5  ;;  %v119_v9 = vadd.f32 %v151_v3, %v118_v7  ;;  %v166_v10 = vpop.f32.mrb[3].mxu0 }
 0x114   :  { %v158_v11 = vpack.c.bf16 %v119_v9, %v119_v9  ;;  %131 = vst.msk [vmem:[#allocation8] sm:$0xf] %vm130_vm2, %v157_v8 }
 0x116   :  { %132 = vst.msk [vmem:[#allocation8 + $0x4] sm:$0xf] %vm130_vm2, %v158_v11 }
 0x117   :  { %254 = shalt.err (!%p251_p0)
}
 0x118   :  { %s255_s28 = scalar_lea.hbm %s366_s3, 128 }
 0x119   :  { %p256_p1 = scmp.ne.s32.totalorder %s366_s3, %s255_s28  ;;  %p259_p2 = scmp.lt.u32.totalorder %s255_s28, %s366_s3 }
 0x11b   :  { %p261_p3 = pnand %p259_p2, %p256_p1 }
 0x11d   :  { %264 = shalt.err (!%p261_p3)
}
 0x11e   :  { %144 = dma.vmem_to_hbm [thread:$0]  %s139_s22, 128, %s366_s3, [#allocation4], %s273_s24, %s273_s24, %s274_s25  }
 0x11f   :  { %269 = dma.done.wait [#allocation4], 128  }
 0x120   :  { %270 = vsyncadd [#allocation4], 4294967168 }
 0x121   :  { %148 = vsyncpa [#allocation3], 1 }
 0x122   :  { %149 = vsyncpa [#allocation6], 1 }
 0x123   :  { %150 = vsyncpa [#allocation4], 1 }

// kernel: conformer_ctc_forward.15
= control target key start
LH: loop header
LB: loop body
LE: loop exit
PB: predicated region body
PF: predicated region fallthrough
CT: control target
= control target key end

     0   :  { %12 = vsyncpa [#allocation3], 0  ;;  %s808_s0 = inlined_call_operand.hbm [shape: bf16[16,32], index: 0, kind: input, shape index: {}]   ;;  %s809_s1 = inlined_call_operand.hbm [shape: f32[1,32], index: 1, kind: input, shape index: {}]   ;;  %s810_s2 = inlined_call_operand.hbm [shape: f32[1,32], index: 2, kind: input, shape index: {}]   ;;  %s811_s3 = inlined_call_operand.hbm [shape: bf16[32,64], index: 3, kind: input, shape index: {}]   ;;  %s812_s4 = inlined_call_operand.hbm [shape: f32[1,64], index: 4, kind: input, shape index: {}]   ;;  %s813_s5 = inlined_call_operand.hbm [shape: bf16[64,32], index: 5, kind: input, shape index: {}]   ;;  %s814_s6 = inlined_call_operand.hbm [shape: f32[1,32], index: 6, kind: input, shape index: {}]   ;;  %s815_s7 = inlined_call_operand.hbm [shape: bf16[16,32], index: 7, kind: output, shape index: {}]  }
   0x1   :  { %13 = vsyncpa [#allocation6], 0 }
   0x2   :  { %14 = vsyncpa [#allocation9], 0 }
   0x3   :  { %15 = vsyncpa [#allocation12], 0 }
   0x4   :  { %16 = vsyncpa [#allocation4], 0  ;;  %s633_s24 = smov [#allocation5]   ;;  %s447_s28 = scalar_lea.hbm %s809_s1, 16 }
   0x5   :  { %s35_s25 = sshll.u32 %s633_s24, 4  ;;  %p448_p0 = scmp.ne.s32.totalorder %s809_s1, %s447_s28  ;;  %s36_s25 = int_to_ptr.vmem [resolvable:$true] %s35_s25 }
   0x6   :  { %p451_p1 = scmp.lt.u32.totalorder %s447_s28, %s809_s1 }
   0x8   :  { %p453_p2 = pnand %p451_p1, %p448_p0 }
   0xa   :  { %456 = shalt.err (!%p453_p2)
}
   0xb   :  { %s457_s10 = scalar_lea.vmem %s36_s25, 16  ;;  %s461_s11 = scalar_lea.vmem %s36_s25, 32 }
   0xc   :  { %p458_p3 = scmp.ne.s32.totalorder %s36_s25, %s457_s10  ;;  %p462_p4 = scmp.lt.s32.totalorder %s36_s25, %s36_s25 }
   0xd   :  { %p463_p5 = scmp.lt.s32.totalorder %s461_s11, %s457_s10 }
   0xf   :  { %p464_p6 = por %p463_p5, %p462_p4 }
  0x11   :  { %p465_p7 = pnand %p464_p6, %p458_p3 }
  0x13   :  { %468 = shalt.err (!%p465_p7)
}
  0x14   :  { %38 = dma.hbm_to_vmem [thread:$0]  %s809_s1, 16, %s36_s25, [#allocation6]  }
  0x15   :  { %s634_s14 = smov [#allocation8]   ;;  %s635_s16 = smov [#allocation11]  }
  0x16   :  { %s54_s15 = sshll.u32 %s634_s14, 4  ;;  %s76_s17 = sshll.u32 %s635_s16, 4  ;;  %s55_s15 = int_to_ptr.vmem [resolvable:$true] %s54_s15  ;;  %s77_s17 = int_to_ptr.vmem [resolvable:$true] %s76_s17 }
  0x17   :  { %s469_s20 = scalar_lea.hbm %s811_s3, 256 }
  0x18   :  { %p470_p8 = scmp.ne.s32.totalorder %s811_s3, %s469_s20  ;;  %p473_p9 = scmp.lt.u32.totalorder %s469_s20, %s811_s3 }
  0x1a   :  { %p475_p10 = pnand %p473_p9, %p470_p8 }
  0x1c   :  { %478 = shalt.err (!%p475_p10)
}
  0x1d   :  { %s479_s1 = scalar_lea.vmem %s55_s15, 256  ;;  %p484_p12 = scmp.lt.s32.totalorder %s55_s15, %s55_s15 }
  0x1e   :  { %p480_p11 = scmp.ne.s32.totalorder %s55_s15, %s479_s1  ;;  %p485_p13 = scmp.lt.s32.totalorder %s479_s1, %s479_s1 }
  0x20   :  { %p486_p0 = por %p485_p13, %p484_p12 }
  0x22   :  { %p487_p1 = pnand %p486_p0, %p480_p11 }
  0x24   :  { %490 = shalt.err (!%p487_p1)
}
  0x25   :  { %s636_s25 = smov 64   ;;  %s637_s26 = smov 4  }
  0x26   :  { %60 = dma.hbm_to_vmem [thread:$0]  %s811_s3, 256, %s55_s15, [#allocation9], %s636_s25, %s636_s25, %s637_s26  }
  0x27   :  { %s491_s8 = scalar_lea.hbm %s813_s5, 512 }
  0x28   :  { %p492_p2 = scmp.ne.s32.totalorder %s813_s5, %s491_s8  ;;  %p495_p3 = scmp.lt.u32.totalorder %s491_s8, %s813_s5 }
  0x2a   :  { %p497_p4 = pnand %p495_p3, %p492_p2 }
  0x2c   :  { %500 = shalt.err (!%p497_p4)
}
  0x2d   :  { %s501_s13 = scalar_lea.vmem %s77_s17, 512  ;;  %p506_p6 = scmp.lt.s32.totalorder %s77_s17, %s77_s17 }
  0x2e   :  { %p502_p5 = scmp.ne.s32.totalorder %s77_s17, %s501_s13  ;;  %p507_p7 = scmp.lt.s32.totalorder %s501_s13, %s501_s13 }
  0x30   :  { %p508_p8 = por %p507_p7, %p506_p6 }
  0x32   :  { %p509_p9 = pnand %p508_p8, %p502_p5 }
  0x34   :  { %512 = shalt.err (!%p509_p9)
}
  0x35   :  { %82 = dma.hbm_to_vmem [thread:$0]  %s813_s5, 512, %s77_s17, [#allocation12], %s636_s25, %s636_s25, %s637_s26  }
  0x36   :  { %s638_s15 = smov [#allocation2]   ;;  %s639_s18 = smov [#allocation7]  }
  0x37   :  { %s22_s16 = sshll.u32 %s638_s15, 4  ;;  %s45_s19 = sshll.u32 %s639_s18, 4  ;;  %s23_s16 = int_to_ptr.vmem [resolvable:$true] %s22_s16  ;;  %s46_s19 = int_to_ptr.vmem [resolvable:$true] %s45_s19 }
  0x38   :  { %s513_s22 = scalar_lea.hbm %s808_s0, 128 }
  0x39   :  { %p514_p10 = scmp.ne.s32.totalorder %s808_s0, %s513_s22  ;;  %p517_p11 = scmp.lt.u32.totalorder %s513_s22, %s808_s0 }
  0x3b   :  { %p519_p12 = pnand %p517_p11, %p514_p10 }
  0x3d   :  { %522 = shalt.err (!%p519_p12)
}
  0x3e   :  { %s523_s5 = scalar_lea.vmem %s23_s16, 128  ;;  %p528_p0 = scmp.lt.s32.totalorder %s23_s16, %s23_s16 }
  0x3f   :  { %p524_p13 = scmp.ne.s32.totalorder %s23_s16, %s523_s5  ;;  %p529_p1 = scmp.lt.s32.totalorder %s523_s5, %s523_s5 }
  0x41   :  { %p530_p2 = por %p529_p1, %p528_p0 }
  0x43   :  { %p531_p3 = pnand %p530_p2, %p524_p13 }
  0x45   :  { %534 = shalt.err (!%p531_p3)
}
  0x46   :  { %28 = dma.hbm_to_vmem [thread:$0]  %s808_s0, 128, %s23_s16, [#allocation3], %s636_s25, %s636_s25, %s637_s26  }
  0x47   :  { %s535_s8 = scalar_lea.hbm %s810_s2, 16 }
  0x48   :  { %p536_p4 = scmp.ne.s32.totalorder %s810_s2, %s535_s8  ;;  %p539_p5 = scmp.lt.u32.totalorder %s535_s8, %s810_s2 }
  0x4a   :  { %p541_p6 = pnand %p539_p5, %p536_p4 }
  0x4c   :  { %544 = shalt.err (!%p541_p6)
}
  0x4d   :  { %s545_s13 = scalar_lea.vmem %s46_s19, 16  ;;  %s549_s3 = scalar_lea.vmem %s46_s19, 32 }
  0x4e   :  { %p546_p7 = scmp.ne.s32.totalorder %s46_s19, %s545_s13  ;;  %p550_p8 = scmp.lt.s32.totalorder %s46_s19, %s46_s19 }
  0x4f   :  { %p551_p9 = scmp.lt.s32.totalorder %s549_s3, %s545_s13 }
  0x51   :  { %p552_p10 = por %p551_p9, %p550_p8 }
  0x53   :  { %p553_p11 = pnand %p552_p10, %p546_p7 }
  0x55   :  { %556 = shalt.err (!%p553_p11)
}
  0x56   :  { %48 = dma.hbm_to_vmem [thread:$0]  %s810_s2, 16, %s46_s19, [#allocation6]  }
  0x57   :  { %s640_s15 = smov [#allocation10]   ;;  %s641_s18 = smov [#allocation13]  }
  0x58   :  { %s67_s16 = sshll.u32 %s640_s15, 4  ;;  %s89_s20 = sshll.u32 %s641_s18, 4  ;;  %s68_s16 = int_to_ptr.vmem [resolvable:$true] %s67_s16  ;;  %s90_s20 = int_to_ptr.vmem [resolvable:$true] %s89_s20 }
  0x59   :  { %s557_s23 = scalar_lea.hbm %s812_s4, 16 }
  0x5a   :  { %p558_p12 = scmp.ne.s32.totalorder %s812_s4, %s557_s23  ;;  %p561_p13 = scmp.lt.u32.totalorder %s557_s23, %s812_s4 }
  0x5c   :  { %p563_p0 = pnand %p561_p13, %p558_p12 }
  0x5e   :  { %566 = shalt.err (!%p563_p0)
}
  0x5f   :  { %s567_s2 = scalar_lea.vmem %s68_s16, 16  ;;  %s571_s19 = scalar_lea.vmem %s68_s16, 32 }
  0x60   :  { %p568_p1 = scmp.ne.s32.totalorder %s68_s16, %s567_s2  ;;  %p572_p2 = scmp.lt.s32.totalorder %s68_s16, %s68_s16 }
  0x61   :  { %p573_p3 = scmp.lt.s32.totalorder %s571_s19, %s567_s2 }
  0x63   :  { %p574_p4 = por %p573_p3, %p572_p2 }
  0x65   :  { %p575_p5 = pnand %p574_p4, %p568_p1 }
  0x67   :  { %578 = shalt.err (!%p575_p5)
}
  0x68   :  { %70 = dma.hbm_to_vmem [thread:$0]  %s812_s4, 16, %s68_s16, [#allocation9]  }
  0x69   :  { %s579_s8 = scalar_lea.hbm %s814_s6, 16 }
  0x6a   :  { %p580_p6 = scmp.ne.s32.totalorder %s814_s6, %s579_s8  ;;  %p583_p7 = scmp.lt.u32.totalorder %s579_s8, %s814_s6 }
  0x6c   :  { %p585_p8 = pnand %p583_p7, %p580_p6 }
  0x6e   :  { %588 = shalt.err (!%p585_p8)
}
  0x6f   :  { %s589_s13 = scalar_lea.vmem %s90_s20, 16  ;;  %s593_s3 = scalar_lea.vmem %s90_s20, 32 }
  0x70   :  { %p590_p9 = scmp.ne.s32.totalorder %s90_s20, %s589_s13  ;;  %p594_p10 = scmp.lt.s32.totalorder %s90_s20, %s90_s20 }
  0x71   :  { %p595_p11 = scmp.lt.s32.totalorder %s593_s3, %s589_s13 }
  0x73   :  { %p596_p12 = por %p595_p11, %p594_p10 }
  0x75   :  { %p597_p13 = pnand %p596_p12, %p590_p9 }
  0x77   :  { %600 = shalt.err (!%p597_p13)
}
  0x78   :  { %92 = dma.hbm_to_vmem [thread:$0]  %s814_s6, 16, %s90_s20, [#allocation12]  }
  0x79   :  { %623 = dma.done.wait [#allocation3], 128  }
  0x7a   :  { %624 = vsyncadd [#allocation3], 4294967168 }
  0x7b   :  { %625 = dma.done.wait [#allocation6], 32  }
  0x7c   :  { %626 = vsyncadd [#allocation6], 4294967264 }
  0x7d   :  { %627 = dma.done.wait [#allocation9], 272  }
  0x7e   :  { %628 = vsyncadd [#allocation9], 4294967024 }
  0x7f   :  { %629 = dma.done.wait [#allocation12], 528  }
  0x80   :  { %630 = vsyncadd [#allocation12], 4294966768  ;;  %v386_v0 = vld [vmem:[#allocation2] sm:$0xff]   ;;  %vm121_vm0 = vcmask 261120   ;;  %v429_v15 = vld [vmem:[#allocation8] sm:$0xff]   ;;  %v642_v16 = vmov 0.0  }
  0x81   :  { %v778_v1 = vunpack.c.l.bf16 %v386_v0  ;;  %v780_v2 = vunpack.c.h.bf16 %v386_v0  ;;  %397 = vmatprep.subr.bf16.mxu0 %v642_v16  ;;  %405 = vmatprep.subr.bf16.mxu1 %v642_v16  ;;  %v430_v17 = vld [vmem:[#allocation8 + $0x8] sm:$0xff]   ;;  %vm643_vm1 = vmmov 0   ;;  %v367_v26 = vld [vmem:[#allocation5] ss:$0 sm:$0xff]  ;;  %v368_v30 = vld [vmem:[#allocation7] ss:$0 sm:$0xff] }
  0x82   :  { %398 = vmatpush3.bf16.msra.mxu0 %v429_v15  ;;  %401 = vmatprep.mubr.msk.bf16.mxu0 %vm643_vm1, %v642_v16  ;;  %v431_v35 = vld [vmem:[#allocation11] sm:$0xff]   ;;  %v432_v36 = vld [vmem:[#allocation11 + $0x8] sm:$0xff]   ;;  %v433_v37 = vld [vmem:[#allocation11 + $0x10] sm:$0xff]   ;;  %vm287_vm2 = vcmask 523264   ;;  %vm344_vm3 = vcmask 257024   ;;  %s644_s6 = smov [#allocation14]  }
  0x83   :  { %v122_v3 = vsel %vm121_vm0, %v778_v1, 0.0  ;;  %v125_v4 = vsel %vm121_vm0, %v780_v2, 0.0  ;;  %399 = vmatprep.subr.bf16.mxu0 %v642_v16  ;;  %413 = vmatprep.mubr.msk.bf16.mxu1 %vm643_vm1, %v642_v16  ;;  %v434_v38 = vld [vmem:[#allocation11 + $0x18] sm:$0xff]   ;;  %v375_v57 = vld [vmem:[#allocation13] ss:$0 sm:$0xff]  ;;  %s352_s14 = sshll.u32 %s644_s6, 4  ;;  %s353_s14 = int_to_ptr.vmem [resolvable:$true] %s352_s14 }
  0x84   :  { %123 = vadd.xlane.f32.xlu0 %v122_v3  ;;  %406 = vmatpush3.bf16.msra.mxu1 %v431_v35  ;;  %v369_v39 = vld [vmem:[#allocation10] ss:$0 sm:$0xff]  ;;  %s601_s15 = scalar_lea.vmem %s353_s14, 128  ;;  %p606_p1 = scmp.lt.s32.totalorder %s353_s14, %s353_s14 }
  0x85   :  { %407 = vmatprep.subr.bf16.mxu1 %v642_v16  ;;  %p602_p0 = scmp.ne.s32.totalorder %s353_s14, %s601_s15  ;;  %p607_p2 = scmp.lt.s32.totalorder %s601_s15, %s601_s15 }
  0x86   :  { %400 = vmatpush3.bf16.msra.mxu0 %v430_v17 }
  0x87   :  { %p608_p3 = por %p607_p2, %p606_p1 }
  0x88   :  { %126 = vadd.xlane.f32.xlu0 %v125_v4  ;;  %408 = vmatpush3.bf16.msra.mxu1 %v432_v36 }
  0x89   :  { %409 = vmatprep.subr.bf16.mxu1 %v642_v16  ;;  %p609_p4 = pnand %p608_p3, %p602_p0 }
  0x8c   :  { %410 = vmatpush3.bf16.msra.mxu1 %v433_v37 }
  0x8d   :  { %411 = vmatprep.subr.bf16.mxu1 %v642_v16 }
  0x90   :  { %412 = vmatpush3.bf16.msra.mxu1 %v434_v38 }
 0x111   :  { %v124_v5 = vpop.xlane.xlu0 %123 }
 0x112   :  { %v129_v6 = vmul.f32 0.03125, %v124_v5 }
 0x114   :  { %v131_v7 = vsub.f32 %v778_v1, %v129_v6 }
 0x115   :  { %v127_v8 = vpop.xlane.xlu0 %126 }
 0x116   :  { %v130_v9 = vmul.f32 0.03125, %v127_v8  ;;  %v133_v10 = vmul.f32 %v131_v7, %v131_v7 }
 0x118   :  { %v132_v11 = vsub.f32 %v780_v2, %v130_v9  ;;  %v135_v12 = vsel %vm121_vm0, %v133_v10, 0.0 }
 0x119   :  { %136 = vadd.xlane.f32.xlu1 %v135_v12 }
 0x11a   :  { %v134_v13 = vmul.f32 %v132_v11, %v132_v11 }
 0x11c   :  { %v138_v14 = vsel %vm121_vm0, %v134_v13, 0.0 }
 0x11d   :  { %139 = vadd.xlane.f32.xlu1 %v138_v14 }
 0x1a6   :  { %v137_v18 = vpop.xlane.xlu1 %136 }
 0x1a7   :  { %v141_v19 = vmul.f32 0.03125, %v137_v18 }
 0x1a9   :  { %v143_v20 = vadd.f32 1e-05, %v141_v19 }
 0x1aa   :  { %v140_v21 = vpop.xlane.xlu1 %139 }
 0x1ab   :  { %435 = vrsqrt.f32 %v143_v20  ;;  %v142_v22 = vmul.f32 0.03125, %v140_v21 }
 0x1ad   :  { %v144_v23 = vadd.f32 1e-05, %v142_v22 }
 0x1af   :  { %437 = vrsqrt.f32 %v144_v23 }
 0x1b5   :  { %v436_v24 = vpop.eup %435 }
 0x1b6   :  { %v147_v25 = vmul.f32 %v436_v24, %v131_v7 }
 0x1b8   :  { %v155_v29 = vmul.f32 %v367_v26, %v147_v25 }
 0x1b9   :  { %v438_v27 = vpop.eup %437 }
 0x1ba   :  { %v148_v28 = vmul.f32 %v438_v27, %v132_v11  ;;  %v163_v32 = vadd.f32 %v368_v30, %v155_v29 }
 0x1bc   :  { %v156_v31 = vmul.f32 %v367_v26, %v148_v28 }
 0x1be   :  { %v164_v33 = vadd.f32 %v368_v30, %v156_v31 }
 0x1c0   :  { %v165_v34 = vpack.c.bf16 %v164_v33, %v163_v32 }
 0x1c2   :  { %402 = vmatmul.mubr.msk.bf16.vlgmr.msra.gmra.mrb[0].mxu0 %vm121_vm0, %v165_v34 }
 0x295   :  { %v226_v40 = vpop.f32.mrb[0].mxu0 }
 0x296   :  { %v227_v41 = vadd.f32 %v369_v39, %v226_v40  ;;  %v403_v42 = vpop.f32.mrb[1].mxu0 }
 0x297   :  { %v229_v43 = vpop.f32.mrb[2].mxu0 }
 0x298   :  { %v373_v44 = vmul.f32 -1.442695, %v227_v41  ;;  %v230_v45 = vadd.f32 %v369_v39, %v229_v43  ;;  %v404_v46 = vpop.f32.mrb[3].mxu0 }
 0x29a   :  { %439 = vpow2.f32 %v373_v44  ;;  %v374_v47 = vmul.f32 -1.442695, %v230_v45 }
 0x29c   :  { %441 = vpow2.f32 %v374_v47 }
 0x2a4   :  { %v440_v48 = vpop.eup %439 }
 0x2a5   :  { %v239_v49 = vadd.f32 1.0, %v440_v48 }
 0x2a6   :  { %v442_v50 = vpop.eup %441 }
 0x2a7   :  { %443 = vrcp.f32 %v239_v49  ;;  %v240_v51 = vadd.f32 1.0, %v442_v50 }
 0x2a9   :  { %445 = vrcp.f32 %v240_v51 }
 0x2b1   :  { %v444_v52 = vpop.eup %443 }
 0x2b2   :  { %v245_v54 = vmul.f32 %v444_v52, %v227_v41 }
 0x2b3   :  { %v446_v53 = vpop.eup %445 }
 0x2b4   :  { %v246_v55 = vmul.f32 %v446_v53, %v230_v45 }
 0x2b6   :  { %v247_v56 = vpack.c.bf16 %v246_v55, %v245_v54 }
 0x2b8   :  { %414 = vmatmul.mubr.msk.bf16.vlgmr.msra.gmra.mrb[0].mxu1 %vm287_vm2, %v247_v56 }
 0x38b   :  { %v325_v58 = vpop.f32.mrb[0].mxu1 }
 0x38c   :  { %v326_v59 = vadd.f32 %v375_v57, %v325_v58  ;;  %v415_v60 = vpop.f32.mrb[1].mxu1 }
 0x38d   :  { %v328_v61 = vpop.f32.mrb[2].mxu1 }
 0x38e   :  { %v332_v62 = vmul.f32 0.5, %v326_v59  ;;  %v329_v63 = vadd.f32 %v375_v57, %v328_v61  ;;  %v416_v0 = vpop.f32.mrb[3].mxu1 }
 0x390   :  { %v334_v3 = vadd.f32 %v778_v1, %v332_v62  ;;  %v333_v4 = vmul.f32 0.5, %v329_v63 }
 0x392   :  { %v383_v5 = vpack.c.bf16 %v334_v3, %v334_v3  ;;  %v335_v6 = vadd.f32 %v780_v2, %v333_v4 }
 0x394   :  { %v384_v7 = vpack.c.bf16 %v335_v6, %v335_v6  ;;  %345 = vst.msk [vmem:[#allocation14] sm:$0xf] %vm344_vm3, %v383_v5 }
 0x396   :  { %346 = vst.msk [vmem:[#allocation14 + $0x4] sm:$0xf] %vm344_vm3, %v384_v7 }
 0x397   :  { %612 = shalt.err (!%p609_p4)
}
 0x398   :  { %s613_s20 = scalar_lea.hbm %s815_s7, 128 }
 0x399   :  { %p614_p5 = scmp.ne.s32.totalorder %s815_s7, %s613_s20  ;;  %p617_p6 = scmp.lt.u32.totalorder %s613_s20, %s815_s7 }
 0x39b   :  { %p619_p7 = pnand %p617_p6, %p614_p5 }
 0x39d   :  { %622 = shalt.err (!%p619_p7)
}
 0x39e   :  { %358 = dma.vmem_to_hbm [thread:$0]  %s353_s14, 128, %s815_s7, [#allocation4], %s636_s25, %s636_s25, %s637_s26  }
 0x39f   :  { %631 = dma.done.wait [#allocation4], 128  }
 0x3a0   :  { %632 = vsyncadd [#allocation4], 4294967168 }
 0x3a1   :  { %362 = vsyncpa [#allocation3], 1 }
 0x3a2   :  { %363 = vsyncpa [#allocation6], 1 }
 0x3a3   :  { %364 = vsyncpa [#allocation9], 1 }
 0x3a4   :  { %365 = vsyncpa [#allocation12], 1 }
 0x3a5   :  { %366 = vsyncpa [#allocation4], 1 }

// kernel: conformer_ctc_forward.16
= control target key start
LH: loop header
LB: loop body
LE: loop exit
PB: predicated region body
PF: predicated region fallthrough
CT: control target
= control target key end

     0   :  { %12 = vsyncpa [#allocation3], 0  ;;  %s764_s0 = inlined_call_operand.hbm [shape: bf16[16,32], index: 0, kind: input, shape index: {}]   ;;  %s765_s1 = inlined_call_operand.hbm [shape: f32[1,32], index: 1, kind: input, shape index: {}]   ;;  %s766_s2 = inlined_call_operand.hbm [shape: f32[1,32], index: 2, kind: input, shape index: {}]   ;;  %s767_s3 = inlined_call_operand.hbm [shape: bf16[32,32], index: 3, kind: input, shape index: {}]   ;;  %s768_s4 = inlined_call_operand.hbm [shape: bf16[32,32], index: 4, kind: input, shape index: {}]   ;;  %s769_s5 = inlined_call_operand.hbm [shape: f32[1,32], index: 5, kind: input, shape index: {}]   ;;  %s770_s6 = inlined_call_operand.hbm [shape: f32[1,32], index: 6, kind: input, shape index: {}]   ;;  %s771_s7 = inlined_call_operand.hbm [shape: bf16[16,32], index: 7, kind: output, shape index: {}]  }
   0x1   :  { %13 = vsyncpa [#allocation6], 0 }
   0x2   :  { %14 = vsyncpa [#allocation9], 0 }
   0x3   :  { %15 = vsyncpa [#allocation12], 0 }
   0x4   :  { %16 = vsyncpa [#allocation4], 0  ;;  %s598_s24 = smov [#allocation5]   ;;  %s412_s28 = scalar_lea.hbm %s765_s1, 16 }
   0x5   :  { %s35_s25 = sshll.u32 %s598_s24, 4  ;;  %p413_p0 = scmp.ne.s32.totalorder %s765_s1, %s412_s28  ;;  %s36_s25 = int_to_ptr.vmem [resolvable:$true] %s35_s25 }
   0x6   :  { %p416_p1 = scmp.lt.u32.totalorder %s412_s28, %s765_s1 }
   0x8   :  { %p418_p2 = pnand %p416_p1, %p413_p0 }
   0xa   :  { %421 = shalt.err (!%p418_p2)
}
   0xb   :  { %s422_s10 = scalar_lea.vmem %s36_s25, 16  ;;  %s426_s11 = scalar_lea.vmem %s36_s25, 32 }
   0xc   :  { %p423_p3 = scmp.ne.s32.totalorder %s36_s25, %s422_s10  ;;  %p427_p4 = scmp.lt.s32.totalorder %s36_s25, %s36_s25 }
   0xd   :  { %p428_p5 = scmp.lt.s32.totalorder %s426_s11, %s422_s10 }
   0xf   :  { %p429_p6 = por %p428_p5, %p427_p4 }
  0x11   :  { %p430_p7 = pnand %p429_p6, %p423_p3 }
  0x13   :  { %433 = shalt.err (!%p430_p7)
}
  0x14   :  { %38 = dma.hbm_to_vmem [thread:$0]  %s765_s1, 16, %s36_s25, [#allocation6]  }
  0x15   :  { %s599_s14 = smov [#allocation8]   ;;  %s600_s16 = smov [#allocation11]  }
  0x16   :  { %s54_s15 = sshll.u32 %s599_s14, 4  ;;  %s79_s17 = sshll.u32 %s600_s16, 4  ;;  %s55_s15 = int_to_ptr.vmem [resolvable:$true] %s54_s15  ;;  %s80_s17 = int_to_ptr.vmem [resolvable:$true] %s79_s17 }
  0x17   :  { %s434_s20 = scalar_lea.hbm %s767_s3, 256 }
  0x18   :  { %p435_p8 = scmp.ne.s32.totalorder %s767_s3, %s434_s20  ;;  %p438_p9 = scmp.lt.u32.totalorder %s434_s20, %s767_s3 }
  0x1a   :  { %p440_p10 = pnand %p438_p9, %p435_p8 }
  0x1c   :  { %443 = shalt.err (!%p440_p10)
}
  0x1d   :  { %s444_s1 = scalar_lea.vmem %s55_s15, 256  ;;  %p449_p12 = scmp.lt.s32.totalorder %s55_s15, %s55_s15 }
  0x1e   :  { %p445_p11 = scmp.ne.s32.totalorder %s55_s15, %s444_s1  ;;  %p450_p13 = scmp.lt.s32.totalorder %s444_s1, %s444_s1 }
  0x20   :  { %p451_p0 = por %p450_p13, %p449_p12 }
  0x22   :  { %p452_p1 = pnand %p451_p0, %p445_p11 }
  0x24   :  { %455 = shalt.err (!%p452_p1)
}
  0x25   :  { %s601_s25 = smov 64   ;;  %s602_s26 = smov 4  }
  0x26   :  { %60 = dma.hbm_to_vmem [thread:$0]  %s767_s3, 256, %s55_s15, [#allocation9], %s601_s25, %s601_s25, %s602_s26  }
  0x27   :  { %s456_s8 = scalar_lea.hbm %s769_s5, 16 }
  0x28   :  { %p457_p2 = scmp.ne.s32.totalorder %s769_s5, %s456_s8  ;;  %p460_p3 = scmp.lt.u32.totalorder %s456_s8, %s769_s5 }
  0x2a   :  { %p462_p4 = pnand %p460_p3, %p457_p2 }
  0x2c   :  { %465 = shalt.err (!%p462_p4)
}
  0x2d   :  { %s466_s13 = scalar_lea.vmem %s80_s17, 16  ;;  %s470_s14 = scalar_lea.vmem %s80_s17, 32 }
  0x2e   :  { %p467_p5 = scmp.ne.s32.totalorder %s80_s17, %s466_s13  ;;  %p471_p6 = scmp.lt.s32.totalorder %s80_s17, %s80_s17 }
  0x2f   :  { %p472_p7 = scmp.lt.s32.totalorder %s470_s14, %s466_s13 }
  0x31   :  { %p473_p8 = por %p472_p7, %p471_p6 }
  0x33   :  { %p474_p9 = pnand %p473_p8, %p467_p5 }
  0x35   :  { %477 = shalt.err (!%p474_p9)
}
  0x36   :  { %82 = dma.hbm_to_vmem [thread:$0]  %s769_s5, 16, %s80_s17, [#allocation12]  }
  0x37   :  { %s603_s16 = smov [#allocation2]   ;;  %s604_s19 = smov [#allocation7]  }
  0x38   :  { %s22_s18 = sshll.u32 %s603_s16, 4  ;;  %s45_s20 = sshll.u32 %s604_s19, 4  ;;  %s23_s18 = int_to_ptr.vmem [resolvable:$true] %s22_s18  ;;  %s46_s20 = int_to_ptr.vmem [resolvable:$true] %s45_s20 }
  0x39   :  { %s478_s23 = scalar_lea.hbm %s764_s0, 128 }
  0x3a   :  { %p479_p10 = scmp.ne.s32.totalorder %s764_s0, %s478_s23  ;;  %p482_p11 = scmp.lt.u32.totalorder %s478_s23, %s764_s0 }
  0x3c   :  { %p484_p12 = pnand %p482_p11, %p479_p10 }
  0x3e   :  { %487 = shalt.err (!%p484_p12)
}
  0x3f   :  { %s488_s5 = scalar_lea.vmem %s23_s18, 128  ;;  %p493_p0 = scmp.lt.s32.totalorder %s23_s18, %s23_s18 }
  0x40   :  { %p489_p13 = scmp.ne.s32.totalorder %s23_s18, %s488_s5  ;;  %p494_p1 = scmp.lt.s32.totalorder %s488_s5, %s488_s5 }
  0x42   :  { %p495_p2 = por %p494_p1, %p493_p0 }
  0x44   :  { %p496_p3 = pnand %p495_p2, %p489_p13 }
  0x46   :  { %499 = shalt.err (!%p496_p3)
}
  0x47   :  { %28 = dma.hbm_to_vmem [thread:$0]  %s764_s0, 128, %s23_s18, [#allocation3], %s601_s25, %s601_s25, %s602_s26  }
  0x48   :  { %s500_s9 = scalar_lea.hbm %s766_s2, 16 }
  0x49   :  { %p501_p4 = scmp.ne.s32.totalorder %s766_s2, %s500_s9  ;;  %p504_p5 = scmp.lt.u32.totalorder %s500_s9, %s766_s2 }
  0x4b   :  { %p506_p6 = pnand %p504_p5, %p501_p4 }
  0x4d   :  { %509 = shalt.err (!%p506_p6)
}
  0x4e   :  { %s510_s14 = scalar_lea.vmem %s46_s20, 16  ;;  %s514_s3 = scalar_lea.vmem %s46_s20, 32 }
  0x4f   :  { %p511_p7 = scmp.ne.s32.totalorder %s46_s20, %s510_s14  ;;  %p515_p8 = scmp.lt.s32.totalorder %s46_s20, %s46_s20 }
  0x50   :  { %p516_p9 = scmp.lt.s32.totalorder %s514_s3, %s510_s14 }
  0x52   :  { %p517_p10 = por %p516_p9, %p515_p8 }
  0x54   :  { %p518_p11 = pnand %p517_p10, %p511_p7 }
  0x56   :  { %521 = shalt.err (!%p518_p11)
}
  0x57   :  { %48 = dma.hbm_to_vmem [thread:$0]  %s766_s2, 16, %s46_s20, [#allocation6]  }
  0x58   :  { %s605_s16 = smov [#allocation10]   ;;  %s606_s19 = smov [#allocation13]  }
  0x59   :  { %s66_s18 = sshll.u32 %s605_s16, 4  ;;  %s89_s21 = sshll.u32 %s606_s19, 4  ;;  %s67_s18 = int_to_ptr.vmem [resolvable:$true] %s66_s18  ;;  %s90_s21 = int_to_ptr.vmem [resolvable:$true] %s89_s21 }
  0x5a   :  { %s522_s24 = scalar_lea.hbm %s768_s4, 256 }
  0x5b   :  { %p523_p12 = scmp.ne.s32.totalorder %s768_s4, %s522_s24  ;;  %p526_p13 = scmp.lt.u32.totalorder %s522_s24, %s768_s4 }
  0x5d   :  { %p528_p0 = pnand %p526_p13, %p523_p12 }
  0x5f   :  { %531 = shalt.err (!%p528_p0)
}
  0x60   :  { %s532_s2 = scalar_lea.vmem %s67_s18, 256  ;;  %p537_p2 = scmp.lt.s32.totalorder %s67_s18, %s67_s18 }
  0x61   :  { %p533_p1 = scmp.ne.s32.totalorder %s67_s18, %s532_s2  ;;  %p538_p3 = scmp.lt.s32.totalorder %s532_s2, %s532_s2 }
  0x63   :  { %p539_p4 = por %p538_p3, %p537_p2 }
  0x65   :  { %p540_p5 = pnand %p539_p4, %p533_p1 }
  0x67   :  { %543 = shalt.err (!%p540_p5)
}
  0x68   :  { %72 = dma.hbm_to_vmem [thread:$0]  %s768_s4, 256, %s67_s18, [#allocation9], %s601_s25, %s601_s25, %s602_s26  }
  0x69   :  { %s544_s8 = scalar_lea.hbm %s770_s6, 16 }
  0x6a   :  { %p545_p6 = scmp.ne.s32.totalorder %s770_s6, %s544_s8  ;;  %p548_p7 = scmp.lt.u32.totalorder %s544_s8, %s770_s6 }
  0x6c   :  { %p550_p8 = pnand %p548_p7, %p545_p6 }
  0x6e   :  { %553 = shalt.err (!%p550_p8)
}
  0x6f   :  { %s554_s13 = scalar_lea.vmem %s90_s21, 16  ;;  %s558_s14 = scalar_lea.vmem %s90_s21, 32 }
  0x70   :  { %p555_p9 = scmp.ne.s32.totalorder %s90_s21, %s554_s13  ;;  %p559_p10 = scmp.lt.s32.totalorder %s90_s21, %s90_s21 }
  0x71   :  { %p560_p11 = scmp.lt.s32.totalorder %s558_s14, %s554_s13 }
  0x73   :  { %p561_p12 = por %p560_p11, %p559_p10 }
  0x75   :  { %p562_p13 = pnand %p561_p12, %p555_p9 }
  0x77   :  { %565 = shalt.err (!%p562_p13)
}
  0x78   :  { %92 = dma.hbm_to_vmem [thread:$0]  %s770_s6, 16, %s90_s21, [#allocation12]  }
  0x79   :  { %588 = dma.done.wait [#allocation3], 128  }
  0x7a   :  { %589 = vsyncadd [#allocation3], 4294967168 }
  0x7b   :  { %590 = dma.done.wait [#allocation6], 32  }
  0x7c   :  { %591 = vsyncadd [#allocation6], 4294967264 }
  0x7d   :  { %592 = dma.done.wait [#allocation9], 512  }
  0x7e   :  { %593 = vsyncadd [#allocation9], 4294966784 }
  0x7f   :  { %594 = dma.done.wait [#allocation12], 32  }
  0x80   :  { %595 = vsyncadd [#allocation12], 4294967264  ;;  %v359_v0 = vld [vmem:[#allocation2] sm:$0xff]   ;;  %vm121_vm0 = vcmask 261120   ;;  %v396_v15 = vld [vmem:[#allocation8] sm:$0xff]   ;;  %v607_v17 = vmov 0.0  }
  0x81   :  { %v360_v1 = vunpack.c.l.bf16 %v359_v0  ;;  %v361_v2 = vunpack.c.h.bf16 %v359_v0  ;;  %v397_v16 = vld [vmem:[#allocation10] sm:$0xff]   ;;  %368 = vmatprep.subr.bf16.mxu0 %v607_v17  ;;  %376 = vmatprep.subr.bf16.mxu1 %v607_v17  ;;  %v398_v18 = vld [vmem:[#allocation8 + $0x8] sm:$0xff]   ;;  %v399_v19 = vld [vmem:[#allocation10 + $0x8] sm:$0xff]   ;;  %vm608_vm1 = vmmov 0   ;;  %vm319_vm2 = vcmask 257024   ;;  %s609_s6 = smov [#allocation14]  }
  0x82   :  { %369 = vmatpush3.bf16.msra.mxu0 %v396_v15  ;;  %377 = vmatpush3.bf16.msra.mxu1 %v397_v16  ;;  %v342_v28 = vld [vmem:[#allocation5] ss:$0 sm:$0xff]  ;;  %v343_v32 = vld [vmem:[#allocation7] ss:$0 sm:$0xff]  ;;  %v348_v37 = vld [vmem:[#allocation13] ss:$0 sm:$0xff] }
  0x83   :  { %v122_v3 = vsel %vm121_vm0, %v360_v1, 0.0  ;;  %v125_v4 = vsel %vm121_vm0, %v361_v2, 0.0  ;;  %370 = vmatprep.subr.bf16.mxu0 %v607_v17  ;;  %378 = vmatprep.subr.bf16.mxu1 %v607_v17  ;;  %v344_v54 = vld [vmem:[#allocation11] ss:$0 sm:$0xff]  ;;  %s327_s0 = sshll.u32 %s609_s6, 4  ;;  %s328_s0 = int_to_ptr.vmem [resolvable:$true] %s327_s0 }
  0x84   :  { %123 = vadd.xlane.f32.xlu0 %v122_v3  ;;  %372 = vmatprep.mubr.msk.bf16.mxu0 %vm608_vm1, %v607_v17  ;;  %s566_s15 = scalar_lea.vmem %s328_s0, 128  ;;  %p571_p1 = scmp.lt.s32.totalorder %s328_s0, %s328_s0 }
  0x85   :  { %380 = vmatprep.mubr.msk.bf16.mxu1 %vm608_vm1, %v607_v17  ;;  %p567_p0 = scmp.ne.s32.totalorder %s328_s0, %s566_s15  ;;  %p572_p2 = scmp.lt.s32.totalorder %s566_s15, %s566_s15 }
  0x86   :  { %371 = vmatpush3.bf16.msra.mxu0 %v398_v18  ;;  %379 = vmatpush3.bf16.msra.mxu1 %v399_v19 }
  0x87   :  { %p573_p3 = por %p572_p2, %p571_p1 }
  0x88   :  { %126 = vadd.xlane.f32.xlu0 %v125_v4 }
  0x89   :  { %p574_p4 = pnand %p573_p3, %p567_p0 }
 0x111   :  { %v124_v5 = vpop.xlane.xlu0 %123 }
 0x112   :  { %v129_v6 = vmul.f32 0.03125, %v124_v5 }
 0x114   :  { %v131_v7 = vsub.f32 %v360_v1, %v129_v6 }
 0x115   :  { %v127_v8 = vpop.xlane.xlu0 %126 }
 0x116   :  { %v130_v9 = vmul.f32 0.03125, %v127_v8  ;;  %v133_v10 = vmul.f32 %v131_v7, %v131_v7 }
 0x118   :  { %v132_v11 = vsub.f32 %v361_v2, %v130_v9  ;;  %v135_v12 = vsel %vm121_vm0, %v133_v10, 0.0 }
 0x119   :  { %136 = vadd.xlane.f32.xlu1 %v135_v12 }
 0x11a   :  { %v134_v13 = vmul.f32 %v132_v11, %v132_v11 }
 0x11c   :  { %v138_v14 = vsel %vm121_vm0, %v134_v13, 0.0 }
 0x11d   :  { %139 = vadd.xlane.f32.xlu1 %v138_v14 }
 0x1a6   :  { %v137_v20 = vpop.xlane.xlu1 %136 }
 0x1a7   :  { %v141_v21 = vmul.f32 0.03125, %v137_v20 }
 0x1a9   :  { %v143_v22 = vadd.f32 1e-05, %v141_v21 }
 0x1aa   :  { %v140_v23 = vpop.xlane.xlu1 %139 }
 0x1ab   :  { %400 = vrsqrt.f32 %v143_v22  ;;  %v142_v24 = vmul.f32 0.03125, %v140_v23 }
 0x1ad   :  { %v144_v25 = vadd.f32 1e-05, %v142_v24 }
 0x1af   :  { %402 = vrsqrt.f32 %v144_v25 }
 0x1b5   :  { %v401_v26 = vpop.eup %400 }
 0x1b6   :  { %v147_v27 = vmul.f32 %v401_v26, %v131_v7 }
 0x1b8   :  { %v155_v31 = vmul.f32 %v342_v28, %v147_v27 }
 0x1b9   :  { %v403_v29 = vpop.eup %402 }
 0x1ba   :  { %v148_v30 = vmul.f32 %v403_v29, %v132_v11  ;;  %v163_v34 = vadd.f32 %v343_v32, %v155_v31 }
 0x1bc   :  { %v156_v33 = vmul.f32 %v342_v28, %v148_v30 }
 0x1be   :  { %v164_v35 = vadd.f32 %v343_v32, %v156_v33 }
 0x1c0   :  { %v165_v36 = vpack.c.bf16 %v164_v35, %v163_v34 }
 0x1c2   :  { %373 = vmatmul.mubr.msk.bf16.vlgmr.msra.gmra.mrb[0].mxu0 %vm121_vm0, %v165_v36  ;;  %381 = vmatmul.mubr.msk.bf16.vlgmr.msra.gmra.mrb[0].mxu1 %vm121_vm0, %v165_v36 }
 0x295   :  { %v226_v38 = vpop.f32.mrb[0].mxu0  ;;  %v290_v39 = vpop.f32.mrb[0].mxu1 }
 0x296   :  { %v291_v40 = vadd.f32 %v348_v37, %v290_v39  ;;  %v374_v41 = vpop.f32.mrb[1].mxu0  ;;  %v382_v42 = vpop.f32.mrb[1].mxu1  ;;  %v227_v55 = vadd.f32 %v344_v54, %v226_v38 }
 0x297   :  { %v229_v43 = vpop.f32.mrb[2].mxu0  ;;  %v293_v44 = vpop.f32.mrb[2].mxu1 }
 0x298   :  { %v352_v45 = vmul.f32 -1.442695, %v291_v40  ;;  %v294_v46 = vadd.f32 %v348_v37, %v293_v44  ;;  %v375_v47 = vpop.f32.mrb[3].mxu0  ;;  %v383_v48 = vpop.f32.mrb[3].mxu1  ;;  %v230_v57 = vadd.f32 %v344_v54, %v229_v43 }
 0x29a   :  { %404 = vpow2.f32 %v352_v45  ;;  %v353_v49 = vmul.f32 -1.442695, %v294_v46 }
 0x29c   :  { %406 = vpow2.f32 %v353_v49 }
 0x2a4   :  { %v405_v50 = vpop.eup %404 }
 0x2a5   :  { %v303_v51 = vadd.f32 1.0, %v405_v50 }
 0x2a6   :  { %v407_v52 = vpop.eup %406 }
 0x2a7   :  { %408 = vrcp.f32 %v303_v51  ;;  %v304_v53 = vadd.f32 1.0, %v407_v52 }
 0x2a9   :  { %410 = vrcp.f32 %v304_v53 }
 0x2b1   :  { %v409_v56 = vpop.eup %408 }
 0x2b2   :  { %v309_v58 = vmul.f32 %v409_v56, %v227_v55 }
 0x2b3   :  { %v411_v59 = vpop.eup %410 }
 0x2b4   :  { %v310_v60 = vmul.f32 %v411_v59, %v230_v57  ;;  %v356_v61 = vpack.c.bf16 %v309_v58, %v309_v58 }
 0x2b6   :  { %v357_v62 = vpack.c.bf16 %v310_v60, %v310_v60  ;;  %320 = vst.msk [vmem:[#allocation14] sm:$0xf] %vm319_vm2, %v356_v61 }
 0x2b8   :  { %321 = vst.msk [vmem:[#allocation14 + $0x4] sm:$0xf] %vm319_vm2, %v357_v62 }
 0x2b9   :  { %577 = shalt.err (!%p574_p4)
}
 0x2ba   :  { %s578_s19 = scalar_lea.hbm %s771_s7, 128 }
 0x2bb   :  { %p579_p5 = scmp.ne.s32.totalorder %s771_s7, %s578_s19  ;;  %p582_p6 = scmp.lt.u32.totalorder %s578_s19, %s771_s7 }
 0x2bd   :  { %p584_p7 = pnand %p582_p6, %p579_p5 }
 0x2bf   :  { %587 = shalt.err (!%p584_p7)
}
 0x2c0   :  { %333 = dma.vmem_to_hbm [thread:$0]  %s328_s0, 128, %s771_s7, [#allocation4], %s601_s25, %s601_s25, %s602_s26  }
 0x2c1   :  { %596 = dma.done.wait [#allocation4], 128  }
 0x2c2   :  { %597 = vsyncadd [#allocation4], 4294967168 }
 0x2c3   :  { %337 = vsyncpa [#allocation3], 1 }
 0x2c4   :  { %338 = vsyncpa [#allocation6], 1 }
 0x2c5   :  { %339 = vsyncpa [#allocation9], 1 }
 0x2c6   :  { %340 = vsyncpa [#allocation12], 1 }
 0x2c7   :  { %341 = vsyncpa [#allocation4], 1 }

// kernel: conformer_ctc_forward.17
= control target key start
LH: loop header
LB: loop body
LE: loop exit
PB: predicated region body
PF: predicated region fallthrough
CT: control target
= control target key end

     0   :  { %s1718_s0 = inlined_call_operand.hbm [shape: bf16[2,14,32], index: 0, kind: input, shape index: {}]   ;;  %s1719_s1 = inlined_call_operand.hbm [shape: f32[7,32], index: 1, kind: input, shape index: {}]   ;;  %s1720_s2 = inlined_call_operand.hbm [shape: f32[1,32], index: 2, kind: input, shape index: {}]   ;;  %s1721_s3 = inlined_call_operand.hbm [shape: f32[1,32], index: 3, kind: input, shape index: {}]   ;;  %s1722_s4 = inlined_call_operand.hbm [shape: f32[1,32], index: 4, kind: input, shape index: {}]   ;;  %s1723_s5 = inlined_call_operand.hbm [shape: bf16[32,32], index: 5, kind: input, shape index: {}]   ;;  %s1724_s6 = inlined_call_operand.hbm [shape: f32[1,32], index: 6, kind: input, shape index: {}]   ;;  %s1725_s7 = inlined_call_operand.hbm [shape: bf16[2,8,32], index: 7, kind: input, shape index: {}]   ;;  %s1726_s8 = inlined_call_operand.hbm [shape: bf16[2,8,32], index: 8, kind: output, shape index: {}]  }
   0x1   :  { %1732 = sst [smem:[#allocation23_spill]] %s1718_s0 }
   0x2   :  { %1733 = sst [smem:[#allocation24_spill]] %s1719_s1 }
   0x3   :  { %1734 = sst [smem:[#allocation25_spill]] %s1720_s2 }
   0x4   :  { %1735 = sst [smem:[#allocation26_spill]] %s1721_s3 }
   0x5   :  { %1736 = sst [smem:[#allocation27_spill]] %s1722_s4 }
   0x6   :  { %13 = vsyncpa [#allocation3], 0 }
   0x7   :  { %15 = vsyncpa [#allocation3 + $0x1], 0 }
   0x8   :  { %16 = vsyncpa [#allocation6], 0 }
   0x9   :  { %17 = vsyncpa [#allocation9], 0 }
   0xa   :  { %18 = vsyncpa [#allocation12], 0 }
   0xb   :  { %19 = vsyncpa [#allocation15], 0 }
   0xc   :  { %21 = vsyncpa [#allocation15 + $0x1], 0 }
   0xd   :  { %22 = vsyncpa [#allocation4], 0 }
   0xe   :  { %24 = vsyncpa [#allocation4 + $0x1], 0  ;;  %s1343_s27 = smov 0   ;;  %s1345_s28 = smov 0  }
   0xf   :  { %s1347_s29 = smov 0   ;;  %s1349_s30 = smov 0  }
  0x10 LB: > { %s1285_s9 = smov [#allocation5]   ;;  %s1364_s11 = sadd.s32 4294967295, %s1283_s30   ;;  %s1283_s30 = sphi %s1349_s30, %s1767_s30   ;;  %s1279_s29 = sphi %s1347_s29, %s1766_s29   ;;  %s1275_s28 = sphi %s1345_s28, %s1765_s28   ;;  %s1271_s27 = sphi %s1343_s27, %s1764_s27  }
  0x11   : > { %s252_s10 = sshll.u32 %s1285_s9, 4  ;;  %p804_p0 = scmp.ge.s32.totalorder %s1283_s30, 1  ;;  %s253_s10 = int_to_ptr.vmem [resolvable:$true] %s252_s10 }
  0x12   : > { %p1727_p1 = scmp.eq.s32.totalorder %s1364_s11, 0  ;;  %p239_p2 = scmp.lt.s32.totalorder %s1283_s30, 3 }
  0x13   : > { %s1286_s13 = smov [#allocation8]   ;;  %s1287_s15 = smov [#allocation11]  }
  0x14   : > { %p1369_p3 = pnand %p804_p0, %p239_p2  ;;  %s274_s14 = sshll.u32 %s1286_s13, 4  ;;  %s1376_s14 = int_to_ptr.vmem [resolvable:$true] %s274_s14 }
  0x15   : > { %s295_s16 = sshll.u32 %s1287_s15, 4  ;;  %s1739_s1 = sld [smem:[#allocation24_spill]]  ;;  %s1384_s16 = int_to_ptr.vmem [resolvable:$true] %s295_s16 }
  0x16   : > { %s1737_s12 = scalar_select %p1369_p3, 1, 0 }
  0x17   : > { %p881_p5 = pneg %p1369_p3 }
  0x19   : > { %p1380_p6 = pnand %p881_p5, %p1727_p1 }
  0x1b   : > { %s973_s20 = scalar_lea.hbm %s1739_s1, 128  ;;  %p1394_p8 = pneg %p1380_p6 }
  0x1c   : > { %p974_p7 = scmp.ne.s32.totalorder %s1739_s1, %s973_s20  ;;  %p980_p11 = scmp.lt.u32.totalorder %s973_s20, %s1739_s1 }
  0x1e   : > { %p976_p9 = pnand %p1394_p8, %p974_p7 }
  0x20   : > { %p977_p10 = pneg %p976_p9 }
  0x22   : > { %p982_p12 = pnand %p980_p11, %p977_p10 }
  0x24   : > { %985 = shalt.err (!%p982_p12)
}
  0x25   : > { %s986_s26 = scalar_lea.vmem %s253_s10, 128  ;;  %p994_p5 = scmp.lt.s32.totalorder %s253_s10, %s253_s10 }
  0x26   : > { %p987_p13 = scmp.ne.s32.totalorder %s253_s10, %s986_s26  ;;  %p995_p4 = scmp.lt.s32.totalorder %s986_s26, %s986_s26 }
  0x28   : > { %p989_p0 = pnand %p987_p13, %p1394_p8  ;;  %p996_p1 = por %p995_p4, %p994_p5 }
  0x2a   : > { %p990_p2 = pneg %p989_p0 }
  0x2c   : > { %p997_p3 = pnand %p996_p1, %p990_p2 }
  0x2e   : > { %1000 = shalt.err (!%p997_p3)
}
  0x2f   : > { %884 = dma.hbm_to_vmem [thread:$0]  (!%p1380_p6), %s1739_s1, 128, %s253_s10, [#allocation6]  }
  0x30   : > { %s1741_s3 = sld [smem:[#allocation26_spill]] }
  0x36   : > { %s1001_s19 = scalar_lea.hbm %s1741_s3, 16 }
  0x37   : > { %p1002_p7 = scmp.ne.s32.totalorder %s1741_s3, %s1001_s19  ;;  %p1008_p1 = scmp.lt.u32.totalorder %s1001_s19, %s1741_s3 }
  0x39   : > { %p1004_p9 = pnand %p1002_p7, %p1394_p8 }
  0x3b   : > { %p1005_p4 = pneg %p1004_p9 }
  0x3d   : > { %p1010_p3 = pnand %p1008_p1, %p1005_p4 }
  0x3f   : > { %1013 = shalt.err (!%p1010_p3)
}
  0x40   : > { %s1014_s10 = scalar_lea.vmem %s1376_s14, 16  ;;  %s1021_s25 = scalar_lea.vmem %s1376_s14, 32 }
  0x41   : > { %p1015_p10 = scmp.ne.s32.totalorder %s1376_s14, %s1014_s10  ;;  %p1022_p13 = scmp.lt.s32.totalorder %s1376_s14, %s1376_s14 }
  0x42   : > { %p1023_p0 = scmp.lt.s32.totalorder %s1021_s25, %s1014_s10 }
  0x43   : > { %p1017_p11 = pnand %p1015_p10, %p1394_p8 }
  0x44   : > { %p1024_p2 = por %p1023_p0, %p1022_p13 }
  0x45   : > { %p1018_p12 = pneg %p1017_p11 }
  0x47   : > { %p1025_p5 = pnand %p1024_p2, %p1018_p12 }
  0x49   : > { %1028 = shalt.err (!%p1025_p5)
}
  0x4a   : > { %890 = dma.hbm_to_vmem [thread:$0]  (!%p1380_p6), %s1741_s3, 16, %s1376_s14, [#allocation9]  }
  0x4b   : > { %s1029_s18 = scalar_lea.hbm %s1723_s5, 256 }
  0x4c   : > { %p1030_p7 = scmp.ne.s32.totalorder %s1723_s5, %s1029_s18  ;;  %p1036_p1 = scmp.lt.u32.totalorder %s1029_s18, %s1723_s5 }
  0x4e   : > { %p1032_p9 = pnand %p1030_p7, %p1394_p8 }
  0x50   : > { %p1033_p4 = pneg %p1032_p9 }
  0x52   : > { %p1038_p3 = pnand %p1036_p1, %p1033_p4 }
  0x54   : > { %1041 = shalt.err (!%p1038_p3)
}
  0x55   : > { %s1042_s14 = scalar_lea.vmem %s1384_s16, 256  ;;  %p1050_p13 = scmp.lt.s32.totalorder %s1384_s16, %s1384_s16 }
  0x56   : > { %p1043_p10 = scmp.ne.s32.totalorder %s1384_s16, %s1042_s14  ;;  %p1051_p0 = scmp.lt.s32.totalorder %s1042_s14, %s1042_s14 }
  0x58   : > { %p1045_p11 = pnand %p1043_p10, %p1394_p8  ;;  %p1052_p2 = por %p1051_p0, %p1050_p13 }
  0x5a   : > { %p1046_p12 = pneg %p1045_p11 }
  0x5c   : > { %p1053_p5 = pnand %p1052_p2, %p1046_p12 }
  0x5e   : > { %1056 = shalt.err (!%p1053_p5)
}
  0x5f   : > { %s1729_s24 = smov 64   ;;  %s1289_s10 = smov 4  }
  0x60   : > { %896 = dma.hbm_to_vmem [thread:$0]  (!%p1380_p6), %s1723_s5, 256, %s1384_s16, [#allocation12], %s1729_s24, %s1729_s24, %s1289_s10  }
  0x61   : > { %s1290_s9 = smov [#allocation7]   ;;  %s1291_s15 = smov [#allocation10]  }
  0x62   : > { %s263_s13 = sshll.u32 %s1290_s9, 4  ;;  %s285_s18 = sshll.u32 %s1291_s15, 4  ;;  %s264_s13 = int_to_ptr.vmem [resolvable:$true] %s263_s13  ;;  %s286_s18 = int_to_ptr.vmem [resolvable:$true] %s285_s18 }
  0x63   : > { %s1742_s2 = sld [smem:[#allocation25_spill]] }
  0x69   : > { %s1057_s21 = scalar_lea.hbm %s1742_s2, 16 }
  0x6a   : > { %p1058_p7 = scmp.ne.s32.totalorder %s1742_s2, %s1057_s21  ;;  %p1064_p1 = scmp.lt.u32.totalorder %s1057_s21, %s1742_s2 }
  0x6c   : > { %p1060_p9 = pnand %p1058_p7, %p1394_p8 }
  0x6e   : > { %p1061_p4 = pneg %p1060_p9 }
  0x70   : > { %p1066_p3 = pnand %p1064_p1, %p1061_p4 }
  0x72   : > { %1069 = shalt.err (!%p1066_p3)
}
  0x73   : > { %s1070_s16 = scalar_lea.vmem %s264_s13, 16  ;;  %s1077_s25 = scalar_lea.vmem %s264_s13, 32 }
  0x74   : > { %p1071_p10 = scmp.ne.s32.totalorder %s264_s13, %s1070_s16  ;;  %p1078_p13 = scmp.lt.s32.totalorder %s264_s13, %s264_s13 }
  0x75   : > { %p1079_p0 = scmp.lt.s32.totalorder %s1077_s25, %s1070_s16 }
  0x76   : > { %p1073_p11 = pnand %p1071_p10, %p1394_p8 }
  0x77   : > { %p1080_p2 = por %p1079_p0, %p1078_p13 }
  0x78   : > { %p1074_p12 = pneg %p1073_p11 }
  0x7a   : > { %p1081_p5 = pnand %p1080_p2, %p1074_p12 }
  0x7c   : > { %1084 = shalt.err (!%p1081_p5)
}
  0x7d   : > { %887 = dma.hbm_to_vmem [thread:$0]  (!%p1380_p6), %s1742_s2, 16, %s264_s13, [#allocation6]  }
  0x7e   : > { %s1743_s4 = sld [smem:[#allocation27_spill]] }
  0x84   : > { %s1085_s15 = scalar_lea.hbm %s1743_s4, 16 }
  0x85   : > { %p1086_p7 = scmp.ne.s32.totalorder %s1743_s4, %s1085_s15  ;;  %p1092_p1 = scmp.lt.u32.totalorder %s1085_s15, %s1743_s4 }
  0x87   : > { %p1088_p9 = pnand %p1086_p7, %p1394_p8 }
  0x89   : > { %p1089_p4 = pneg %p1088_p9 }
  0x8b   : > { %p1094_p3 = pnand %p1092_p1, %p1089_p4 }
  0x8d   : > { %1097 = shalt.err (!%p1094_p3)
}
  0x8e   : > { %s1098_s14 = scalar_lea.vmem %s286_s18, 16  ;;  %s1105_s13 = scalar_lea.vmem %s286_s18, 32 }
  0x8f   : > { %p1099_p10 = scmp.ne.s32.totalorder %s286_s18, %s1098_s14  ;;  %p1106_p13 = scmp.lt.s32.totalorder %s286_s18, %s286_s18 }
  0x90   : > { %p1107_p0 = scmp.lt.s32.totalorder %s1105_s13, %s1098_s14 }
  0x91   : > { %p1101_p11 = pnand %p1099_p10, %p1394_p8 }
  0x92   : > { %p1108_p2 = por %p1107_p0, %p1106_p13 }
  0x93   : > { %p1102_p12 = pneg %p1101_p11 }
  0x95   : > { %p1109_p5 = pnand %p1108_p2, %p1102_p12 }
  0x97   : > { %1112 = shalt.err (!%p1109_p5)
}
  0x98   : > { %893 = dma.hbm_to_vmem [thread:$0]  (!%p1380_p6), %s1743_s4, 16, %s286_s18, [#allocation9]  }
  0x99   : > { %s1292_s26 = smov [#allocation13]   ;;  %s1113_s15 = scalar_lea.hbm %s1724_s6, 16 }
  0x9a   : > { %s309_s9 = sshll.u32 %s1292_s26, 4  ;;  %p1114_p7 = scmp.ne.s32.totalorder %s1724_s6, %s1113_s15  ;;  %s310_s9 = int_to_ptr.vmem [resolvable:$true] %s309_s9 }
  0x9b   : > { %p1120_p1 = scmp.lt.u32.totalorder %s1113_s15, %s1724_s6 }
  0x9c   : > { %p1116_p9 = pnand %p1114_p7, %p1394_p8 }
  0x9e   : > { %p1117_p4 = pneg %p1116_p9 }
  0xa0   : > { %p1122_p3 = pnand %p1120_p1, %p1117_p4 }
  0xa2   : > { %1125 = shalt.err (!%p1122_p3)
}
  0xa3   : > { %s1126_s18 = scalar_lea.vmem %s310_s9, 16  ;;  %s1133_s14 = scalar_lea.vmem %s310_s9, 32 }
  0xa4   : > { %p1127_p10 = scmp.ne.s32.totalorder %s310_s9, %s1126_s18  ;;  %p1134_p13 = scmp.lt.s32.totalorder %s310_s9, %s310_s9 }
  0xa5   : > { %p1135_p0 = scmp.lt.s32.totalorder %s1133_s14, %s1126_s18 }
  0xa6   : > { %p1129_p11 = pnand %p1127_p10, %p1394_p8 }
  0xa7   : > { %p1136_p2 = por %p1135_p0, %p1134_p13 }
  0xa8   : > { %p1130_p12 = pneg %p1129_p11 }
  0xaa   : > { %p1137_p5 = pnand %p1136_p2, %p1130_p12 }
  0xac   : > { %1140 = shalt.err (!%p1137_p5)
}
  0xad   : > { %899 = dma.hbm_to_vmem [thread:$0]  (!%p1380_p6), %s1724_s6, 16, %s310_s9, [#allocation12]  }
  0xae   : > { %s803_s23 = sadd.s32 4294967294, %s1283_s30   ;;  %s1516_s17 = sadd.s32 1, %s1283_s30  }
  0xaf   : > { %s34_s25 = ssub.s32 %s1283_s30, %s1516_s17  ;;  %s37_s26 = sadd.s32 1, %s1279_s29 }
  0xb0   : > { %p35_p8 = scmp.eq.s32.totalorder %s34_s25, 0  ;;  %p44_p7 = scmp.ne.s32.totalorder %s1279_s29, %s1275_s28 }
  0xb1   : > { %p45_p9 = scmp.eq.s32.totalorder %s1283_s30, 0  ;;  %p50_p4 = scmp.ne.s32.totalorder %s1275_s28, %s1271_s27 }
  0xb2   : > { %s1527_s1 = scalar_select %p35_p8, %s1279_s29, %s37_s26  }
  0xb3   : > { %p1529_p1 = por %p45_p9, %p44_p7  ;;  %p1745_p3 = scmp.eq.s32.totalorder %s1364_s11, 0 }
  0xb4   : > { %p226_p10 = scmp.eq.s32.totalorder %s1364_s11, 1  ;;  %p232_p11 = scmp.eq.s32.totalorder %s803_s23, 1 }
  0xb5   : > { %p1535_p6 = por %p1745_p3, %p50_p4  ;;  %p917_p12 = scmp.lt.s32.totalorder %s1283_s30, 2 }
  0xb6   : > { %s1542_s15 = sand.u32 1, %s1279_s29   ;;  %p1544_p13 = por %p226_p10, %p44_p7 }
  0xb7   : > { %s1746_s9 = scalar_select %p1535_p6, 1, 0 }
  0xb8   : > { %s1747_s19 = scalar_select %p1544_p13, 1, 0 }
  0xb9   : > { %p1548_p0 = por %p232_p11, %p50_p4  ;;  %s812_s21 = sshll.u32 %s1542_s15, 3 }
  0xba   : > { %s839_s22 = sshll.u32 %s1283_s30, 7  ;;  %s1749_s0 = sld [smem:[#allocation23_spill]] }
  0xbb   : > { %s1748_s20 = scalar_select %p1548_p0, 1, 0 }
  0xbc   : > { %s324_s16 = scalar_lea.vmem [#allocation2], %s812_s21  ;;  %p1563_p2 = pnand %p917_p12, %p1529_p1 }
  0xbd   : > { %s331_s23 = sshll.u32 %s324_s16, 4  ;;  %s321_s24 = scalar_lea.sflag [#allocation3], %s1542_s15  ;;  %s1559_s23 = int_to_ptr.vmem [resolvable:$true] %s331_s23 }
  0xbe   : > { %p1143_p8 = pneg %p1563_p2 }
  0xc0   : > { %s1557_s13 = scalar_lea.hbm %s1749_s0, %s839_s22  ;;  %s1146_s3 = scalar_lea.hbm %s1749_s0, 256 }
  0xc1   : > { %s1141_s18 = scalar_lea.hbm %s1557_s13, 128  ;;  %p1147_p4 = scmp.lt.u32.totalorder %s1557_s13, %s1749_s0 }
  0xc2   : > { %p1142_p5 = scmp.ne.s32.totalorder %s1557_s13, %s1141_s18  ;;  %p1148_p1 = scmp.lt.u32.totalorder %s1146_s3, %s1141_s18 }
  0xc3   : > { %p1150_p10 = scmp.lt.u32.totalorder %s1141_s18, %s1557_s13 }
  0xc4   : > { %p1144_p7 = pnand %p1143_p8, %p1142_p5  ;;  %p1149_p3 = por %p1148_p1, %p1147_p4 }
  0xc6   : > { %p1145_p9 = pneg %p1144_p7  ;;  %p1151_p11 = por %p1150_p10, %p1149_p3 }
  0xc8   : > { %p1152_p12 = pnand %p1151_p11, %p1145_p9 }
  0xca   : > { %1155 = shalt.err (!%p1152_p12)
}
  0xcb   : > { %s1156_s26 = scalar_lea.vmem %s1559_s23, 128  ;;  %s1293_s21 = smov [#allocation2]  }
  0xcc   : > { %p1157_p5 = scmp.ne.s32.totalorder %s1559_s23, %s1156_s26  ;;  %s1161_s22 = sshll.u32 %s1293_s21, 4  ;;  %s1162_s22 = int_to_ptr.vmem [resolvable:$false] %s1161_s22 }
  0xcd   : > { %s1163_s14 = scalar_lea.vmem %s1162_s22, 256  ;;  %p1164_p13 = scmp.lt.s32.totalorder %s1559_s23, %s1162_s22 }
  0xce   : > { %p1159_p7 = pnand %p1157_p5, %p1143_p8  ;;  %p1165_p4 = scmp.lt.s32.totalorder %s1163_s14, %s1156_s26 }
  0xd0   : > { %p1160_p0 = pneg %p1159_p7  ;;  %p1166_p1 = por %p1165_p4, %p1164_p13 }
  0xd2   : > { %p1167_p3 = pnand %p1166_p1, %p1160_p0 }
  0xd4   : > { %1170 = shalt.err (!%p1167_p3)
}
  0xd5   : > { %s1751_s18 = smov 64   ;;  %s816_s3 = sshll.u32 %s1283_s30, 6 }
  0xd6   : > { %903 = dma.hbm_to_vmem [thread:$0]  (!%p1563_p2), %s1557_s13, 128, %s1559_s23, %s321_s24, %s1751_s18, %s1751_s18, %s1289_s10  }
  0xd7   : > { %s1752_s16 = sshll.u32 %s1542_s15, 2  ;;  %s1605_s0 = scalar_lea.hbm %s1725_s7, %s816_s3 }
  0xd8   : > { %s345_s26 = scalar_lea.vmem [#allocation14], %s1752_s16  ;;  %s342_s2 = scalar_lea.sflag [#allocation15], %s1542_s15 }
  0xd9   : > { %s352_s21 = sshll.u32 %s345_s26, 4  ;;  %s1171_s4 = scalar_lea.hbm %s1605_s0, 64  ;;  %s353_s21 = int_to_ptr.vmem [resolvable:$true] %s352_s21 }
  0xda   : > { %p1172_p13 = scmp.ne.s32.totalorder %s1605_s0, %s1171_s4  ;;  %s1176_s13 = scalar_lea.hbm %s1725_s7, 128 }
  0xdb   : > { %p1177_p10 = scmp.lt.u32.totalorder %s1605_s0, %s1725_s7  ;;  %p1178_p11 = scmp.lt.u32.totalorder %s1176_s13, %s1171_s4 }
  0xdc   : > { %p1174_p0 = pnand %p1172_p13, %p1143_p8  ;;  %p1180_p5 = scmp.lt.u32.totalorder %s1171_s4, %s1605_s0 }
  0xdd   : > { %p1179_p12 = por %p1178_p11, %p1177_p10 }
  0xde   : > { %p1175_p9 = pneg %p1174_p0 }
  0xdf   : > { %p1181_p7 = por %p1180_p5, %p1179_p12 }
  0xe1   : > { %p1182_p4 = pnand %p1181_p7, %p1175_p9 }
  0xe3   : > { %1185 = shalt.err (!%p1182_p4)
}
  0xe4   : > { %s1186_s15 = scalar_lea.vmem %s353_s21, 64  ;;  %s1294_s3 = smov [#allocation14]  }
  0xe5   : > { %p1187_p1 = scmp.ne.s32.totalorder %s353_s21, %s1186_s15  ;;  %s1191_s16 = sshll.u32 %s1294_s3, 4  ;;  %s1192_s16 = int_to_ptr.vmem [resolvable:$false] %s1191_s16 }
  0xe6   : > { %s1193_s26 = scalar_lea.vmem %s1192_s16, 128  ;;  %p1194_p0 = scmp.lt.s32.totalorder %s353_s21, %s1192_s16 }
  0xe7   : > { %p1189_p3 = pnand %p1187_p1, %p1143_p8  ;;  %p1195_p6 = scmp.lt.s32.totalorder %s1193_s26, %s1186_s15 }
  0xe9   : > { %p1190_p13 = pneg %p1189_p3  ;;  %p1196_p10 = por %p1195_p6, %p1194_p0 }
  0xeb   : > { %p1197_p11 = pnand %p1196_p10, %p1190_p13 }
  0xed   : > { %1200 = shalt.err (!%p1197_p11)
}
  0xee   : > { %906 = dma.hbm_to_vmem [thread:$0]  (!%p1563_p2), %s1605_s0, 64, %s353_s21, %s342_s2  }
  0xef   : > { %p1753_p9 = scmp.ne.s32.totalorder %s1737_s12, 0 }
  0xf0   : > { %s1630_s4 = sand.u32 (!%p1753_p9), 1, %s1275_s28   ;;  %p1754_p6 = scmp.ne.s32.totalorder (!%p1753_p9), %s1746_s9, 0 }
  0xf1   : > { %361 = sbr.rel (%p1753_p9) target bundleno = 554 (0x22a), region = 52  ;;  %s818_s22 = sshll.u32 (!%p1753_p9), %s1630_s4, 3 }
  0xf2   : > { %s364_s14 = scalar_lea.sflag (!%p1753_p9), [#allocation3], %s1630_s4  ;;  %s1634_s24 = scalar_lea.vmem (!%p1753_p9), [#allocation2], %s818_s22 }
  0xf8   : > { %1246 = dma.done.wait (%p1754_p6), %s364_s14, 128  }
  0xf9   : > { %1248 = vsyncadd (%p1754_p6), %s364_s14, 4294967168  ;;  %p1755_p2 = scmp.eq.s32.totalorder %s1364_s11, 0 }
  0xfb   : > { %1250 = dma.done.wait (%p1755_p2), [#allocation6], 144   ;;  %p1756_p8 = pmov %p1755_p2 }
  0xfc   : > { %p1757_p12 = pmov %p1755_p2 }
  0xfd   : > { %1252 = vsyncadd (%p1756_p8), [#allocation6], 4294967152 }
  0xfe   : > { %1254 = dma.done.wait (%p1757_p12), [#allocation9], 32   ;;  %p1758_p5 = pmov %p1755_p2 }
  0xff   : > { %p1759_p7 = pmov %p1755_p2 }
 0x100   : > { %1256 = vsyncadd (%p1758_p5), [#allocation9], 4294967264 }
 0x101   : > { %1258 = dma.done.wait (%p1759_p7), [#allocation12], 272   ;;  %p1760_p4 = pmov %p1755_p2 }
 0x102   : > { %s825_s0 = sshll.u32 %s1630_s4, 2  ;;  %s397_s2 = scalar_lea.sflag [#allocation15], %s1630_s4 }
 0x103   : > { %1260 = vsyncadd (%p1760_p4), [#allocation12], 4294967024  ;;  %s1656_s12 = scalar_lea.vmem [#allocation14], %s825_s0 }
 0x104   : > { %1262 = dma.done.wait (%p1754_p6), %s397_s2, 64  }
 0x105   : > { %1264 = vsyncadd (%p1754_p6), %s397_s2, 4294967232  ;;  %v444_v0 = vlaneseq  ;;  %v1295_v1 = vmov 0.0   ;;  %vm1296_vm0 = vmmov 0   ;;  %vm458_vm1 = vcmask 1046528   ;;  %v967_v8 = vld [vmem:[#allocation11] sm:$0xff]   ;;  %v968_v10 = vld [vmem:[#allocation11 + $0x8] sm:$0xff]  }
 0x106   : > { %843 = vmatprep.subr.bf16.mxu0 %v1295_v1  ;;  %847 = vmatprep.mubr.msk.bf16.mxu0 %vm1296_vm0, %v1295_v1  ;;  %vm472_vm2 = vcmask 1045504   ;;  %vm486_vm3 = vcmask 1044480   ;;  %v439_v12 = vld [vmem:[%s1634_s24] sm:$0xf]  ;;  %v440_v13 = vld [vmem:[%s1634_s24 + $0x4] sm:$0x7] }
 0x107   : > { %v445_v2 = vshrl.u32 %v444_v0, 7  ;;  %844 = vmatpush3.bf16.msra.mxu0 %v967_v8  ;;  %v443_v14 = vld [vmem:[#allocation5] sm:$0x7f]  ;;  %v441_v15 = vunpack.c.l.bf16 %v439_v12  ;;  %v442_v16 = vunpack.c.l.bf16 %v440_v13  ;;  %vm500_vm4 = vcmask 1043456   ;;  %v827_v60 = vld [vmem:[#allocation7] ss:$0 sm:$0xff] }
 0x108   : > { %845 = vmatprep.subr.bf16.mxu0 %v1295_v1  ;;  %vm514_vm5 = vcmask 1042432   ;;  %vm528_vm6 = vcmask 1041408   ;;  %v828_v62 = vld [vmem:[#allocation8] ss:$0 sm:$0xff]  ;;  %v829_v0 = vld [vmem:[#allocation10] ss:$0 sm:$0xff] }
 0x109   : > { %v446_v3 = vsub.s32 0, %v445_v2  ;;  %v452_v4 = vsub.s32 1, %v445_v2  ;;  %v466_v5 = vsub.s32 2, %v445_v2  ;;  %v480_v6 = vsub.s32 3, %v445_v2  ;;  %s836_s9 = sshll.u32 %s1364_s11, 6  ;;  %s437_s25 = scalar_lea.vmem [#allocation16], %s825_s0 }
 0x10a   : > { %v494_v7 = vsub.s32 4, %v445_v2  ;;  %v508_v9 = vsub.s32 5, %v445_v2  ;;  %v522_v11 = vsub.s32 6, %v445_v2  ;;  %vm589_vm7 = vcmask 261120   ;;  %s653_s21 = sshll.u32 %s437_s25, 4  ;;  %s1674_s23 = scalar_lea.hbm %s1726_s8, %s836_s9  ;;  %s1676_s21 = int_to_ptr.vmem [resolvable:$true] %s653_s21 }
 0x10b   : > { %v447_v17 = vrot.slane %v443_v14, %v446_v3  ;;  %v453_v18 = vrot.slane %v443_v14, %v452_v4  ;;  %v467_v19 = vrot.slane %v443_v14, %v466_v5  ;;  %v481_v20 = vrot.slane %v443_v14, %v480_v6  ;;  %846 = vmatpush3.bf16.msra.mxu0 %v968_v10  ;;  %v831_v10 = vld [vmem:[#allocation13] ss:$0 sm:$0xff]  ;;  %s640_s18 = scalar_lea.sflag [#allocation4], %s1630_s4  ;;  %s1201_s11 = scalar_lea.vmem %s1676_s21, 64 }
 0x10c   : > { %v495_v21 = vrot.slane %v443_v14, %v494_v7  ;;  %v509_v22 = vrot.slane %v443_v14, %v508_v9  ;;  %v523_v26 = vrot.slane %v443_v14, %v522_v11  ;;  %v633_v9 = vld [vmem:[%s1656_s12] sm:$0xf]  ;;  %vm637_vm8 = vcmask 257024   ;;  %p1202_p1 = scmp.ne.s32.totalorder %s1676_s21, %s1201_s11  ;;  %p1761_p3 = scmp.ne.s32.totalorder %s1747_s19, 0 }
 0x10d   : > { %v448_v23 = vmul.f32 %v447_v17, %v441_v15  ;;  %v454_v24 = vmul.f32 %v453_v18, %v441_v15  ;;  %v455_v25 = vmul.f32 %v453_v18, %v442_v16  ;;  %v468_v27 = vmul.f32 %v467_v19, %v441_v15  ;;  %s1297_s15 = smov [#allocation16]  }
 0x10e   : > { %v469_v28 = vmul.f32 %v467_v19, %v442_v16  ;;  %v482_v29 = vmul.f32 %v481_v20, %v441_v15  ;;  %v483_v30 = vmul.f32 %v481_v20, %v442_v16  ;;  %v496_v33 = vmul.f32 %v495_v21, %v441_v15  ;;  %p1203_p13 = pnand %p1202_p1, %p1761_p3  ;;  %s1205_s3 = sshll.u32 %s1297_s15, 4  ;;  %s1206_s3 = int_to_ptr.vmem [resolvable:$false] %s1205_s3 }
 0x10f   : > { %v459_v31 = vrot.slane %v454_v24, 1  ;;  %v460_v32 = vrot.slane %v455_v25, 1  ;;  %v497_v34 = vmul.f32 %v495_v21, %v442_v16  ;;  %v473_v35 = vrot.slane %v468_v27, 2  ;;  %s1207_s16 = scalar_lea.vmem %s1206_s3, 128  ;;  %p1208_p10 = scmp.lt.s32.totalorder %s1676_s21, %s1206_s3 }
 0x110   : > { %v474_v36 = vrot.slane %v469_v28, 2  ;;  %v487_v37 = vrot.slane %v482_v29, 3  ;;  %v488_v38 = vrot.slane %v483_v30, 3  ;;  %v501_v40 = vrot.slane %v496_v33, 4  ;;  %p1204_p0 = pneg %p1203_p13  ;;  %p1209_p11 = scmp.lt.s32.totalorder %s1207_s16, %s1201_s11 }
 0x111   : > { %v461_v39 = vsel %vm458_vm1, %v459_v31, %v460_v32  ;;  %v502_v41 = vrot.slane %v497_v34, 4  ;;  %v510_v42 = vmul.f32 %v509_v22, %v441_v15  ;;  %v511_v45 = vmul.f32 %v509_v22, %v442_v16 }
 0x112   : > { %v463_v43 = vadd.f32 %v461_v39, %v448_v23  ;;  %v475_v44 = vsel %vm472_vm2, %v473_v35, %v474_v36  ;;  %v489_v46 = vsel %vm486_vm3, %v487_v37, %v488_v38  ;;  %v524_v48 = vmul.f32 %v523_v26, %v441_v15  ;;  %p1210_p9 = por %p1209_p11, %p1208_p10 }
 0x113   : > { %v515_v47 = vrot.slane %v510_v42, 5  ;;  %v525_v49 = vmul.f32 %v523_v26, %v442_v16  ;;  %v516_v51 = vrot.slane %v511_v45, 5  ;;  %v503_v52 = vsel %vm500_vm4, %v501_v40, %v502_v41 }
 0x114   : > { %v477_v50 = vadd.f32 %v475_v44, %v463_v43  ;;  %v529_v53 = vrot.slane %v524_v48, 6  ;;  %v634_v11 = vunpack.c.l.bf16 %v633_v9  ;;  %p1211_p6 = pnand %p1210_p9, %p1204_p0 }
 0x115   : > { %v530_v54 = vrot.slane %v525_v49, 6  ;;  %v517_v56 = vsel %vm514_vm5, %v515_v47, %v516_v51 }
 0x116   : > { %v491_v55 = vadd.f32 %v489_v46, %v477_v50 }
 0x117   : > { %v531_v58 = vsel %vm528_vm6, %v529_v53, %v530_v54 }
 0x118   : > { %v505_v57 = vadd.f32 %v503_v52, %v491_v55 }
 0x11a   : > { %v519_v59 = vadd.f32 %v517_v56, %v505_v57 }
 0x11c   : > { %v533_v61 = vadd.f32 %v531_v58, %v519_v59 }
 0x11e   : > { %v541_v63 = vadd.f32 %v827_v60, %v533_v61 }
 0x120   : > { %v549_v1 = vmul.f32 %v828_v62, %v541_v63 }
 0x122   : > { %v557_v2 = vadd.f32 %v829_v0, %v549_v1 }
 0x124   : > { %v830_v3 = vmul.f32 -1.442695, %v557_v2 }
 0x126   : > { %969 = vpow2.f32 %v830_v3 }
 0x130   : > { %v970_v4 = vpop.eup %969 }
 0x131   : > { %v561_v5 = vadd.f32 1.0, %v970_v4 }
 0x133   : > { %971 = vrcp.f32 %v561_v5 }
 0x13d   : > { %v972_v6 = vpop.eup %971 }
 0x13e   : > { %v564_v7 = vmul.f32 %v972_v6, %v557_v2 }
 0x140   : > { %v565_v8 = vpack.c.bf16 %v564_v7, %v564_v7 }
 0x142   : > { %848 = vmatmul.mubr.msk.bf16.vlgmr.msra.gmra.mrb[0].mxu0 %vm589_vm7, %v565_v8 }
 0x215   : > { %v627_v12 = vpop.f32.mrb[0].mxu0 }
 0x216   : > { %v628_v13 = vadd.f32 %v831_v10, %v627_v12  ;;  %v849_v14 = vpop.f32.mrb[1].mxu0 }
 0x217   : > { %v630_v15 = vpop.f32.mrb[2].mxu0 }
 0x218   : > { %v635_v16 = vadd.f32 %v634_v11, %v628_v13  ;;  %v850_v17 = vpop.f32.mrb[3].mxu0 }
 0x21a   : > { %v636_v18 = vpack.c.bf16 %v635_v16, %v635_v16 }
 0x21c   : > { %638 = vst.msk [vmem:[%s437_s25] sm:$0xf] %vm637_vm8, %v636_v18 }
 0x21d   : > { %1214 = shalt.err (!%p1211_p6)
}
 0x21e   : > { %s1215_s26 = scalar_lea.hbm %s1674_s23, 64  ;;  %s1219_s14 = scalar_lea.hbm %s1726_s8, 128 }
 0x21f   : > { %p1216_p2 = scmp.ne.s32.totalorder %s1674_s23, %s1215_s26  ;;  %p1220_p5 = scmp.lt.u32.totalorder %s1674_s23, %s1726_s8 }
 0x220   : > { %p1221_p7 = scmp.lt.u32.totalorder %s1219_s14, %s1215_s26  ;;  %p1223_p1 = scmp.lt.u32.totalorder %s1215_s26, %s1674_s23 }
 0x221   : > { %p1217_p8 = pnand %p1216_p2, %p1761_p3 }
 0x222   : > { %p1222_p4 = por %p1221_p7, %p1220_p5 }
 0x223   : > { %p1218_p12 = pneg %p1217_p8 }
 0x224   : > { %p1224_p13 = por %p1223_p1, %p1222_p4 }
 0x226   : > { %p1225_p0 = pnand %p1224_p13, %p1218_p12 }
 0x228   : > { %1228 = shalt.err (!%p1225_p0)
}
 0x229   : > { %879 = dma.vmem_to_hbm [thread:$0]  (%p1761_p3), %s1676_s21, 64, %s1674_s23, %s640_s18  }
 0x22a PF: > { %s665_s2 = sand.u32 1, %s1271_s27   ;;  %p1762_p10 = scmp.ne.s32.totalorder %s1748_s20, 0 }
 0x22b   : > { %p1763_p11 = scmp.ge.s32.totalorder %s1283_s30, 2  ;;  %s666_s12 = scalar_lea.sflag [#allocation4], %s665_s2 }
 0x22d   : > { %p908_p9 = pnand %p1763_p11, %p1762_p10 }
 0x22f   : > { %1266 = dma.done.wait (!%p908_p9), %s666_s12, 64  }
 0x230   : > { %1268 = vsyncadd (!%p908_p9), %s666_s12, 4294967232  ;;  %p27_p6 = scmp.ge.s32.totalorder %s1516_s17, 4   ;;  %s1764_s27 = smov %s1275_s28 }
 0x231   : > { %s1765_s28 = smov %s1279_s29  ;;  %s1766_s29 = smov %s1527_s1 }
 0x232   : > { %s1767_s30 = smov %s1516_s17  ;;  %29 = sbr.rel (!%p27_p6) target bundleno = 16 (0x10), region = 134 }
 0x239   :  { %671 = vsyncpa [#allocation3], 1 }
 0x23a   :  { %673 = vsyncpa [#allocation3 + $0x1], 1 }
 0x23b   :  { %674 = vsyncpa [#allocation6], 1 }
 0x23c   :  { %675 = vsyncpa [#allocation9], 1 }
 0x23d   :  { %676 = vsyncpa [#allocation12], 1 }
 0x23e   :  { %677 = vsyncpa [#allocation15], 1 }
 0x23f   :  { %679 = vsyncpa [#allocation15 + $0x1], 1 }
 0x240   :  { %680 = vsyncpa [#allocation4], 1 }
 0x241   :  { %682 = vsyncpa [#allocation4 + $0x1], 1 }

// kernel: conformer_ctc_forward.19
= control target key start
LH: loop header
LB: loop body
LE: loop exit
PB: predicated region body
PF: predicated region fallthrough
CT: control target
= control target key end

     0   :  { %s1971_s0 = inlined_call_operand.hbm [shape: s32[2], index: 0, kind: input, shape index: {}]   ;;  %s1972_s1 = inlined_call_operand.hbm [shape: bf16[2,4,8,8], index: 1, kind: input, shape index: {}]   ;;  %s1973_s2 = inlined_call_operand.hbm [shape: bf16[2,4,8,8], index: 2, kind: input, shape index: {}]   ;;  %s1974_s3 = inlined_call_operand.hbm [shape: bf16[2,4,8,8], index: 3, kind: input, shape index: {}]   ;;  %s1975_s4 = inlined_call_operand.hbm [shape: bf16[4,8,32], index: 4, kind: input, shape index: {}]   ;;  %s1976_s5 = inlined_call_operand.hbm [shape: f32[1,32], index: 5, kind: input, shape index: {}]   ;;  %s1977_s6 = inlined_call_operand.hbm [shape: bf16[2,8,32], index: 6, kind: input, shape index: {}]   ;;  %s1978_s7 = inlined_call_operand.hbm [shape: bf16[2,8,32], index: 7, kind: output, shape index: {}]  }
   0x1   :  { %2000 = sst [smem:[#allocation33_spill]] %s1973_s2  ;;  %s1120_s26 = scalar_lea.hbm %s1971_s0, 16 }
   0x2   :  { %2001 = sst [smem:[#allocation34_spill]] %s1975_s4  ;;  %p1121_p0 = scmp.ne.s32.totalorder %s1971_s0, %s1120_s26 }
   0x3   :  { %2002 = sst [smem:[#allocation35_spill]] %s1976_s5  ;;  %p1124_p1 = scmp.lt.u32.totalorder %s1120_s26, %s1971_s0 }
   0x4   :  { %2003 = sst [smem:[#allocation36_spill]] %s1978_s7 }
   0x5   :  { %p1126_p2 = pnand %p1124_p1, %p1121_p0 }
   0x7   :  { %1129 = shalt.err (!%p1126_p2)  }
   0x8   :  { %s1444_s8 = smov [#allocation7]  }
   0x9   :  { %13 = dma.hbm_to_smem %s1971_s0, 16, %s1444_s8, [#allocation6] }
   0xa   :  { %1378 = dma.done.wait [#allocation6], 16 }
   0xb   :  { %1379 = vsyncadd [#allocation6], 4294967280 }
   0xc   :  { %15 = sfence }
   0xd   :  { %16 = vsyncpa [#allocation9], 0 }
   0xe   :  { %18 = vsyncpa [#allocation9 + $0x1], 0 }
   0xf   :  { %19 = vsyncpa [#allocation12], 0 }
  0x10   :  { %21 = vsyncpa [#allocation12 + $0x1], 0 }
  0x11   :  { %22 = vsyncpa [#allocation15], 0 }
  0x12   :  { %23 = vsyncpa [#allocation18], 0 }
  0x13   :  { %25 = vsyncpa [#allocation18 + $0x1], 0 }
  0x14   :  { %26 = vsyncpa [#allocation10], 0 }
  0x15   :  { %28 = vsyncpa [#allocation10 + $0x1], 0  ;;  %s1511_s11 = smov 0   ;;  %s1513_s12 = smov 0  }
  0x16   :  { %s1515_s13 = smov 0   ;;  %s1517_s14 = smov 0  }
  0x17   :  { %s1519_s0 = smov 0   ;;  %s1521_s15 = smov 0  }
  0x18   :  { %s1523_s16 = smov 0   ;;  %s1525_s17 = smov 0  }
  0x19   :  { %s1527_s18 = smov 0   ;;  %s1529_s19 = smov 0  }
  0x1a   :  { %s1531_s20 = smov 0  }
  0x1b LB: > { %2004 = sst [smem:[#allocation26_spill]] %s1426_s16  ;;  %s1567_s21 = sadd.s32 4294967295, %s1442_s20   ;;  %s1442_s20 = sphi %s1531_s20, %s34_s20   ;;  %s1438_s19 = sphi %s1529_s19, %s2060_s19   ;;  %s1434_s18 = sphi %s1527_s18, %s2051_s18   ;;  %s1430_s17 = sphi %s1525_s17, %s2059_s17   ;;  %s1426_s16 = sphi %s1523_s16, %s2050_s16   ;;  %s1422_s15 = sphi %s1521_s15, %s2058_s15   ;;  %s1418_s0 = sphi %s1519_s0, %s2057_s0   ;;  %s1414_s14 = sphi %s1517_s14, %s2056_s14   ;;  %s1410_s13 = sphi %s1515_s13, %s2055_s13   ;;  %s1406_s12 = sphi %s1513_s12, %s2054_s12   ;;  %s1402_s11 = sphi %s1511_s11, %s2053_s11  }
  0x1c   : > { %2005 = sst [smem:[#allocation27_spill]] %s1430_s17  ;;  %p906_p3 = scmp.ge.s32.totalorder %s1442_s20, 1 }
  0x1d   : > { %2006 = sst [smem:[#allocation28_spill]] %s1434_s18  ;;  %p1979_p4 = scmp.eq.s32.totalorder %s1567_s21, 0 }
  0x1e   : > { %p253_p5 = scmp.lt.s32.totalorder %s1442_s20, 9  ;;  %s1445_s23 = smov [#allocation14]  }
  0x1f   : > { %s265_s24 = sshll.u32 %s1445_s23, 4  ;;  %s2009_s4 = sld [smem:[#allocation34_spill]]  ;;  %s266_s24 = int_to_ptr.vmem [resolvable:$true] %s265_s24 }
  0x20   : > { %p1572_p6 = pnand %p906_p3, %p253_p5 }
  0x22   : > { %s2007_s22 = scalar_select %p1572_p6, 1, 0 }
  0x23   : > { %p984_p7 = pneg %p1572_p6 }
  0x25   : > { %p1580_p8 = pnand %p984_p7, %p1979_p4  ;;  %s1130_s28 = scalar_lea.hbm %s2009_s4, 256 }
  0x26   : > { %p1131_p9 = scmp.ne.s32.totalorder %s2009_s4, %s1130_s28  ;;  %p1137_p13 = scmp.lt.u32.totalorder %s1130_s28, %s2009_s4 }
  0x27   : > { %s2008_s25 = scalar_select %p1580_p8, 1, 0 }
  0x28   : > { %p1991_p10 = pneg %p1580_p8 }
  0x2a   : > { %p1133_p11 = pnand %p1991_p10, %p1131_p9 }
  0x2c   : > { %p1134_p12 = pneg %p1133_p11 }
  0x2e   : > { %p1139_p0 = pnand %p1137_p13, %p1134_p12 }
  0x30   : > { %1142 = shalt.err (!%p1139_p0)
}
  0x31   : > { %s1143_s10 = scalar_lea.vmem %s266_s24, 256  ;;  %p1151_p5 = scmp.lt.s32.totalorder %s266_s24, %s266_s24 }
  0x32   : > { %p1144_p1 = scmp.ne.s32.totalorder %s266_s24, %s1143_s10  ;;  %p1152_p7 = scmp.lt.s32.totalorder %s1143_s10, %s1143_s10 }
  0x34   : > { %p1146_p2 = pnand %p1144_p1, %p1991_p10  ;;  %p1153_p4 = por %p1152_p7, %p1151_p5 }
  0x36   : > { %p1147_p3 = pneg %p1146_p2 }
  0x38   : > { %p1154_p6 = pnand %p1153_p4, %p1147_p3 }
  0x3a   : > { %1157 = shalt.err (!%p1154_p6)
}
  0x3b   : > { %s1446_s23 = smov 64   ;;  %s1447_s26 = smov 4  }
  0x3c   : > { %987 = dma.hbm_to_vmem [thread:$0]  (!%p1580_p8), %s2009_s4, 256, %s266_s24, [#allocation15], %s1446_s23, %s1446_s23, %s1447_s26  }
  0x3d   : > { %s52_s29 = sadd.s32 1, %s1434_s18  ;;  %s60_s30 = sadd.s32 1, %s1438_s19 }
  0x3e   : > { %p54_p4 = scmp.ge.s32.totalorder %s52_s29, 4  ;;  %s71_s8 = sadd.s32 1, %s1422_s15 }
  0x3f   : > { %p78_p6 = scmp.ne.s32.totalorder %s1422_s15, %s1418_s0  ;;  %p1990_p9 = scmp.eq.s32.totalorder %s1442_s20, 0 }
  0x40   : > { %s2062_s29 = smov (%p54_p4, %s52_s29), 0  ;;  %s2064_s30 = smov (!%p54_p4, %s60_s30), %s1438_s19 }
  0x41   : > { %2010 = sst [smem:[#allocation29_spill]] %s2062_s29  ;;  %s65_s9 = ssub.s32 %s1434_s18, %s2062_s29 }
  0x42   : > { %p62_p11 = scmp.ge.s32.totalorder %s2064_s30, 2  ;;  %p84_p12 = scmp.ne.s32.totalorder %s1418_s0, %s1414_s14 }
  0x43   : > { %p80_p13 = por %p1990_p9, %p78_p6  ;;  %p1989_p0 = scmp.lt.s32.totalorder %s1442_s20, 8 }
  0x44   : > { %s2066_s30 = smov (%p62_p11, %s2064_s30), 0  ;;  %p2012_p1 = scmp.eq.s32.totalorder %s1567_s21, 0 }
  0x45   : > { %2011 = sst [smem:[#allocation30_spill]] %s2066_s30  ;;  %s1984_s10 = sand.u32 1, %s1422_s15  }
  0x46   : > { %p1626_p2 = por %p2012_p1, %p84_p12  ;;  %s1633_s23 = ssub.s32 %s1438_s19, %s2066_s30 }
  0x47   : > { %s1637_s26 = sshll.u32 %s1984_s10, 2  ;;  %s66_s14 = sor.u32 %s65_s9, %s1633_s23 }
  0x48   : > { %s2013_s24 = scalar_select %p1626_p2, 1, 0 }
  0x49   : > { %p69_p5 = scmp.eq.s32.totalorder %s66_s14, 0  ;;  %s911_s27 = sshll.u32 %s1438_s19, 2 }
  0x4a   : > { %2014 = sst [smem:[#allocation31_spill]] %s2013_s24  ;;  %s300_s28 = sadd.s32 %s1434_s18, %s911_s27 }
  0x4b   : > { %p1645_p7 = pnand %p1989_p0, %p80_p13  ;;  %s1652_s30 = sshll.u32 %s300_s28, 6 }
  0x4c   : > { %s1650_s29 = scalar_select %p69_p5, %s1422_s15, %s71_s8  }
  0x4d   : > { %s2015_s4 = scalar_select %p1645_p7, 1, 0 }
  0x4e   : > { %2016 = sst [smem:[#allocation32_spill]] %s1650_s29  ;;  %s311_s7 = sand.u32 1, %s1442_s20  }
  0x4f   : > { %s2017_s2 = sld [smem:[#allocation33_spill]]  ;;  %s315_s14 = scalar_lea.vmem [#allocation11], %s1637_s26 }
  0x50   : > { %s325_s27 = sshll.u32 %s315_s14, 4  ;;  %s1448_s18 = smov [#allocation16]   ;;  %s1662_s27 = int_to_ptr.vmem [resolvable:$true] %s325_s27 }
  0x51   : > { %s1664_s8 = sshll.u32 %s1448_s18, 4  ;;  %s1666_s28 = scalar_lea.sflag [#allocation12], %s311_s7  ;;  %s280_s8 = int_to_ptr.vmem [resolvable:$true] %s1664_s8 }
  0x52   : > { %p1672_p6 = pneg %p1645_p7 }
  0x54   : > { %s2018_s17 = scalar_select %p1672_p6, 1, 0 }
  0x55   : > { %s1659_s9 = scalar_lea.hbm %s2017_s2, %s1652_s30  ;;  %s1163_s16 = scalar_lea.hbm %s2017_s2, 512 }
  0x56   : > { %s1158_s29 = scalar_lea.hbm %s1659_s9, 64  ;;  %p1164_p13 = scmp.lt.u32.totalorder %s1659_s9, %s2017_s2 }
  0x57   : > { %p1159_p4 = scmp.ne.s32.totalorder %s1659_s9, %s1158_s29  ;;  %p1165_p1 = scmp.lt.u32.totalorder %s1163_s16, %s1158_s29 }
  0x58   : > { %p1167_p0 = scmp.lt.u32.totalorder %s1158_s29, %s1659_s9 }
  0x59   : > { %p1161_p11 = pnand %p1672_p6, %p1159_p4  ;;  %p1166_p5 = por %p1165_p1, %p1164_p13 }
  0x5b   : > { %p1162_p12 = pneg %p1161_p11  ;;  %p1168_p9 = por %p1167_p0, %p1166_p5 }
  0x5d   : > { %p1169_p3 = pnand %p1168_p9, %p1162_p12 }
  0x5f   : > { %1172 = shalt.err (!%p1169_p3)
}
  0x60   : > { %s1173_s7 = scalar_lea.vmem %s1662_s27, 64  ;;  %s1449_s10 = smov [#allocation11]  }
  0x61   : > { %p1174_p4 = scmp.ne.s32.totalorder %s1662_s27, %s1173_s7  ;;  %s1178_s14 = sshll.u32 %s1449_s10, 4  ;;  %s1179_s14 = int_to_ptr.vmem [resolvable:$false] %s1178_s14 }
  0x62   : > { %s1180_s24 = scalar_lea.vmem %s1179_s14, 128  ;;  %p1181_p2 = scmp.lt.s32.totalorder %s1662_s27, %s1179_s14 }
  0x63   : > { %p1176_p11 = pnand %p1174_p4, %p1672_p6  ;;  %p1182_p8 = scmp.lt.s32.totalorder %s1180_s24, %s1173_s7 }
  0x65   : > { %p1177_p10 = pneg %p1176_p11  ;;  %p1183_p13 = por %p1182_p8, %p1181_p2 }
  0x67   : > { %p1184_p1 = pnand %p1183_p13, %p1177_p10 }
  0x69   : > { %1187 = shalt.err (!%p1184_p1)
}
  0x6a   : > { %997 = dma.hbm_to_vmem [thread:$0]  (!%p1645_p7), %s1659_s9, 64, %s1662_s27, %s1666_s28  }
  0x6b   : > { %s2019_s5 = sld [smem:[#allocation35_spill]]  ;;  %p2020_p8 = scmp.ne.s32.totalorder %s2008_s25, 0 }
  0x6d   : > { %p2021_p10 = pneg %p2020_p8 }
  0x71   : > { %s1188_s18 = scalar_lea.hbm %s2019_s5, 16 }
  0x72   : > { %p1189_p9 = scmp.ne.s32.totalorder %s2019_s5, %s1188_s18  ;;  %p1195_p3 = scmp.lt.u32.totalorder %s1188_s18, %s2019_s5 }
  0x74   : > { %p1191_p0 = pnand %p1189_p9, %p2021_p10 }
  0x76   : > { %p1192_p2 = pneg %p1191_p0 }
  0x78   : > { %p1197_p12 = pnand %p1195_p3, %p1192_p2 }
  0x7a   : > { %1200 = shalt.err (!%p1197_p12)
}
  0x7b   : > { %s1201_s9 = scalar_lea.vmem %s280_s8, 16  ;;  %p2022_p4 = pmov %p2021_p10 }
  0x7c   : > { %p1202_p5 = scmp.ne.s32.totalorder %s280_s8, %s1201_s9  ;;  %s1208_s27 = scalar_lea.vmem %s280_s8, 32 }
  0x7d   : > { %p1209_p1 = scmp.lt.s32.totalorder %s280_s8, %s280_s8  ;;  %p1210_p7 = scmp.lt.s32.totalorder %s1208_s27, %s1201_s9 }
  0x7e   : > { %p1204_p11 = pnand %p1202_p5, %p2022_p4 }
  0x7f   : > { %p1211_p6 = por %p1210_p7, %p1209_p1 }
  0x80   : > { %p1205_p13 = pneg %p1204_p11 }
  0x82   : > { %p1212_p9 = pnand %p1211_p6, %p1205_p13 }
  0x84   : > { %1215 = shalt.err (!%p1212_p9)
}
  0x85   : > { %990 = dma.hbm_to_vmem [thread:$0]  (!%p2020_p8), %s2019_s5, 16, %s280_s8, [#allocation15]  }
  0x86   : > { %s1721_s18 = scalar_lea.hbm %s1972_s1, %s1652_s30  ;;  %s294_s10 = scalar_lea.vmem [#allocation8], %s1637_s26 }
  0x87   : > { %s304_s25 = sshll.u32 %s294_s10, 4  ;;  %s1730_s9 = scalar_lea.hbm %s1974_s3, %s1652_s30  ;;  %s1724_s25 = int_to_ptr.vmem [resolvable:$true] %s304_s25 }
  0x88   : > { %s2023_s27 = sand.u32 1, %s1422_s15   ;;  %s1216_s2 = scalar_lea.hbm %s1721_s18, 64 }
  0x89   : > { %s291_s8 = scalar_lea.sflag [#allocation9], %s2023_s27  ;;  %p1217_p7 = scmp.ne.s32.totalorder %s1721_s18, %s1216_s2 }
  0x8a   : > { %p2024_p6 = scmp.ne.s32.totalorder %s2018_s17, 0  ;;  %s1221_s29 = scalar_lea.hbm %s1972_s1, 512 }
  0x8b   : > { %p1222_p0 = scmp.lt.u32.totalorder %s1721_s18, %s1972_s1  ;;  %p1223_p2 = scmp.lt.u32.totalorder %s1221_s29, %s1216_s2 }
  0x8c   : > { %p1219_p8 = pnand %p1217_p7, %p2024_p6  ;;  %p1225_p12 = scmp.lt.u32.totalorder %s1216_s2, %s1721_s18 }
  0x8d   : > { %p1224_p3 = por %p1223_p2, %p1222_p0 }
  0x8e   : > { %p1220_p10 = pneg %p1219_p8 }
  0x8f   : > { %p1226_p5 = por %p1225_p12, %p1224_p3 }
  0x91   : > { %p1227_p4 = pnand %p1226_p5, %p1220_p10 }
  0x93   : > { %1230 = shalt.err (!%p1227_p4)
}
  0x94   : > { %s1231_s30 = scalar_lea.vmem %s1724_s25, 64  ;;  %s1450_s7 = smov [#allocation8]  }
  0x95   : > { %p1232_p11 = scmp.ne.s32.totalorder %s1724_s25, %s1231_s30  ;;  %s1236_s14 = sshll.u32 %s1450_s7, 4  ;;  %s1237_s14 = int_to_ptr.vmem [resolvable:$false] %s1236_s14 }
  0x96   : > { %s1238_s5 = scalar_lea.vmem %s1237_s14, 128  ;;  %p1239_p9 = scmp.lt.s32.totalorder %s1724_s25, %s1237_s14 }
  0x97   : > { %p1234_p13 = pnand %p1232_p11, %p2024_p6  ;;  %p1240_p7 = scmp.lt.s32.totalorder %s1238_s5, %s1231_s30 }
  0x99   : > { %p1235_p1 = pneg %p1234_p13  ;;  %p1241_p8 = por %p1240_p7, %p1239_p9 }
  0x9b   : > { %p1242_p0 = pnand %p1241_p8, %p1235_p1 }
  0x9d   : > { %1245 = shalt.err (!%p1242_p0)
}
  0x9e   : > { %p2025_p10 = scmp.ne.s32.totalorder %s2015_s4, 0  ;;  %s336_s27 = scalar_lea.vmem [#allocation13], %s1637_s26 }
  0x9f   : > { %s346_s2 = sshll.u32 %s336_s27, 4  ;;  %s1246_s24 = scalar_lea.hbm %s1730_s9, 64  ;;  %s347_s2 = int_to_ptr.vmem [resolvable:$true] %s346_s2 }
  0xa0   : > { %994 = dma.hbm_to_vmem [thread:$0]  (!%p2025_p10), %s1721_s18, 64, %s1724_s25, %s291_s8  }
  0xa1   : > { %p1247_p2 = scmp.ne.s32.totalorder %s1730_s9, %s1246_s24  ;;  %s1251_s10 = scalar_lea.hbm %s1974_s3, 512 }
  0xa2   : > { %p1252_p5 = scmp.lt.u32.totalorder %s1730_s9, %s1974_s3  ;;  %p1253_p4 = scmp.lt.u32.totalorder %s1251_s10, %s1246_s24 }
  0xa3   : > { %p1249_p3 = pnand %p1247_p2, %p2024_p6  ;;  %p1255_p13 = scmp.lt.u32.totalorder %s1246_s24, %s1730_s9 }
  0xa4   : > { %p1254_p11 = por %p1253_p4, %p1252_p5 }
  0xa5   : > { %p1250_p12 = pneg %p1249_p3 }
  0xa6   : > { %p1256_p1 = por %p1255_p13, %p1254_p11 }
  0xa8   : > { %p1257_p9 = pnand %p1256_p1, %p1250_p12 }
  0xaa   : > { %1260 = shalt.err (!%p1257_p9)
}
  0xab   : > { %s1261_s26 = scalar_lea.vmem %s347_s2, 64  ;;  %s1451_s18 = smov [#allocation13]  }
  0xac   : > { %p1262_p7 = scmp.ne.s32.totalorder %s347_s2, %s1261_s26  ;;  %s1266_s25 = sshll.u32 %s1451_s18, 4  ;;  %s1267_s25 = int_to_ptr.vmem [resolvable:$false] %s1266_s25 }
  0xad   : > { %s1268_s8 = scalar_lea.vmem %s1267_s25, 128  ;;  %p1269_p2 = scmp.lt.s32.totalorder %s347_s2, %s1267_s25 }
  0xae   : > { %p1264_p8 = pnand %p1262_p7, %p2024_p6  ;;  %p1270_p3 = scmp.lt.s32.totalorder %s1268_s8, %s1261_s26 }
  0xb0   : > { %p1265_p0 = pneg %p1264_p8  ;;  %p1271_p10 = por %p1270_p3, %p1269_p2 }
  0xb2   : > { %p1272_p4 = pnand %p1271_p10, %p1265_p0 }
  0xb4   : > { %1275 = shalt.err (!%p1272_p4)
}
  0xb5   : > { %p2026_p5 = scmp.ne.s32.totalorder %s2015_s4, 0  ;;  %s905_s17 = sadd.s32 4294967294, %s1442_s20  }
  0xb6   : > { %s201_s14 = sadd.s32 1, %s1410_s13  ;;  %p2027_p6 = scmp.eq.s32.totalorder %s1633_s23, 0 }
  0xb7   : > { %1000 = dma.hbm_to_vmem [thread:$0]  (!%p2026_p5), %s1730_s9, 64, %s347_s2, %s1666_s28  }
  0xb8   : > { %s1779_s4 = scalar_select %p2027_p6, %s1410_s13, %s201_s14  }
  0xb9   : > { %p208_p10 = scmp.ne.s32.totalorder %s1410_s13, %s1406_s12  ;;  %p214_p12 = scmp.ne.s32.totalorder %s1406_s12, %s1402_s11 }
  0xba   : > { %p240_p11 = scmp.eq.s32.totalorder %s1567_s21, 7  ;;  %p246_p13 = scmp.eq.s32.totalorder %s905_s17, 7 }
  0xbb   : > { %p2028_p1 = scmp.eq.s32.totalorder %s1442_s20, 0  ;;  %p2029_p7 = scmp.eq.s32.totalorder %s1567_s21, 0 }
  0xbc   : > { %p1794_p0 = por %p240_p11, %p208_p10  ;;  %p1798_p2 = por %p246_p13, %p214_p12 }
  0xbd   : > { %p210_p9 = por %p208_p10, %p2028_p1  ;;  %p1790_p8 = por %p214_p12, %p2029_p7 }
  0xbe   : > { %s2031_s27 = scalar_select %p1794_p0, 1, 0 }
  0xbf   : > { %s2032_s23 = scalar_select %p1798_p2, 1, 0 }
  0xc0   : > { %s353_s28 = sand.u32 1, %s1410_s13   ;;  %s920_s9 = sshll.u32 %s1438_s19, 6 }
  0xc1   : > { %s919_s2 = sshll.u32 %s353_s28, 2  ;;  %s1807_s29 = scalar_lea.hbm %s1977_s6, %s920_s9 }
  0xc2   : > { %s357_s10 = scalar_lea.vmem [#allocation17], %s919_s2  ;;  %p2033_p3 = scmp.lt.s32.totalorder %s1442_s20, 8 }
  0xc3   : > { %s365_s30 = sshll.u32 %s357_s10, 4  ;;  %s354_s26 = scalar_lea.sflag [#allocation18], %s353_s28  ;;  %s1815_s30 = int_to_ptr.vmem [resolvable:$true] %s365_s30 }
  0xc4   : > { %p1811_p4 = pnand %p2033_p3, %p210_p9  ;;  %s1276_s18 = scalar_lea.hbm %s1807_s29, 64 }
  0xc5   : > { %p1277_p5 = scmp.ne.s32.totalorder %s1807_s29, %s1276_s18  ;;  %s1281_s17 = scalar_lea.hbm %s1977_s6, 128 }
  0xc6   : > { %p1278_p6 = pneg %p1811_p4  ;;  %p1282_p11 = scmp.lt.u32.totalorder %s1807_s29, %s1977_s6 }
  0xc7   : > { %p1283_p13 = scmp.lt.u32.totalorder %s1281_s17, %s1276_s18  ;;  %p1285_p9 = scmp.lt.u32.totalorder %s1276_s18, %s1807_s29 }
  0xc8   : > { %p1279_p10 = pnand %p1278_p6, %p1277_p5 }
  0xc9   : > { %p1284_p1 = por %p1283_p13, %p1282_p11 }
  0xca   : > { %p1280_p12 = pneg %p1279_p10 }
  0xcb   : > { %p1286_p7 = por %p1285_p9, %p1284_p1 }
  0xcd   : > { %p1287_p3 = pnand %p1286_p7, %p1280_p12 }
  0xcf   : > { %1290 = shalt.err (!%p1287_p3)
}
  0xd0   : > { %s1291_s28 = scalar_lea.vmem %s1815_s30, 64  ;;  %s1452_s2 = smov [#allocation17]  }
  0xd1   : > { %p1292_p5 = scmp.ne.s32.totalorder %s1815_s30, %s1291_s28  ;;  %s1296_s24 = sshll.u32 %s1452_s2, 4  ;;  %s1297_s24 = int_to_ptr.vmem [resolvable:$false] %s1296_s24 }
  0xd2   : > { %s1298_s16 = scalar_lea.vmem %s1297_s24, 128  ;;  %p1299_p0 = scmp.lt.s32.totalorder %s1815_s30, %s1297_s24 }
  0xd3   : > { %p1294_p10 = pnand %p1292_p5, %p1278_p6  ;;  %p1300_p11 = scmp.lt.s32.totalorder %s1298_s16, %s1291_s28 }
  0xd5   : > { %p1295_p2 = pneg %p1294_p10  ;;  %p1301_p13 = por %p1300_p11, %p1299_p0 }
  0xd7   : > { %p1302_p1 = pnand %p1301_p13, %p1295_p2 }
  0xd9   : > { %1305 = shalt.err (!%p1302_p1)
}
  0xda   : > { %1003 = dma.hbm_to_vmem [thread:$0]  (!%p1811_p4), %s1807_s29, 64, %s1815_s30, %s354_s26  }
  0xdb   : > { %p2035_p12 = scmp.ne.s32.totalorder %s2007_s22, 0 }
  0xdc   : > { %s2036_s10 = sld [smem:[#allocation31_spill]] (!%p2035_p12)  ;;  %s376_s18 = sand.u32 (!%p2035_p12), 1, %s1418_s0  }
  0xdd   : > { %374 = sbr.rel (%p2035_p12) target bundleno = 1317 (0x525), region = 44  ;;  %s1845_s25 = sshll.u32 (!%p2035_p12), %s376_s18, 2 }
  0xde   : > { %s377_s8 = scalar_lea.sflag (!%p2035_p12), [#allocation9], %s376_s18  ;;  %s380_s17 = scalar_lea.vmem (!%p2035_p12), [#allocation8], %s1845_s25 }
  0xe2   : > { %p2037_p6 = scmp.ne.s32.totalorder (!%p2035_p12), %s2036_s10, 0 }
  0xe4   : > { %1381 = dma.done.wait (%p2037_p6), %s377_s8, 64  }
  0xe5   : > { %1383 = vsyncadd (%p2037_p6), %s377_s8, 4294967232  ;;  %s385_s29 = sand.u32 1, %s1567_s21   ;;  %s389_s22 = scalar_lea.vmem [#allocation11], %s1845_s25 }
  0xe6   : > { %s386_s30 = scalar_lea.sflag [#allocation12], %s385_s29 }
  0xe7   : > { %1385 = dma.done.wait (%p2037_p6), %s386_s30, 128  }
  0xe8   : > { %1387 = vsyncadd (%p2037_p6), %s386_s30, 4294967168  ;;  %s398_s7 = scalar_lea.vmem [#allocation13], %s1845_s25  ;;  %p2038_p0 = scmp.eq.s32.totalorder %s1567_s21, 0 }
  0xea   : > { %1389 = dma.done.wait (%p2038_p0), [#allocation15], 272   ;;  %p2039_p2 = pmov %p2038_p0 }
  0xeb   : > { %s1864_s26 = sand.u32 1, %s1406_s12  }
  0xec   : > { %1391 = vsyncadd (%p2039_p2), [#allocation15], 4294967024  ;;  %s927_s14 = sshll.u32 %s1864_s26, 2  ;;  %s412_s9 = scalar_lea.sflag [#allocation18], %s1864_s26 }
  0xed   : > { %s1868_s28 = scalar_lea.vmem [#allocation17], %s927_s14 }
  0xee   : > { %1393 = dma.done.wait (%p1790_p8), %s412_s9, 64  }
  0xef   : > { %1395 = vsyncadd (%p1790_p8), %s412_s9, 4294967232  ;;  %s2040_s2 = sld [smem:[#allocation26_spill]]  ;;  %s1875_s24 = scalar_lea.vmem [#allocation19], %s927_s14 }
  0xf5   : > { %p460_p4 = scmp.eq.s32.totalorder %s2040_s2, 0 }
  0xf6   : > { %vm466_vm0 = vcmask (%p460_p4), 261120   ;;  %v1453_v0 = vmov (%p460_p4), 0.0  }
  0xf7   : > { %465 = sbr.rel (!%p460_p4) target bundleno = 254 (0xfe), region = 72  ;;  %467 = vst.msk [vmem:[#allocation5] sm:$0xff] (%p460_p4), %vm466_vm0, %v1453_v0 }
  0xfe PF: > { %vm474_vm1 = vcmask 64512   ;;  %s2041_s21 = sld [smem:[#allocation27_spill]]  ;;  %v477_v1 = vld [vmem:[%s389_s22] sm:$0xf]  ;;  %v1454_v2 = vmov 0.0   ;;  %vm1455_vm2 = vmmov 0   ;;  %v526_v5 = vlaneseq }
  0xff   : > { %948 = vmatprep.subr.bf16.mxu0 %v1454_v2  ;;  %475 = vst.msk [vmem:[#allocation4] sm:$0xff] %vm474_vm1, %v1454_v2  ;;  %v483_v3 = vsel %vm474_vm1, %v477_v1, 0  ;;  %950 = vmatprep.mubr.msk.bf16.mxu0 %vm1455_vm2, %v1454_v2  ;;  %v476_v4 = vld [vmem:[%s380_s17] sm:$0xf]  ;;  %vm471_vm4 = vcmask 7168   ;;  %v1456_v15 = vmov -inf  }
 0x100   : > { %949 = vmatpush3.bf16.xpose.msra.mxu0 %v483_v3  ;;  %954 = vmatprep.subr.bf16.mxu1 %v1454_v2  ;;  %v527_v6 = vand.u32 127, %v526_v5  ;;  %472 = vst.msk [vmem:[#allocation2] sm:$0xff] %vm471_vm4, %v1456_v15  ;;  %473 = vst.msk [vmem:[#allocation3] sm:$0xff] %vm471_vm4, %v1454_v2  ;;  %v1457_v16 = vmov 0   ;;  %s2044_s16 = sld [smem:[#allocation26_spill]]  ;;  %vm571_vm5 = vcmask 1043456  }
 0x101   : > { %956 = vmatprep.mubr.msk.bf16.mxu1 %vm1455_vm2, %v1454_v2  ;;  %1112 = vset.pattern.permute.xlu0 %v1457_v16  ;;  %v567_v21 = vld [vmem:[%s398_s7] sm:$0xf]  ;;  %v631_v52 = vld [vmem:[#allocation5] sm:$0xff]  ;;  %vm682_vm6 = vcmask 261120  }
 0x102   : > { %1113 = vset.pattern.permute.xlu1 %v1457_v16  ;;  %v573_v22 = vsel %vm571_vm5, %v567_v21, 0 }
 0x103   : > { %955 = vmatpush3.bf16.msra.mxu1 %v573_v22 }
 0x104   : > { %s530_s5 = sld [smem:[#allocation7 + %s2041_s21]]  ;;  %960 = vmatprep.subr.bf16.mxu1 %v1454_v2 }
 0x106   : > { %s932_s10 = sshll.u32 %s2044_s16, 2  ;;  %v559_v40 = vld [vmem:[#allocation4] sm:$0xff]  ;;  %p684_p8 = scmp.eq.s32.totalorder %s2044_s16, 3 }
 0x107   : > { %951 = vmatmul.mubr.msk.bf16.vlgmr.msra.gmra.mrb[0].mxu0 %vm474_vm1, %v476_v4  ;;  %v534_v17 = vld [vmem:[#allocation2] sm:$0xff]  ;;  %s633_s18 = scalar_lea.vmem [#allocation14], %s932_s10  ;;  %v551_v34 = vld [vmem:[#allocation3] sm:$0xff]  ;;  %vm702_vm7 = vcmask (%p684_p8), 257024  }
 0x108   : > { %v634_v26 = vld [vmem:[%s633_s18] sm:$0xf]  ;;  %v935_v59 = vld [vmem:[#allocation16] ss:$0 sm:$0xff] (%p684_p8)  ;;  %v698_v60 = vld [vmem:[%s1868_s28] sm:$0xf] (%p684_p8) }
 0x109   : > { %v639_v29 = vsel %vm571_vm5, %v634_v26, 0  ;;  %v699_v62 = vunpack.c.l.bf16 (%p684_p8), %v698_v60 }
 0x10a   : > { %v531_v7 = vstv %s530_s5 }
 0x10b   : > { %vm1885_vm3 = vcmp.lt.s32.totalorder %v527_v6, %v531_v7 }
 0x1da   : > { %v519_v9 = vpop.f32.mrb[0].mxu0 }
 0x1db   : > { %v533_v10 = vsel %vm1885_vm3, %v519_v9, -1e+30  ;;  %v952_v11 = vpop.f32.mrb[1].mxu0 }
 0x1dc   : > { %v522_v12 = vpop.f32.mrb[2].mxu0  ;;  %v535_v13 = vsel %vm474_vm1, %v533_v10, -inf }
 0x1dd   : > { %536 = vmax.xlane.f32.xlu0 %v535_v13  ;;  %v953_v14 = vpop.f32.mrb[3].mxu0 }
 0x26a   : > { %v537_v18 = vpop.xlane.xlu0 %536 }
 0x26b   : > { %v538_v19 = vmax.f32 %v534_v17, %v537_v18 }
 0x26d   : > { %v539_v20 = vsub.f32 %v534_v17, %v538_v19  ;;  %617 = vst.msk [vmem:[#allocation2] sm:$0xff] %vm471_vm4, %v538_v19  ;;  %544 = vperm.xlu0 %1112, %v538_v19  }
 0x26f   : > { %v540_v32 = vmul.f32 1.442695, %v539_v20 }
 0x2ec   : > { %v545_v23 = vpop.permute.xlu0 %544 }
 0x2ed   : > { %v547_v24 = vsub.f32 %v533_v10, %v545_v23 }
 0x2ef   : > { %v548_v25 = vmul.f32 1.442695, %v547_v24 }
 0x2f1   : > { %1114 = vpow2.f32 %v548_v25 }
 0x2f2   : > { %1116 = vpow2.f32 %v540_v32 }
 0x2fb   : > { %v1115_v27 = vpop.eup %1114 }
 0x2fc   : > { %v550_v28 = vsel %vm1885_vm3, %v1115_v27, 0.0  ;;  %v1117_v33 = vpop.eup %1116 }
 0x2fd   : > { %v553_v30 = vsel %vm474_vm1, %v550_v28, 0.0  ;;  %v566_v31 = vpack.c.bf16 %v550_v28, %v550_v28  ;;  %v552_v35 = vmul.f32 %v1117_v33, %v551_v34 }
 0x2fe   : > { %554 = vadd.xlane.f32.xlu1 %v553_v30 }
 0x2ff   : > { %957 = vmatmul.mubr.msk.bf16.vlgmr.msra.gmra.mrb[0].mxu1 %vm474_vm1, %v566_v31 }
 0x300   : > { %961 = vmatpush3.bf16.msra.mxu1 %v639_v29  ;;  %962 = vmatprep.mubr.msk.bf16.mxu1 %vm1455_vm2, %v1454_v2 }
 0x30f   : > { %562 = vperm.xlu1 %1113, %v1117_v33  }
 0x38b   : > { %v555_v36 = vpop.xlane.xlu1 %554 }
 0x38c   : > { %v556_v37 = vadd.f32 %v555_v36, %v552_v35 }
 0x38e   : > { %558 = vst.msk [vmem:[#allocation3] sm:$0xff] %vm471_vm4, %v556_v37 }
 0x38f   : > { %v563_v41 = vpop.permute.xlu1 %562 }
 0x390   : > { %v565_v42 = vmul.f32 %v563_v41, %v559_v40 }
 0x395   : > { %v622_v38 = vld [vmem:[#allocation3] sm:$0xff] }
 0x396   : > { %1118 = vrcp.f32 %v622_v38 }
 0x3a0   : > { %v1119_v39 = vpop.eup %1118 }
 0x3a1   : > { %626 = vperm.xlu1 %1113, %v1119_v39  }
 0x3d2   : > { %v609_v43 = vpop.f32.mrb[0].mxu1 }
 0x3d3   : > { %v615_v44 = vadd.f32 %v609_v43, %v565_v42  ;;  %v958_v45 = vpop.f32.mrb[1].mxu1 }
 0x3d4   : > { %v612_v46 = vpop.f32.mrb[2].mxu1 }
 0x3d5   : > { %616 = vst.msk [vmem:[#allocation4] sm:$0xff] %vm474_vm1, %v615_v44  ;;  %v959_v47 = vpop.f32.mrb[3].mxu1 }
 0x3dc   : > { %v621_v48 = vld [vmem:[#allocation4] sm:$0xff] }
 0x420   : > { %v627_v49 = vpop.permute.xlu1 %626 }
 0x421   : > { %v629_v50 = vmul.f32 %v627_v49, %v621_v48 }
 0x423   : > { %v630_v51 = vpack.c.bf16 %v629_v50, %v629_v50 }
 0x425   : > { %963 = vmatmul.mubr.msk.bf16.vlgmr.msra.gmra.mrb[4].mxu1 %vm474_vm1, %v630_v51 }
 0x4f5   : > { %688 = sbr.rel (!%p684_p8) target bundleno = 1290 (0x50a), region = 84 }
 0x4f8   : > { %v675_v53 = vpop.f32.mrb[4].mxu1 }
 0x4f9   : > { %v681_v54 = vadd.f32 %v675_v53, %v631_v52  ;;  %v964_v55 = vpop.f32.mrb[5].mxu1 }
 0x4fa   : > { %v678_v56 = vpop.f32.mrb[6].mxu1 }
 0x4fb   : > { %683 = vst.msk [vmem:[#allocation5] sm:$0xff] %vm682_vm6, %v681_v54  ;;  %v965_v57 = vpop.f32.mrb[7].mxu1 }
 0x502   : > { %v689_v58 = vld [vmem:[#allocation5] sm:$0xff] }
 0x503   : > { %v697_v61 = vadd.f32 %v935_v59, %v689_v58 }
 0x505   : > { %v700_v63 = vadd.f32 %v699_v62, %v697_v61 }
 0x507   : > { %v701_v0 = vpack.c.bf16 %v700_v63, %v700_v63 }
 0x509   : > { %703 = vst.msk [vmem:[%s1875_s24] sm:$0xf] %vm702_vm7, %v701_v0 }
 0x50a PF: > { %s2045_s25 = sld [smem:[#allocation27_spill]]  ;;  %s2046_s30 = sld [smem:[#allocation36_spill]] }
 0x50b   : > { %s719_s7 = sshll.u32 %s1875_s24, 4  ;;  %s705_s14 = scalar_lea.sflag [#allocation10], %s1864_s26  ;;  %s720_s7 = int_to_ptr.vmem [resolvable:$true] %s719_s7 }
 0x50c   : > { %s1306_s9 = scalar_lea.vmem %s720_s7, 64  ;;  %p2047_p7 = scmp.ne.s32.totalorder %s2031_s27, 0 }
 0x50d   : > { %p1307_p9 = scmp.ne.s32.totalorder %s720_s7, %s1306_s9  ;;  %s1458_s28 = smov [#allocation19]  }
 0x50e   : > { %s1310_s2 = sshll.u32 %s1458_s28, 4  ;;  %s1311_s2 = int_to_ptr.vmem [resolvable:$false] %s1310_s2 }
 0x50f   : > { %p1308_p3 = pnand %p1307_p9, %p2047_p7  ;;  %s1312_s21 = scalar_lea.vmem %s1311_s2, 128 }
 0x510   : > { %s937_s8 = sshll.u32 %s2045_s25, 6  ;;  %p1313_p10 = scmp.lt.s32.totalorder %s720_s7, %s1311_s2 }
 0x511   : > { %s1913_s22 = scalar_lea.hbm %s2046_s30, %s937_s8  ;;  %p1309_p5 = pneg %p1308_p3 }
 0x512   : > { %p1314_p11 = scmp.lt.s32.totalorder %s1312_s21, %s1306_s9 }
 0x514   : > { %p1315_p13 = por %p1314_p11, %p1313_p10 }
 0x516   : > { %p1316_p1 = pnand %p1315_p13, %p1309_p5 }
 0x518   : > { %1319 = shalt.err (!%p1316_p1)
}
 0x519   : > { %s1320_s26 = scalar_lea.hbm %s1913_s22, 64  ;;  %s1324_s16 = scalar_lea.hbm %s2046_s30, 128 }
 0x51a   : > { %p1321_p12 = scmp.ne.s32.totalorder %s1913_s22, %s1320_s26  ;;  %p1325_p2 = scmp.lt.u32.totalorder %s1913_s22, %s2046_s30 }
 0x51b   : > { %p1326_p4 = scmp.lt.u32.totalorder %s1324_s16, %s1320_s26  ;;  %p1328_p9 = scmp.lt.u32.totalorder %s1320_s26, %s1913_s22 }
 0x51c   : > { %p1322_p6 = pnand %p1321_p12, %p2047_p7 }
 0x51d   : > { %p1327_p8 = por %p1326_p4, %p1325_p2 }
 0x51e   : > { %p1323_p0 = pneg %p1322_p6 }
 0x51f   : > { %p1329_p3 = por %p1328_p9, %p1327_p8 }
 0x521   : > { %p1330_p5 = pnand %p1329_p3, %p1323_p0 }
 0x523   : > { %1333 = shalt.err (!%p1330_p5)
}
 0x524   : > { %982 = dma.vmem_to_hbm [thread:$0]  (%p2047_p7), %s720_s7, 64, %s1913_s22, %s705_s14  }
 0x525 PF: > { %p1013_p10 = scmp.ge.s32.totalorder %s1442_s20, 2  ;;  %s731_s25 = sand.u32 1, %s1402_s11  }
 0x526   : > { %p2048_p11 = scmp.ne.s32.totalorder %s2032_s23, 0  ;;  %s732_s8 = scalar_lea.sflag [#allocation10], %s731_s25 }
 0x528   : > { %p1005_p13 = pnand %p1013_p10, %p2048_p11 }
 0x52a   : > { %1397 = dma.done.wait (!%p1005_p13), %s732_s8, 64  }
 0x52b   : > { %1399 = vsyncadd (!%p1005_p13), %s732_s8, 4294967232  ;;  %s34_s20 = sadd.s32 1, %s1442_s20   ;;  %s2049_s27 = sld [smem:[#allocation32_spill]] }
 0x52c   : > { %p31_p1 = scmp.ge.s32.totalorder %s34_s20, 10   ;;  %s2050_s16 = sld [smem:[#allocation28_spill]] }
 0x52d   : > { %s2051_s18 = sld [smem:[#allocation29_spill]]  ;;  %s2052_s29 = sld [smem:[#allocation30_spill]] }
 0x52e   : > { %s2053_s11 = smov %s1406_s12  ;;  %s2054_s12 = smov %s1410_s13 }
 0x52f   : > { %s2055_s13 = smov %s1779_s4  ;;  %s2056_s14 = smov %s1418_s0 }
 0x530   : > { %s2057_s0 = smov %s1422_s15  ;;  %s2059_s17 = smov %s1438_s19 }
 0x531   : > { %s2058_s15 = smov %s2049_s27  ;;  %33 = sbr.rel (!%p31_p1) target bundleno = 27 (0x1b), region = 151 }
 0x533   : > { %s2060_s19 = smov %s2052_s29 }
 0x538   :  { %737 = vsyncpa [#allocation9], 1 }
 0x539   :  { %739 = vsyncpa [#allocation9 + $0x1], 1 }
 0x53a   :  { %740 = vsyncpa [#allocation12], 1 }
 0x53b   :  { %742 = vsyncpa [#allocation12 + $0x1], 1 }
 0x53c   :  { %743 = vsyncpa [#allocation15], 1 }
 0x53d   :  { %744 = vsyncpa [#allocation18], 1 }
 0x53e   :  { %746 = vsyncpa [#allocation18 + $0x1], 1 }
 0x53f   :  { %747 = vsyncpa [#allocation10], 1 }
 0x540   :  { %749 = vsyncpa [#allocation10 + $0x1], 1 }

// kernel: conformer_ctc_forward.18
= control target key start
LH: loop header
LB: loop body
LE: loop exit
PB: predicated region body
PF: predicated region fallthrough
CT: control target
= control target key end

     0   :  { %s3182_s0 = inlined_call_operand.hbm [shape: bf16[2,8,32], index: 0, kind: input, shape index: {}]   ;;  %s3183_s1 = inlined_call_operand.hbm [shape: f32[1,32], index: 1, kind: input, shape index: {}]   ;;  %s3184_s2 = inlined_call_operand.hbm [shape: f32[1,32], index: 2, kind: input, shape index: {}]   ;;  %s3185_s3 = inlined_call_operand.hbm [shape: bf16[4,32,8], index: 3, kind: input, shape index: {}]   ;;  %s3186_s4 = inlined_call_operand.hbm [shape: bf16[4,32,8], index: 4, kind: input, shape index: {}]   ;;  %s3187_s5 = inlined_call_operand.hbm [shape: bf16[4,32,8], index: 5, kind: input, shape index: {}]   ;;  %s3188_s6 = inlined_call_operand.hbm [shape: f32[4,1,8], index: 6, kind: input, shape index: {}]   ;;  %s3189_s7 = inlined_call_operand.hbm [shape: f32[4,1,8], index: 7, kind: input, shape index: {}]   ;;  %s3190_s8 = inlined_call_operand.hbm [shape: f32[4,1,8], index: 8, kind: input, shape index: {}]   ;;  %s3191_s9 = inlined_call_operand.hbm [shape: bf16[2,4,8,8], index: 9, kind: output, shape index: {0}]   ;;  %s3192_s10 = inlined_call_operand.hbm [shape: bf16[2,4,8,8], index: 10, kind: output, shape index: {1}]   ;;  %s3193_s11 = inlined_call_operand.hbm [shape: bf16[2,4,8,8], index: 11, kind: output, shape index: {2}]  }
   0x1   :  { %3209 = sst [smem:[#allocation29_spill]] %s3182_s0 }
   0x2   :  { %3210 = sst [smem:[#allocation30_spill]] %s3183_s1 }
   0x3   :  { %3211 = sst [smem:[#allocation31_spill]] %s3184_s2 }
   0x4   :  { %3212 = sst [smem:[#allocation32_spill]] %s3185_s3 }
   0x5   :  { %3213 = sst [smem:[#allocation33_spill]] %s3186_s4 }
   0x6   :  { %3214 = sst [smem:[#allocation34_spill]] %s3187_s5 }
   0x7   :  { %3215 = sst [smem:[#allocation35_spill]] %s3191_s9 }
   0x8   :  { %3216 = sst [smem:[#allocation36_spill]] %s3192_s10 }
   0x9   :  { %3217 = sst [smem:[#allocation37_spill]] %s3193_s11 }
   0xa   :  { %17 = vsyncpa [#allocation3], 0 }
   0xb   :  { %19 = vsyncpa [#allocation3 + $0x1], 0 }
   0xc   :  { %20 = vsyncpa [#allocation6], 0 }
   0xd   :  { %21 = vsyncpa [#allocation9], 0 }
   0xe   :  { %22 = vsyncpa [#allocation12], 0 }
   0xf   :  { %23 = vsyncpa [#allocation15], 0 }
  0x10   :  { %24 = vsyncpa [#allocation4], 0 }
  0x11   :  { %26 = vsyncpa [#allocation4 + $0x1], 0 }
  0x12   :  { %27 = vsyncpa [#allocation19], 0 }
  0x13   :  { %29 = vsyncpa [#allocation19 + $0x1], 0  ;;  %s2600_s17 = smov 0   ;;  %s2602_s18 = smov 0  }
  0x14   :  { %s2604_s19 = smov 0   ;;  %s2606_s20 = smov 0  }
  0x15   :  { %s2608_s21 = smov 0   ;;  %s2610_s22 = smov 0  }
  0x16 LB: > { %3218 = sst [smem:[#allocation28_spill]] %s2510_s20  ;;  %s2631_s23 = sadd.s32 4294967295, %s2518_s22   ;;  %s2518_s22 = sphi %s2610_s22, %s35_s22   ;;  %s2514_s21 = sphi %s2608_s21, %s3261_s21   ;;  %s2510_s20 = sphi %s2606_s20, %s3260_s20   ;;  %s2506_s19 = sphi %s2604_s19, %s3259_s19   ;;  %s2502_s18 = sphi %s2602_s18, %s3258_s18   ;;  %s2498_s17 = sphi %s2600_s17, %s3257_s17  }
  0x17   : > { %p1689_p0 = scmp.ge.s32.totalorder %s2518_s22, 1  ;;  %p3195_p1 = scmp.eq.s32.totalorder %s2631_s23, 0 }
  0x18   : > { %p332_p2 = scmp.lt.s32.totalorder %s2518_s22, 3  ;;  %s2520_s25 = smov [#allocation5]  }
  0x19   : > { %s345_s26 = sshll.u32 %s2520_s25, 4  ;;  %s2521_s27 = smov [#allocation8]   ;;  %s346_s26 = int_to_ptr.vmem [resolvable:$true] %s345_s26 }
  0x1a   : > { %p2636_p3 = pnand %p1689_p0, %p332_p2  ;;  %s366_s28 = sshll.u32 %s2521_s27, 4  ;;  %s2649_s28 = int_to_ptr.vmem [resolvable:$true] %s366_s28 }
  0x1b   : > { %s2522_s30 = smov [#allocation11]   ;;  %s3221_s1 = sld [smem:[#allocation30_spill]] }
  0x1c   : > { %s3219_s24 = scalar_select %p2636_p3, 1, 0 }
  0x1d   : > { %p1959_p5 = pneg %p2636_p3  ;;  %s2651_s12 = sshll.u32 %s2522_s30, 4  ;;  %s393_s12 = int_to_ptr.vmem [resolvable:$true] %s2651_s12 }
  0x1f   : > { %p2645_p6 = pnand %p1959_p5, %p3195_p1 }
  0x21   : > { %s2106_s15 = scalar_lea.hbm %s3221_s1, 16  ;;  %p2661_p8 = pneg %p2645_p6 }
  0x22   : > { %p2107_p7 = scmp.ne.s32.totalorder %s3221_s1, %s2106_s15  ;;  %p2113_p11 = scmp.lt.u32.totalorder %s2106_s15, %s3221_s1 }
  0x24   : > { %p2109_p9 = pnand %p2661_p8, %p2107_p7 }
  0x26   : > { %p2110_p10 = pneg %p2109_p9 }
  0x28   : > { %p2115_p12 = pnand %p2113_p11, %p2110_p10 }
  0x2a   : > { %2118 = shalt.err (!%p2115_p12)
}
  0x2b   : > { %s2119_s13 = scalar_lea.vmem %s346_s26, 16  ;;  %s2126_s14 = scalar_lea.vmem %s346_s26, 32 }
  0x2c   : > { %p2120_p13 = scmp.ne.s32.totalorder %s346_s26, %s2119_s13  ;;  %p2127_p5 = scmp.lt.s32.totalorder %s346_s26, %s346_s26 }
  0x2d   : > { %p2128_p4 = scmp.lt.s32.totalorder %s2126_s14, %s2119_s13 }
  0x2e   : > { %p2122_p0 = pnand %p2120_p13, %p2661_p8 }
  0x2f   : > { %p2129_p1 = por %p2128_p4, %p2127_p5 }
  0x30   : > { %p2123_p2 = pneg %p2122_p0 }
  0x32   : > { %p2130_p3 = pnand %p2129_p1, %p2123_p2 }
  0x34   : > { %2133 = shalt.err (!%p2130_p3)
}
  0x35   : > { %1962 = dma.hbm_to_vmem [thread:$0]  (!%p2645_p6), %s3221_s1, 16, %s346_s26, [#allocation6]  }
  0x36   : > { %s3223_s3 = sld [smem:[#allocation32_spill]] }
  0x3c   : > { %s2134_s30 = scalar_lea.hbm %s3223_s3, 1024 }
  0x3d   : > { %p2135_p7 = scmp.ne.s32.totalorder %s3223_s3, %s2134_s30  ;;  %p2141_p1 = scmp.lt.u32.totalorder %s2134_s30, %s3223_s3 }
  0x3f   : > { %p2137_p9 = pnand %p2135_p7, %p2661_p8 }
  0x41   : > { %p2138_p4 = pneg %p2137_p9 }
  0x43   : > { %p2143_p3 = pnand %p2141_p1, %p2138_p4 }
  0x45   : > { %2146 = shalt.err (!%p2143_p3)
}
  0x46   : > { %s2147_s26 = scalar_lea.vmem %s2649_s28, 1024  ;;  %p2155_p13 = scmp.lt.s32.totalorder %s2649_s28, %s2649_s28 }
  0x47   : > { %p2148_p10 = scmp.ne.s32.totalorder %s2649_s28, %s2147_s26  ;;  %p2156_p0 = scmp.lt.s32.totalorder %s2147_s26, %s2147_s26 }
  0x49   : > { %p2150_p11 = pnand %p2148_p10, %p2661_p8  ;;  %p2157_p2 = por %p2156_p0, %p2155_p13 }
  0x4b   : > { %p2151_p12 = pneg %p2150_p11 }
  0x4d   : > { %p2158_p5 = pnand %p2157_p2, %p2151_p12 }
  0x4f   : > { %2161 = shalt.err (!%p2158_p5)
}
  0x50   : > { %s2523_s9 = smov 64   ;;  %s2524_s10 = smov 4  }
  0x51   : > { %1968 = dma.hbm_to_vmem [thread:$0]  (!%p2645_p6), %s3223_s3, 1024, %s2649_s28, [#allocation9], %s2523_s9, %s2523_s9, %s2524_s10  }
  0x52   : > { %s3224_s5 = sld [smem:[#allocation34_spill]] }
  0x58   : > { %s2162_s30 = scalar_lea.hbm %s3224_s5, 1024 }
  0x59   : > { %p2163_p7 = scmp.ne.s32.totalorder %s3224_s5, %s2162_s30  ;;  %p2169_p1 = scmp.lt.u32.totalorder %s2162_s30, %s3224_s5 }
  0x5b   : > { %p2165_p9 = pnand %p2163_p7, %p2661_p8 }
  0x5d   : > { %p2166_p4 = pneg %p2165_p9 }
  0x5f   : > { %p2171_p3 = pnand %p2169_p1, %p2166_p4 }
  0x61   : > { %2174 = shalt.err (!%p2171_p3)
}
  0x62   : > { %s2175_s16 = scalar_lea.vmem %s393_s12, 1024  ;;  %p2183_p13 = scmp.lt.s32.totalorder %s393_s12, %s393_s12 }
  0x63   : > { %p2176_p10 = scmp.ne.s32.totalorder %s393_s12, %s2175_s16  ;;  %p2184_p0 = scmp.lt.s32.totalorder %s2175_s16, %s2175_s16 }
  0x65   : > { %p2178_p11 = pnand %p2176_p10, %p2661_p8  ;;  %p2185_p2 = por %p2184_p0, %p2183_p13 }
  0x67   : > { %p2179_p12 = pneg %p2178_p11 }
  0x69   : > { %p2186_p5 = pnand %p2185_p2, %p2179_p12 }
  0x6b   : > { %2189 = shalt.err (!%p2186_p5)
}
  0x6c   : > { %1974 = dma.hbm_to_vmem [thread:$0]  (!%p2645_p6), %s3224_s5, 1024, %s393_s12, [#allocation12], %s2523_s9, %s2523_s9, %s2524_s10  }
  0x6d   : > { %s2525_s25 = smov [#allocation14]   ;;  %s2526_s15 = smov [#allocation7]  }
  0x6e   : > { %s418_s11 = sshll.u32 %s2525_s25, 4  ;;  %s356_s30 = sshll.u32 %s2526_s15, 4  ;;  %s419_s11 = int_to_ptr.vmem [resolvable:$true] %s418_s11  ;;  %s357_s30 = int_to_ptr.vmem [resolvable:$true] %s356_s30 }
  0x6f   : > { %s2190_s26 = scalar_lea.hbm %s3189_s7, 64 }
  0x70   : > { %p2191_p7 = scmp.ne.s32.totalorder %s3189_s7, %s2190_s26  ;;  %p2197_p1 = scmp.lt.u32.totalorder %s2190_s26, %s3189_s7 }
  0x72   : > { %p2193_p9 = pnand %p2191_p7, %p2661_p8 }
  0x74   : > { %p2194_p4 = pneg %p2193_p9 }
  0x76   : > { %p2199_p3 = pnand %p2197_p1, %p2194_p4 }
  0x78   : > { %2202 = shalt.err (!%p2199_p3)
}
  0x79   : > { %s2203_s12 = scalar_lea.vmem %s419_s11, 64  ;;  %p2211_p13 = scmp.lt.s32.totalorder %s419_s11, %s419_s11 }
  0x7a   : > { %p2204_p10 = scmp.ne.s32.totalorder %s419_s11, %s2203_s12  ;;  %p2212_p0 = scmp.lt.s32.totalorder %s2203_s12, %s2203_s12 }
  0x7c   : > { %p2206_p11 = pnand %p2204_p10, %p2661_p8  ;;  %p2213_p2 = por %p2212_p0, %p2211_p13 }
  0x7e   : > { %p2207_p12 = pneg %p2206_p11 }
  0x80   : > { %p2214_p5 = pnand %p2213_p2, %p2207_p12 }
  0x82   : > { %2217 = shalt.err (!%p2214_p5)
}
  0x83   : > { %s3199_s3 = smov 16   ;;  %s3201_s28 = smov 1  }
  0x84   : > { %1980 = dma.hbm_to_vmem [thread:$0]  (!%p2645_p6), %s3189_s7, 64, %s419_s11, [#allocation15], %s3199_s3, %s3199_s3, %s3201_s28  }
  0x85   : > { %s3225_s2 = sld [smem:[#allocation31_spill]] }
  0x8b   : > { %s2218_s14 = scalar_lea.hbm %s3225_s2, 16 }
  0x8c   : > { %p2219_p7 = scmp.ne.s32.totalorder %s3225_s2, %s2218_s14  ;;  %p2225_p1 = scmp.lt.u32.totalorder %s2218_s14, %s3225_s2 }
  0x8e   : > { %p2221_p9 = pnand %p2219_p7, %p2661_p8 }
  0x90   : > { %p2222_p4 = pneg %p2221_p9 }
  0x92   : > { %p2227_p3 = pnand %p2225_p1, %p2222_p4 }
  0x94   : > { %2230 = shalt.err (!%p2227_p3)
}
  0x95   : > { %s2231_s20 = scalar_lea.vmem %s357_s30, 16  ;;  %s2238_s11 = scalar_lea.vmem %s357_s30, 32 }
  0x96   : > { %p2232_p10 = scmp.ne.s32.totalorder %s357_s30, %s2231_s20  ;;  %p2239_p13 = scmp.lt.s32.totalorder %s357_s30, %s357_s30 }
  0x97   : > { %p2240_p0 = scmp.lt.s32.totalorder %s2238_s11, %s2231_s20 }
  0x98   : > { %p2234_p11 = pnand %p2232_p10, %p2661_p8 }
  0x99   : > { %p2241_p2 = por %p2240_p0, %p2239_p13 }
  0x9a   : > { %p2235_p12 = pneg %p2234_p11 }
  0x9c   : > { %p2242_p5 = pnand %p2241_p2, %p2235_p12 }
  0x9e   : > { %2245 = shalt.err (!%p2242_p5)
}
  0x9f   : > { %1965 = dma.hbm_to_vmem [thread:$0]  (!%p2645_p6), %s3225_s2, 16, %s357_s30, [#allocation6]  }
  0xa0   : > { %s2529_s13 = smov [#allocation10]   ;;  %s2530_s26 = smov [#allocation13]  }
  0xa1   : > { %s379_s14 = sshll.u32 %s2529_s13, 4  ;;  %s405_s16 = sshll.u32 %s2530_s26, 4  ;;  %s380_s14 = int_to_ptr.vmem [resolvable:$true] %s379_s14  ;;  %s406_s16 = int_to_ptr.vmem [resolvable:$true] %s405_s16 }
  0xa2   : > { %s3226_s4 = sld [smem:[#allocation33_spill]] }
  0xa8   : > { %s2246_s3 = scalar_lea.hbm %s3226_s4, 1024 }
  0xa9   : > { %p2247_p7 = scmp.ne.s32.totalorder %s3226_s4, %s2246_s3  ;;  %p2253_p1 = scmp.lt.u32.totalorder %s2246_s3, %s3226_s4 }
  0xab   : > { %p2249_p9 = pnand %p2247_p7, %p2661_p8 }
  0xad   : > { %p2250_p4 = pneg %p2249_p9 }
  0xaf   : > { %p2255_p3 = pnand %p2253_p1, %p2250_p4 }
  0xb1   : > { %2258 = shalt.err (!%p2255_p3)
}
  0xb2   : > { %s2259_s30 = scalar_lea.vmem %s380_s14, 1024  ;;  %p2267_p13 = scmp.lt.s32.totalorder %s380_s14, %s380_s14 }
  0xb3   : > { %p2260_p10 = scmp.ne.s32.totalorder %s380_s14, %s2259_s30  ;;  %p2268_p0 = scmp.lt.s32.totalorder %s2259_s30, %s2259_s30 }
  0xb5   : > { %p2262_p11 = pnand %p2260_p10, %p2661_p8  ;;  %p2269_p2 = por %p2268_p0, %p2267_p13 }
  0xb7   : > { %p2263_p12 = pneg %p2262_p11 }
  0xb9   : > { %p2270_p5 = pnand %p2269_p2, %p2263_p12 }
  0xbb   : > { %2273 = shalt.err (!%p2270_p5)
}
  0xbc   : > { %1971 = dma.hbm_to_vmem [thread:$0]  (!%p2645_p6), %s3226_s4, 1024, %s380_s14, [#allocation9], %s2523_s9, %s2523_s9, %s2524_s10  }
  0xbd   : > { %s2274_s26 = scalar_lea.hbm %s3188_s6, 64 }
  0xbe   : > { %p2275_p7 = scmp.ne.s32.totalorder %s3188_s6, %s2274_s26  ;;  %p2281_p1 = scmp.lt.u32.totalorder %s2274_s26, %s3188_s6 }
  0xc0   : > { %p2277_p9 = pnand %p2275_p7, %p2661_p8 }
  0xc2   : > { %p2278_p4 = pneg %p2277_p9 }
  0xc4   : > { %p2283_p3 = pnand %p2281_p1, %p2278_p4 }
  0xc6   : > { %2286 = shalt.err (!%p2283_p3)
}
  0xc7   : > { %s2287_s25 = scalar_lea.vmem %s406_s16, 64  ;;  %p2295_p13 = scmp.lt.s32.totalorder %s406_s16, %s406_s16 }
  0xc8   : > { %p2288_p10 = scmp.ne.s32.totalorder %s406_s16, %s2287_s25  ;;  %p2296_p0 = scmp.lt.s32.totalorder %s2287_s25, %s2287_s25 }
  0xca   : > { %p2290_p11 = pnand %p2288_p10, %p2661_p8  ;;  %p2297_p2 = por %p2296_p0, %p2295_p13 }
  0xcc   : > { %p2291_p12 = pneg %p2290_p11 }
  0xce   : > { %p2298_p5 = pnand %p2297_p2, %p2291_p12 }
  0xd0   : > { %2301 = shalt.err (!%p2298_p5)
}
  0xd1   : > { %s3227_s9 = smov 1   ;;  %s3228_s10 = smov 16  }
  0xd2   : > { %1977 = dma.hbm_to_vmem [thread:$0]  (!%p2645_p6), %s3188_s6, 64, %s406_s16, [#allocation12], %s3228_s10, %s3228_s10, %s3227_s9  }
  0xd3   : > { %s2531_s28 = smov [#allocation16]   ;;  %s2302_s26 = scalar_lea.hbm %s3190_s8, 64 }
  0xd4   : > { %s431_s3 = sshll.u32 %s2531_s28, 4  ;;  %p2303_p7 = scmp.ne.s32.totalorder %s3190_s8, %s2302_s26  ;;  %s432_s3 = int_to_ptr.vmem [resolvable:$true] %s431_s3 }
  0xd5   : > { %p2309_p1 = scmp.lt.u32.totalorder %s2302_s26, %s3190_s8 }
  0xd6   : > { %p2305_p9 = pnand %p2303_p7, %p2661_p8 }
  0xd8   : > { %p2306_p4 = pneg %p2305_p9 }
  0xda   : > { %p2311_p3 = pnand %p2309_p1, %p2306_p4 }
  0xdc   : > { %2314 = shalt.err (!%p2311_p3)
}
  0xdd   : > { %s2315_s16 = scalar_lea.vmem %s432_s3, 64  ;;  %p2323_p13 = scmp.lt.s32.totalorder %s432_s3, %s432_s3 }
  0xde   : > { %p2316_p10 = scmp.ne.s32.totalorder %s432_s3, %s2315_s16  ;;  %p2324_p0 = scmp.lt.s32.totalorder %s2315_s16, %s2315_s16 }
  0xe0   : > { %p2318_p11 = pnand %p2316_p10, %p2661_p8  ;;  %p2325_p2 = por %p2324_p0, %p2323_p13 }
  0xe2   : > { %p2319_p12 = pneg %p2318_p11 }
  0xe4   : > { %p2326_p5 = pnand %p2325_p2, %p2319_p12 }
  0xe6   : > { %2329 = shalt.err (!%p2326_p5)
}
  0xe7   : > { %1983 = dma.hbm_to_vmem [thread:$0]  (!%p2645_p6), %s3190_s8, 64, %s432_s3, [#allocation15], %s3228_s10, %s3228_s10, %s3227_s9  }
  0xe8   : > { %s3203_s29 = sadd.s32 4294967294, %s2518_s22   ;;  %s47_s27 = sadd.s32 1, %s2514_s21 }
  0xe9   : > { %p49_p8 = scmp.ge.s32.totalorder %s47_s27, 2  ;;  %s56_s30 = sadd.s32 1, %s2506_s19 }
  0xea   : > { %p63_p7 = scmp.ne.s32.totalorder %s2506_s19, %s2502_s18  ;;  %p64_p9 = scmp.eq.s32.totalorder %s2518_s22, 0 }
  0xeb   : > { %s3263_s27 = smov (%p49_p8, %s47_s27), 0  ;;  %p69_p1 = scmp.ne.s32.totalorder %s2502_s18, %s2498_s17 }
  0xec   : > { %p2835_p4 = por %p64_p9, %p63_p7  ;;  %s51_s9 = ssub.s32 %s2514_s21, %s3263_s27 }
  0xed   : > { %p263_p6 = scmp.eq.s32.totalorder %s2631_s23, 1  ;;  %p54_p3 = scmp.eq.s32.totalorder %s51_s9, 0 }
  0xee   : > { %p3230_p10 = scmp.eq.s32.totalorder %s2631_s23, 0  ;;  %p269_p13 = scmp.eq.s32.totalorder %s3203_s29, 1 }
  0xef   : > { %p2850_p12 = por %p263_p6, %p63_p7  ;;  %p2006_p2 = scmp.lt.s32.totalorder %s2518_s22, 2 }
  0xf0   : > { %p2846_p11 = por %p3230_p10, %p69_p1  ;;  %p2859_p0 = por %p269_p13, %p69_p1 }
  0xf1   : > { %s3232_s3 = scalar_select %p2850_p12, 1, 0 }
  0xf2   : > { %s2857_s15 = scalar_select %p54_p3, %s2506_s19, %s56_s30  }
  0xf3   : > { %s3233_s13 = scalar_select %p2859_p0, 1, 0 }
  0xf4   : > { %s445_s26 = sand.u32 1, %s2506_s19   ;;  %s1700_s1 = sshll.u32 %s2514_s21, 6 }
  0xf5   : > { %s1699_s12 = sshll.u32 %s445_s26, 2  ;;  %s3234_s0 = sld [smem:[#allocation29_spill]] }
  0xf6   : > { %s449_s25 = scalar_lea.vmem [#allocation2], %s1699_s12  ;;  %p2873_p5 = pnand %p2006_p2, %p2835_p4 }
  0xf7   : > { %s457_s14 = sshll.u32 %s449_s25, 4  ;;  %s446_s9 = scalar_lea.sflag [#allocation3], %s445_s26  ;;  %s2877_s14 = int_to_ptr.vmem [resolvable:$true] %s457_s14 }
  0xf8   : > { %p2332_p7 = pneg %p2873_p5 }
  0xfb   : > { %s2869_s16 = scalar_lea.hbm %s3234_s0, %s1700_s1  ;;  %s2335_s28 = scalar_lea.hbm %s3234_s0, 128 }
  0xfc   : > { %s2330_s29 = scalar_lea.hbm %s2869_s16, 64  ;;  %p2336_p4 = scmp.lt.u32.totalorder %s2869_s16, %s3234_s0 }
  0xfd   : > { %p2331_p8 = scmp.ne.s32.totalorder %s2869_s16, %s2330_s29  ;;  %p2337_p6 = scmp.lt.u32.totalorder %s2335_s28, %s2330_s29 }
  0xfe   : > { %p2339_p10 = scmp.lt.u32.totalorder %s2330_s29, %s2869_s16 }
  0xff   : > { %p2333_p9 = pnand %p2332_p7, %p2331_p8  ;;  %p2338_p3 = por %p2337_p6, %p2336_p4 }
 0x101   : > { %p2334_p1 = pneg %p2333_p9  ;;  %p2340_p13 = por %p2339_p10, %p2338_p3 }
 0x103   : > { %p2341_p2 = pnand %p2340_p13, %p2334_p1 }
 0x105   : > { %2344 = shalt.err (!%p2341_p2)
}
 0x106   : > { %s2345_s26 = scalar_lea.vmem %s2877_s14, 64  ;;  %s2532_s25 = smov [#allocation2]  }
 0x107   : > { %p2346_p8 = scmp.ne.s32.totalorder %s2877_s14, %s2345_s26  ;;  %s2350_s1 = sshll.u32 %s2532_s25, 4  ;;  %s2351_s1 = int_to_ptr.vmem [resolvable:$false] %s2350_s1 }
 0x108   : > { %s2352_s12 = scalar_lea.vmem %s2351_s1, 128  ;;  %p2353_p12 = scmp.lt.s32.totalorder %s2877_s14, %s2351_s1 }
 0x109   : > { %p2348_p9 = pnand %p2346_p8, %p2332_p7  ;;  %p2354_p4 = scmp.lt.s32.totalorder %s2352_s12, %s2345_s26 }
 0x10b   : > { %p2349_p0 = pneg %p2348_p9  ;;  %p2355_p6 = por %p2354_p4, %p2353_p12 }
 0x10d   : > { %p2356_p3 = pnand %p2355_p6, %p2349_p0 }
 0x10f   : > { %2359 = shalt.err (!%p2356_p3)
}
 0x110   : > { %1987 = dma.hbm_to_vmem [thread:$0]  (!%p2873_p5), %s2869_s16, 64, %s2877_s14, %s446_s9  }
 0x111   : > { %p3236_p1 = scmp.ne.s32.totalorder %s3219_s24, 0 }
 0x112   : > { %s2907_s29 = sand.u32 (!%p3236_p1), 1, %s2502_s18  }
 0x113   : > { %466 = sbr.rel (%p3236_p1) target bundleno = 930 (0x3a2), region = 56  ;;  %s1702_s28 = sshll.u32 (!%p3236_p1), %s2907_s29, 2 }
 0x114   : > { %s469_s20 = scalar_lea.sflag (!%p3236_p1), [#allocation3], %s2907_s29  ;;  %s472_s11 = scalar_lea.vmem (!%p3236_p1), [#allocation2], %s1702_s28 }
 0x11a   : > { %2469 = dma.done.wait (%p2846_p11), %s469_s20, 64  }
 0x11b   : > { %2471 = vsyncadd (%p2846_p11), %s469_s20, 4294967232  ;;  %p3237_p12 = scmp.eq.s32.totalorder %s2631_s23, 0 }
 0x11d   : > { %2473 = dma.done.wait (%p3237_p12), [#allocation6], 32   ;;  %p3238_p0 = pmov %p3237_p12 }
 0x11f   : > { %2475 = vsyncadd (%p3238_p0), [#allocation6], 4294967264  ;;  %p3239_p5 = pmov %p3238_p0 }
 0x120   : > { %p3240_p7 = pmov %p3238_p0 }
 0x121   : > { %2477 = dma.done.wait (%p3239_p5), [#allocation9], 2048  }
 0x122   : > { %2479 = vsyncadd (%p3240_p7), [#allocation9], 4294965248  ;;  %p3241_p10 = pmov %p3238_p0 }
 0x123   : > { %p3242_p13 = pmov %p3238_p0 }
 0x124   : > { %2481 = dma.done.wait (%p3241_p10), [#allocation12], 1088  }
 0x125   : > { %2483 = vsyncadd (%p3242_p13), [#allocation12], 4294966208  ;;  %p3243_p11 = pmov %p3238_p0 }
 0x126   : > { %p3244_p2 = pmov %p3238_p0 }
 0x127   : > { %2485 = dma.done.wait (%p3243_p11), [#allocation15], 128  }
 0x128   : > { %2487 = vsyncadd (%p3244_p2), [#allocation15], 4294967168  ;;  %vm558_vm0 = vcmask 261120   ;;  %v554_v0 = vld [vmem:[%s472_s11] sm:$0xf]  ;;  %v2080_v8 = vld [vmem:[#allocation8] sm:$0xff]  }
 0x129   : > { %v555_v1 = vunpack.c.l.bf16 %v554_v0  ;;  %v2081_v9 = vld [vmem:[#allocation10] sm:$0xff]   ;;  %v2533_v10 = vmov 0.0   ;;  %v2082_v11 = vld [vmem:[#allocation8 + $0x8] sm:$0xff]   ;;  %vm2534_vm1 = vmmov 0   ;;  %v1714_v17 = vld [vmem:[#allocation5] ss:$0 sm:$0xff] }
 0x12a   : > { %1823 = vmatprep.subr.bf16.mxu0 %v2533_v10  ;;  %1831 = vmatprep.subr.bf16.mxu1 %v2533_v10  ;;  %v2083_v12 = vld [vmem:[#allocation10 + $0x8] sm:$0xff]   ;;  %v1715_v19 = vld [vmem:[#allocation7] ss:$0 sm:$0xff]  ;;  %v2084_v22 = vld [vmem:[#allocation11] sm:$0xff]   ;;  %s3008_s24 = sshll.u32 %s2907_s29, 4  ;;  %vm656_vm2 = vcmask 60416  }
 0x12b   : > { %v559_v2 = vsel %vm558_vm0, %v555_v1, 0.0  ;;  %1824 = vmatpush3.bf16.msra.mxu0 %v2080_v8  ;;  %1832 = vmatpush3.bf16.msra.mxu1 %v2081_v9  ;;  %v2085_v23 = vld [vmem:[#allocation8 + $0x10] sm:$0xff]   ;;  %v2086_v25 = vld [vmem:[#allocation11 + $0x8] sm:$0xff]   ;;  %v2087_v26 = vld [vmem:[#allocation8 + $0x18] sm:$0xff]   ;;  %s3011_s10 = scalar_lea.vmem [#allocation18], %s3008_s24  ;;  %s3016_s16 = scalar_lea.vmem [#allocation17], %s3008_s24 }
 0x12c   : > { %560 = vadd.xlane.f32.xlu0 %v559_v2  ;;  %1825 = vmatprep.subr.bf16.mxu0 %v2533_v10  ;;  %v2088_v27 = vld [vmem:[#allocation10 + $0x10] sm:$0xff]   ;;  %v2090_v29 = vld [vmem:[#allocation10 + $0x18] sm:$0xff]   ;;  %v2092_v31 = vld [vmem:[#allocation8 + $0x20] sm:$0xff]   ;;  %s3021_s14 = scalar_lea.vmem [#allocation20], %s3008_s24  ;;  %s3245_s30 = sld [smem:[#allocation28_spill]] }
 0x12d   : > { %1833 = vmatprep.subr.bf16.mxu1 %v2533_v10  ;;  %1827 = vmatprep.mubr.msk.bf16.mxu0 %vm2534_vm1, %v2533_v10  ;;  %v2089_v28 = vld [vmem:[#allocation11 + $0x10] sm:$0xff]   ;;  %v2091_v30 = vld [vmem:[#allocation11 + $0x18] sm:$0xff]   ;;  %v2093_v32 = vld [vmem:[#allocation10 + $0x20] sm:$0xff]   ;;  %s1428_s9 = sshll.u32 %s3016_s16, 4  ;;  %s3246_s12 = sld [smem:[#allocation35_spill]]  ;;  %s3039_s9 = int_to_ptr.vmem [resolvable:$true] %s1428_s9 }
 0x12e   : > { %1835 = vmatprep.mubr.msk.bf16.mxu1 %vm2534_vm1, %v2533_v10  ;;  %v2094_v33 = vld [vmem:[#allocation8 + $0x28] sm:$0xff]   ;;  %v2096_v35 = vld [vmem:[#allocation11 + $0x20] sm:$0xff]   ;;  %v2097_v36 = vld [vmem:[#allocation8 + $0x30] sm:$0xff]   ;;  %s1404_s24 = scalar_lea.sflag [#allocation4], %s2907_s29  ;;  %p3247_p9 = scmp.ne.s32.totalorder %s3232_s3, 0 }
 0x12f   : > { %1826 = vmatpush3.bf16.msra.mxu0 %v2082_v11  ;;  %1834 = vmatpush3.bf16.msra.mxu1 %v2083_v12  ;;  %v2095_v34 = vld [vmem:[#allocation10 + $0x28] sm:$0xff]   ;;  %v2099_v38 = vld [vmem:[#allocation8 + $0x38] sm:$0xff]   ;;  %v2100_v39 = vld [vmem:[#allocation10 + $0x30] sm:$0xff]   ;;  %s2535_s0 = smov [#allocation17]  }
 0x130   : > { %1839 = vmatprep.subr.bf16.mxu0 %v2533_v10  ;;  %1847 = vmatprep.subr.bf16.mxu1 %v2533_v10  ;;  %v2098_v37 = vld [vmem:[#allocation11 + $0x28] sm:$0xff]   ;;  %v2101_v40 = vld [vmem:[#allocation11 + $0x30] sm:$0xff]   ;;  %v2102_v41 = vld [vmem:[#allocation10 + $0x38] sm:$0xff]   ;;  %s2364_s2 = sshll.u32 %s2535_s0, 4  ;;  %s2365_s2 = int_to_ptr.vmem [resolvable:$false] %s2364_s2 }
 0x131   : > { %v2103_v42 = vld [vmem:[#allocation11 + $0x38] sm:$0xff]   ;;  %v1716_v43 = vld [vmem:[#allocation13] ss:$0 sm:$0xff]  ;;  %v1720_v44 = vld [vmem:[#allocation14] ss:$0 sm:$0xff]  ;;  %s2366_s25 = scalar_lea.vmem %s2365_s2, 512  ;;  %p2367_p3 = scmp.lt.s32.totalorder %s3039_s9, %s2365_s2 }
 0x132   : > { %v1724_v58 = vld [vmem:[#allocation16] ss:$0 sm:$0xff]  ;;  %v1728_v59 = vld [vmem:[#allocation13 + $0x1] ss:$0 sm:$0xff]  ;;  %v1733_v9 = vld [vmem:[#allocation14 + $0x1] ss:$0 sm:$0xff] }
 0x133   : > { %s3037_s26 = sshll.u32 %s3245_s30, 8  ;;  %s2360_s30 = scalar_lea.vmem %s3039_s9, 256 }
 0x134   : > { %s3047_s28 = scalar_lea.hbm %s3246_s12, %s3037_s26  ;;  %p2361_p8 = scmp.ne.s32.totalorder %s3039_s9, %s2360_s30 }
 0x135   : > { %p2368_p1 = scmp.lt.s32.totalorder %s2366_s25, %s2360_s30 }
 0x136   : > { %p2362_p4 = pnand %p2361_p8, %p3247_p9 }
 0x137   : > { %p2369_p12 = por %p2368_p1, %p2367_p3 }
 0x138   : > { %p2363_p6 = pneg %p2362_p4 }
 0x13a   : > { %p2370_p0 = pnand %p2369_p12, %p2363_p6 }
 0x1b9   : > { %v561_v3 = vpop.xlane.xlu0 %560 }
 0x1ba   : > { %v563_v4 = vmul.f32 0.03125, %v561_v3 }
 0x1bc   : > { %v564_v5 = vsub.f32 %v555_v1, %v563_v4 }
 0x1be   : > { %v565_v6 = vmul.f32 %v564_v5, %v564_v5 }
 0x1c0   : > { %v566_v7 = vsel %vm558_vm0, %v565_v6, 0.0 }
 0x1c1   : > { %567 = vadd.xlane.f32.xlu0 %v566_v7 }
 0x24e   : > { %v568_v13 = vpop.xlane.xlu0 %567 }
 0x24f   : > { %v569_v14 = vmul.f32 0.03125, %v568_v13 }
 0x251   : > { %v570_v15 = vadd.f32 1e-05, %v569_v14 }
 0x253   : > { %2104 = vrsqrt.f32 %v570_v15 }
 0x25d   : > { %v2105_v16 = vpop.eup %2104 }
 0x25e   : > { %v572_v18 = vmul.f32 %v2105_v16, %v564_v5 }
 0x260   : > { %v579_v20 = vmul.f32 %v1714_v17, %v572_v18 }
 0x262   : > { %v586_v21 = vadd.f32 %v1715_v19, %v579_v20 }
 0x264   : > { %v2943_v24 = vpack.c.bf16 %v586_v21, %v586_v21 }
 0x266   : > { %1828 = vmatmul.mubr.msk.bf16.vlgmr.msra.gmra.mrb[0].mxu0 %vm558_vm0, %v2943_v24  ;;  %1836 = vmatmul.mubr.msk.bf16.vlgmr.msra.gmra.mrb[0].mxu1 %vm558_vm0, %v2943_v24 }
 0x267   : > { %1840 = vmatpush3.bf16.msra.mxu0 %v2084_v22  ;;  %1848 = vmatpush3.bf16.msra.mxu1 %v2085_v23  ;;  %v1743_v23 = vld [vmem:[#allocation13 + $0x2] ss:$0 sm:$0xff] }
 0x268   : > { %1841 = vmatprep.subr.bf16.mxu0 %v2533_v10  ;;  %1849 = vmatprep.subr.bf16.mxu1 %v2533_v10 }
 0x269   : > { %1843 = vmatprep.mubr.msk.bf16.mxu0 %vm2534_vm1, %v2533_v10  ;;  %1851 = vmatprep.mubr.msk.bf16.mxu1 %vm2534_vm1, %v2533_v10 }
 0x26b   : > { %1842 = vmatpush3.bf16.msra.mxu0 %v2086_v25  ;;  %1850 = vmatpush3.bf16.msra.mxu1 %v2087_v26 }
 0x26c   : > { %1855 = vmatprep.subr.bf16.mxu0 %v2533_v10  ;;  %1863 = vmatprep.subr.bf16.mxu1 %v2533_v10 }
 0x26e   : > { %1844 = vmatmul.mubr.msk.bf16.vlgmr.msra.gmra.mrb[4].mxu0 %vm558_vm0, %v2943_v24  ;;  %1852 = vmatmul.mubr.msk.bf16.vlgmr.msra.gmra.mrb[4].mxu1 %vm558_vm0, %v2943_v24 }
 0x26f   : > { %1856 = vmatpush3.bf16.msra.mxu0 %v2088_v27  ;;  %1864 = vmatpush3.bf16.msra.mxu1 %v2089_v28 }
 0x270   : > { %1857 = vmatprep.subr.bf16.mxu0 %v2533_v10  ;;  %1865 = vmatprep.subr.bf16.mxu1 %v2533_v10 }
 0x271   : > { %1859 = vmatprep.mubr.msk.bf16.mxu0 %vm2534_vm1, %v2533_v10  ;;  %1867 = vmatprep.mubr.msk.bf16.mxu1 %vm2534_vm1, %v2533_v10 }
 0x273   : > { %1858 = vmatpush3.bf16.msra.mxu0 %v2090_v29  ;;  %1866 = vmatpush3.bf16.msra.mxu1 %v2091_v30 }
 0x274   : > { %1871 = vmatprep.subr.bf16.mxu0 %v2533_v10  ;;  %1879 = vmatprep.subr.bf16.mxu1 %v2533_v10 }
 0x276   : > { %1860 = vmatmul.mubr.msk.bf16.vlgmr.msra.gmra.mrb[8].mxu0 %vm558_vm0, %v2943_v24  ;;  %1868 = vmatmul.mubr.msk.bf16.vlgmr.msra.gmra.mrb[8].mxu1 %vm558_vm0, %v2943_v24 }
 0x277   : > { %1872 = vmatpush3.bf16.msra.mxu0 %v2092_v31  ;;  %1880 = vmatpush3.bf16.msra.mxu1 %v2093_v32 }
 0x278   : > { %1873 = vmatprep.subr.bf16.mxu0 %v2533_v10  ;;  %1881 = vmatprep.subr.bf16.mxu1 %v2533_v10 }
 0x279   : > { %1875 = vmatprep.mubr.msk.bf16.mxu0 %vm2534_vm1, %v2533_v10  ;;  %1883 = vmatprep.mubr.msk.bf16.mxu1 %vm2534_vm1, %v2533_v10 }
 0x27b   : > { %1874 = vmatpush3.bf16.msra.mxu0 %v2094_v33  ;;  %1882 = vmatpush3.bf16.msra.mxu1 %v2095_v34 }
 0x27c   : > { %1887 = vmatprep.subr.bf16.mxu0 %v2533_v10  ;;  %1895 = vmatprep.subr.bf16.mxu1 %v2533_v10 }
 0x27e   : > { %1876 = vmatmul.mubr.msk.bf16.vlgmr.msra.gmra.mrb[12].mxu0 %vm558_vm0, %v2943_v24  ;;  %1884 = vmatmul.mubr.msk.bf16.vlgmr.msra.gmra.mrb[12].mxu1 %vm558_vm0, %v2943_v24 }
 0x27f   : > { %1888 = vmatpush3.bf16.msra.mxu0 %v2096_v35  ;;  %1896 = vmatpush3.bf16.msra.mxu1 %v2097_v36 }
 0x280   : > { %1889 = vmatprep.subr.bf16.mxu0 %v2533_v10  ;;  %1897 = vmatprep.subr.bf16.mxu1 %v2533_v10 }
 0x281   : > { %1891 = vmatprep.mubr.msk.bf16.mxu0 %vm2534_vm1, %v2533_v10  ;;  %1899 = vmatprep.mubr.msk.bf16.mxu1 %vm2534_vm1, %v2533_v10 }
 0x283   : > { %1890 = vmatpush3.bf16.msra.mxu0 %v2098_v37  ;;  %1898 = vmatpush3.bf16.msra.mxu1 %v2099_v38  ;;  %v1753_v38 = vld [vmem:[#allocation16 + $0x2] ss:$0 sm:$0xff] }
 0x284   : > { %1903 = vmatprep.subr.bf16.mxu0 %v2533_v10  ;;  %1911 = vmatprep.subr.bf16.mxu1 %v2533_v10 }
 0x286   : > { %1892 = vmatmul.mubr.msk.bf16.vlgmr.msra.gmra.mrb[16].mxu0 %vm558_vm0, %v2943_v24  ;;  %1900 = vmatmul.mubr.msk.bf16.vlgmr.msra.gmra.mrb[16].mxu1 %vm558_vm0, %v2943_v24 }
 0x287   : > { %1904 = vmatpush3.bf16.msra.mxu0 %v2100_v39  ;;  %1912 = vmatpush3.bf16.msra.mxu1 %v2101_v40  ;;  %v1758_v39 = vld [vmem:[#allocation13 + $0x3] ss:$0 sm:$0xff] }
 0x288   : > { %1905 = vmatprep.subr.bf16.mxu0 %v2533_v10  ;;  %1913 = vmatprep.subr.bf16.mxu1 %v2533_v10 }
 0x289   : > { %1907 = vmatprep.mubr.msk.bf16.mxu0 %vm2534_vm1, %v2533_v10  ;;  %1915 = vmatprep.mubr.msk.bf16.mxu1 %vm2534_vm1, %v2533_v10  ;;  %v1738_v10 = vld [vmem:[#allocation16 + $0x1] ss:$0 sm:$0xff] }
 0x28b   : > { %1906 = vmatpush3.bf16.msra.mxu0 %v2102_v41  ;;  %1914 = vmatpush3.bf16.msra.mxu1 %v2103_v42 }
 0x28e   : > { %1908 = vmatmul.mubr.msk.bf16.vlgmr.msra.gmra.mrb[20].mxu0 %vm558_vm0, %v2943_v24  ;;  %1916 = vmatmul.mubr.msk.bf16.vlgmr.msra.gmra.mrb[20].mxu1 %vm558_vm0, %v2943_v24  ;;  %v1748_v24 = vld [vmem:[#allocation14 + $0x2] ss:$0 sm:$0xff] }
 0x339   : > { %v648_v45 = vpop.f32.mrb[0].mxu0  ;;  %v715_v46 = vpop.f32.mrb[0].mxu1 }
 0x33a   : > { %v649_v47 = vadd.f32 %v1716_v43, %v648_v45  ;;  %v716_v48 = vadd.f32 %v1720_v44, %v715_v46  ;;  %v1829_v49 = vpop.f32.mrb[1].mxu0  ;;  %v1837_v50 = vpop.f32.mrb[1].mxu1 }
 0x33b   : > { %v651_v51 = vpop.f32.mrb[2].mxu0  ;;  %v718_v52 = vpop.f32.mrb[2].mxu1 }
 0x33c   : > { %v654_v53 = vmul.f32 0.35355338, %v649_v47  ;;  %v721_v54 = vpack.c.bf16 %v716_v48, %v716_v48  ;;  %v1830_v55 = vpop.f32.mrb[3].mxu0  ;;  %v1838_v56 = vpop.f32.mrb[3].mxu1 }
 0x33e   : > { %v655_v57 = vpack.c.bf16 %v654_v53, %v654_v53  ;;  %722 = vst.msk [vmem:[%s3011_s10] sm:$0xf] %vm656_vm2, %v721_v54  ;;  %v1763_v53 = vld [vmem:[#allocation14 + $0x3] ss:$0 sm:$0xff]  ;;  %v1768_v54 = vld [vmem:[#allocation16 + $0x3] ss:$0 sm:$0xff] }
 0x340   : > { %657 = vst.msk [vmem:[%s3016_s16] sm:$0xf] %vm656_vm2, %v655_v57 }
 0x341   : > { %v780_v60 = vpop.f32.mrb[4].mxu0  ;;  %v847_v61 = vpop.f32.mrb[4].mxu1 }
 0x342   : > { %v781_v62 = vadd.f32 %v1724_v58, %v780_v60  ;;  %v848_v63 = vadd.f32 %v1728_v59, %v847_v61  ;;  %v1845_v0 = vpop.f32.mrb[5].mxu0  ;;  %v1853_v1 = vpop.f32.mrb[5].mxu1 }
 0x343   : > { %v783_v2 = vpop.f32.mrb[6].mxu0  ;;  %v850_v3 = vpop.f32.mrb[6].mxu1 }
 0x344   : > { %v786_v4 = vpack.c.bf16 %v781_v62, %v781_v62  ;;  %v853_v5 = vmul.f32 0.35355338, %v848_v63  ;;  %v1846_v6 = vpop.f32.mrb[7].mxu0  ;;  %v1854_v7 = vpop.f32.mrb[7].mxu1 }
 0x346   : > { %787 = vst.msk [vmem:[%s3021_s14] sm:$0xf] %vm656_vm2, %v786_v4  ;;  %v854_v8 = vpack.c.bf16 %v853_v5, %v853_v5 }
 0x348   : > { %1732 = vst.msk [vmem:[%s3016_s16 + $0x4] sm:$0xf] %vm656_vm2, %v854_v8 }
 0x349   : > { %v916_v11 = vpop.f32.mrb[8].mxu0  ;;  %v984_v12 = vpop.f32.mrb[8].mxu1 }
 0x34a   : > { %v917_v13 = vadd.f32 %v1733_v9, %v916_v11  ;;  %v985_v14 = vadd.f32 %v1738_v10, %v984_v12  ;;  %v1861_v15 = vpop.f32.mrb[9].mxu0  ;;  %v1869_v16 = vpop.f32.mrb[9].mxu1 }
 0x34b   : > { %v919_v17 = vpop.f32.mrb[10].mxu0  ;;  %v987_v18 = vpop.f32.mrb[10].mxu1 }
 0x34c   : > { %v922_v19 = vpack.c.bf16 %v917_v13, %v917_v13  ;;  %v990_v20 = vpack.c.bf16 %v985_v14, %v985_v14  ;;  %v1862_v21 = vpop.f32.mrb[11].mxu0  ;;  %v1870_v22 = vpop.f32.mrb[11].mxu1 }
 0x34e   : > { %1737 = vst.msk [vmem:[%s3011_s10 + $0x4] sm:$0xf] %vm656_vm2, %v922_v19  ;;  %1742 = vst.msk [vmem:[%s3021_s14 + $0x4] sm:$0xf] %vm656_vm2, %v990_v20 }
 0x351   : > { %v1052_v25 = vpop.f32.mrb[12].mxu0  ;;  %v1121_v26 = vpop.f32.mrb[12].mxu1 }
 0x352   : > { %v1053_v27 = vadd.f32 %v1743_v23, %v1052_v25  ;;  %v1122_v28 = vadd.f32 %v1748_v24, %v1121_v26  ;;  %v1877_v29 = vpop.f32.mrb[13].mxu0  ;;  %v1885_v30 = vpop.f32.mrb[13].mxu1 }
 0x353   : > { %v1055_v31 = vpop.f32.mrb[14].mxu0  ;;  %v1124_v32 = vpop.f32.mrb[14].mxu1 }
 0x354   : > { %v1058_v33 = vmul.f32 0.35355338, %v1053_v27  ;;  %v1127_v34 = vpack.c.bf16 %v1122_v28, %v1122_v28  ;;  %v1878_v35 = vpop.f32.mrb[15].mxu0  ;;  %v1886_v36 = vpop.f32.mrb[15].mxu1 }
 0x356   : > { %v1059_v37 = vpack.c.bf16 %v1058_v33, %v1058_v33  ;;  %1752 = vst.msk [vmem:[%s3011_s10 + $0x8] sm:$0xf] %vm656_vm2, %v1127_v34 }
 0x358   : > { %1747 = vst.msk [vmem:[%s3016_s16 + $0x8] sm:$0xf] %vm656_vm2, %v1059_v37 }
 0x359   : > { %v1189_v40 = vpop.f32.mrb[16].mxu0  ;;  %v1257_v41 = vpop.f32.mrb[16].mxu1 }
 0x35a   : > { %v1190_v42 = vadd.f32 %v1753_v38, %v1189_v40  ;;  %v1258_v43 = vadd.f32 %v1758_v39, %v1257_v41  ;;  %v1893_v44 = vpop.f32.mrb[17].mxu0  ;;  %v1901_v45 = vpop.f32.mrb[17].mxu1 }
 0x35b   : > { %v1192_v46 = vpop.f32.mrb[18].mxu0  ;;  %v1260_v47 = vpop.f32.mrb[18].mxu1 }
 0x35c   : > { %v1195_v48 = vpack.c.bf16 %v1190_v42, %v1190_v42  ;;  %v1263_v49 = vmul.f32 0.35355338, %v1258_v43  ;;  %v1894_v50 = vpop.f32.mrb[19].mxu0  ;;  %v1902_v51 = vpop.f32.mrb[19].mxu1 }
 0x35e   : > { %1757 = vst.msk [vmem:[%s3021_s14 + $0x8] sm:$0xf] %vm656_vm2, %v1195_v48  ;;  %v1264_v52 = vpack.c.bf16 %v1263_v49, %v1263_v49 }
 0x360   : > { %1762 = vst.msk [vmem:[%s3016_s16 + $0xc] sm:$0xf] %vm656_vm2, %v1264_v52 }
 0x361   : > { %v1326_v55 = vpop.f32.mrb[20].mxu0  ;;  %v1394_v56 = vpop.f32.mrb[20].mxu1 }
 0x362   : > { %2373 = shalt.err (!%p2370_p0)
}
 0x363   : > { %s2374_s16 = scalar_lea.hbm %s3047_s28, 256  ;;  %s2378_s0 = scalar_lea.hbm %s3246_s12, 512 }
 0x364   : > { %p2375_p5 = scmp.ne.s32.totalorder %s3047_s28, %s2374_s16  ;;  %p2379_p13 = scmp.lt.u32.totalorder %s3047_s28, %s3246_s12 }
 0x365   : > { %p2380_p11 = scmp.lt.u32.totalorder %s2378_s0, %s2374_s16  ;;  %p2382_p8 = scmp.lt.u32.totalorder %s2374_s16, %s3047_s28 }
 0x366   : > { %p2376_p7 = pnand %p2375_p5, %p3247_p9 }
 0x367   : > { %p2381_p2 = por %p2380_p11, %p2379_p13 }
 0x368   : > { %p2377_p10 = pneg %p2376_p7 }
 0x369   : > { %p2383_p4 = por %p2382_p8, %p2381_p2 }
 0x36b   : > { %p2384_p6 = pnand %p2383_p4, %p2377_p10 }
 0x36d   : > { %2387 = shalt.err (!%p2384_p6)
}
 0x36e   : > { %s3205_s30 = smov 64   ;;  %s3207_s11 = smov 4   ;;  %v1327_v57 = vadd.f32 %v1763_v53, %v1326_v55  ;;  %v1395_v58 = vadd.f32 %v1768_v54, %v1394_v56  ;;  %v1909_v59 = vpop.f32.mrb[21].mxu0  ;;  %v1917_v60 = vpop.f32.mrb[21].mxu1 }
 0x36f   : > { %1953 = dma.vmem_to_hbm [thread:$0]  (%p3247_p9), %s3039_s9, 256, %s3047_s28, %s1404_s24, %s3205_s30, %s3205_s30, %s3207_s11   ;;  %v1329_v61 = vpop.f32.mrb[22].mxu0  ;;  %v1397_v62 = vpop.f32.mrb[22].mxu1 }
 0x370   : > { %s1462_s20 = sshll.u32 %s3021_s14, 4  ;;  %s3248_s25 = sshll.u32 %s3011_s10, 4  ;;  %v1332_v63 = vpack.c.bf16 %v1327_v57, %v1327_v57  ;;  %v1400_v0 = vpack.c.bf16 %v1395_v58, %v1395_v58  ;;  %v1910_v1 = vpop.f32.mrb[23].mxu0  ;;  %v1918_v2 = vpop.f32.mrb[23].mxu1  ;;  %s3083_s25 = int_to_ptr.vmem [resolvable:$true] %s3248_s25  ;;  %s3091_s20 = int_to_ptr.vmem [resolvable:$true] %s1462_s20 }
 0x371   : > { %s3249_s28 = sld [smem:[#allocation36_spill]]  ;;  %s3250_s0 = sld [smem:[#allocation37_spill]] }
 0x372   : > { %1767 = vst.msk [vmem:[%s3011_s10 + $0xc] sm:$0xf] %vm656_vm2, %v1332_v63  ;;  %1772 = vst.msk [vmem:[%s3021_s14 + $0xc] sm:$0xf] %vm656_vm2, %v1400_v0  ;;  %s3251_s30 = sand.u32 1, %s2631_s23   ;;  %s2388_s4 = scalar_lea.vmem %s3083_s25, 256 }
 0x373   : > { %s3105_s11 = scalar_lea.sflag [#allocation19], %s3251_s30  ;;  %p2389_p3 = scmp.ne.s32.totalorder %s3083_s25, %s2388_s4 }
 0x374   : > { %s2538_s29 = smov [#allocation18]  }
 0x375   : > { %p2390_p1 = pnand %p2389_p3, %p3247_p9  ;;  %s2392_s9 = sshll.u32 %s2538_s29, 4  ;;  %s2393_s9 = int_to_ptr.vmem [resolvable:$false] %s2392_s9 }
 0x376   : > { %s2394_s5 = scalar_lea.vmem %s2393_s9, 512  ;;  %p2395_p0 = scmp.lt.s32.totalorder %s3083_s25, %s2393_s9 }
 0x377   : > { %s3089_s24 = scalar_lea.hbm %s3249_s28, %s3037_s26  ;;  %s3097_s2 = scalar_lea.hbm %s3250_s0, %s3037_s26 }
 0x378   : > { %p2391_p12 = pneg %p2390_p1  ;;  %p2396_p5 = scmp.lt.s32.totalorder %s2394_s5, %s2388_s4 }
 0x37a   : > { %p2397_p7 = por %p2396_p5, %p2395_p0 }
 0x37c   : > { %p2398_p10 = pnand %p2397_p7, %p2391_p12 }
 0x37e   : > { %2401 = shalt.err (!%p2398_p10)
}
 0x37f   : > { %s2402_s23 = scalar_lea.hbm %s3089_s24, 256  ;;  %s2406_s26 = scalar_lea.hbm %s3249_s28, 512 }
 0x380   : > { %p2403_p13 = scmp.ne.s32.totalorder %s3089_s24, %s2402_s23  ;;  %p2407_p8 = scmp.lt.u32.totalorder %s3089_s24, %s3249_s28 }
 0x381   : > { %p2408_p4 = scmp.lt.u32.totalorder %s2406_s26, %s2402_s23  ;;  %p2410_p3 = scmp.lt.u32.totalorder %s2402_s23, %s3089_s24 }
 0x382   : > { %p2404_p11 = pnand %p2403_p13, %p3247_p9 }
 0x383   : > { %p2409_p6 = por %p2408_p4, %p2407_p8 }
 0x384   : > { %p2405_p2 = pneg %p2404_p11 }
 0x385   : > { %p2411_p1 = por %p2410_p3, %p2409_p6 }
 0x387   : > { %p2412_p12 = pnand %p2411_p1, %p2405_p2 }
 0x389   : > { %2415 = shalt.err (!%p2412_p12)
}
 0x38a   : > { %s3252_s4 = smov 4   ;;  %s3253_s5 = smov 64  }
 0x38b   : > { %1954 = dma.vmem_to_hbm [thread:$0]  (%p3247_p9), %s3083_s25, 256, %s3089_s24, %s3105_s11, %s3253_s5, %s3253_s5, %s3252_s4  }
 0x38c   : > { %s2416_s1 = scalar_lea.vmem %s3091_s20, 256  ;;  %s2539_s29 = smov [#allocation20]  }
 0x38d   : > { %p2417_p0 = scmp.ne.s32.totalorder %s3091_s20, %s2416_s1  ;;  %s2420_s9 = sshll.u32 %s2539_s29, 4  ;;  %s2421_s9 = int_to_ptr.vmem [resolvable:$false] %s2420_s9 }
 0x38e   : > { %s2422_s23 = scalar_lea.vmem %s2421_s9, 512  ;;  %p2423_p10 = scmp.lt.s32.totalorder %s3091_s20, %s2421_s9 }
 0x38f   : > { %p2418_p5 = pnand %p2417_p0, %p3247_p9  ;;  %p2424_p13 = scmp.lt.s32.totalorder %s2422_s23, %s2416_s1 }
 0x391   : > { %p2419_p7 = pneg %p2418_p5  ;;  %p2425_p11 = por %p2424_p13, %p2423_p10 }
 0x393   : > { %p2426_p2 = pnand %p2425_p11, %p2419_p7 }
 0x395   : > { %2429 = shalt.err (!%p2426_p2)
}
 0x396   : > { %s2430_s25 = scalar_lea.hbm %s3097_s2, 256  ;;  %s2434_s14 = scalar_lea.hbm %s3250_s0, 512 }
 0x397   : > { %p2431_p8 = scmp.ne.s32.totalorder %s3097_s2, %s2430_s25  ;;  %p2435_p3 = scmp.lt.u32.totalorder %s3097_s2, %s3250_s0 }
 0x398   : > { %p2436_p1 = scmp.lt.u32.totalorder %s2434_s14, %s2430_s25  ;;  %p2438_p0 = scmp.lt.u32.totalorder %s2430_s25, %s3097_s2 }
 0x399   : > { %p2432_p4 = pnand %p2431_p8, %p3247_p9 }
 0x39a   : > { %p2437_p12 = por %p2436_p1, %p2435_p3 }
 0x39b   : > { %p2433_p6 = pneg %p2432_p4 }
 0x39c   : > { %p2439_p5 = por %p2438_p0, %p2437_p12 }
 0x39e   : > { %p2440_p7 = pnand %p2439_p5, %p2433_p6 }
 0x3a0   : > { %2443 = shalt.err (!%p2440_p7)
}
 0x3a1   : > { %1955 = dma.vmem_to_hbm [thread:$0]  (%p3247_p9), %s3091_s20, 256, %s3097_s2, %s3105_s11, %s3253_s5, %s3253_s5, %s3252_s4  }
 0x3a2 PF: > { %s1477_s16 = sand.u32 1, %s2498_s17   ;;  %p3254_p10 = scmp.ne.s32.totalorder %s3233_s13, 0 }
 0x3a3   : > { %p3255_p13 = scmp.ge.s32.totalorder %s2518_s22, 2  ;;  %s1478_s1 = scalar_lea.sflag [#allocation4], %s1477_s16 }
 0x3a5   : > { %p1989_p11 = pnand %p3255_p13, %p3254_p10 }
 0x3a7   : > { %2489 = dma.done.wait (!%p1989_p11), %s1478_s1, 256  }
 0x3a8   : > { %2491 = vsyncadd (!%p1989_p11), %s1478_s1, 4294967040  ;;  %s3256_s3 = sadd.s32 4294967294, %s2518_s22  }
 0x3a9   : > { %s1486_s29 = sand.u32 1, %s3256_s3  }
 0x3aa   : > { %s1487_s9 = scalar_lea.sflag [#allocation19], %s1486_s29 }
 0x3ab   : > { %2493 = dma.done.wait (!%p1989_p11), %s1487_s9, 512  }
 0x3ac   : > { %2495 = vsyncadd (!%p1989_p11), %s1487_s9, 4294966784  ;;  %s35_s22 = sadd.s32 1, %s2518_s22   ;;  %s3257_s17 = smov %s2502_s18 }
 0x3ad   : > { %p32_p9 = scmp.ge.s32.totalorder %s35_s22, 4   ;;  %s3258_s18 = smov %s2506_s19 }
 0x3ae   : > { %s3259_s19 = smov %s2857_s15  ;;  %s3260_s20 = smov %s2514_s21 }
 0x3af   : > { %s3261_s21 = smov %s3263_s27  ;;  %34 = sbr.rel (!%p32_p9) target bundleno = 22 (0x16), region = 192 }
 0x3b6   :  { %1501 = vsyncpa [#allocation3], 1 }
 0x3b7   :  { %1503 = vsyncpa [#allocation3 + $0x1], 1 }
 0x3b8   :  { %1504 = vsyncpa [#allocation6], 1 }
 0x3b9   :  { %1505 = vsyncpa [#allocation9], 1 }
 0x3ba   :  { %1506 = vsyncpa [#allocation12], 1 }
 0x3bb   :  { %1507 = vsyncpa [#allocation15], 1 }
 0x3bc   :  { %1508 = vsyncpa [#allocation4], 1 }
 0x3bd   :  { %1510 = vsyncpa [#allocation4 + $0x1], 1 }
 0x3be   :  { %1511 = vsyncpa [#allocation19], 1 }
 0x3bf   :  { %1513 = vsyncpa [#allocation19 + $0x1], 1 }

// kernel: conformer_ctc_forward.27
= control target key start
LH: loop header
LB: loop body
LE: loop exit
PB: predicated region body
PF: predicated region fallthrough
CT: control target
= control target key end

     0   :  { %8 = vsyncpa [#allocation3], 0  ;;  %s397_s0 = inlined_call_operand.hbm [shape: bf16[16,32], index: 0, kind: input, shape index: {}]   ;;  %s398_s1 = inlined_call_operand.hbm [shape: bf16[32,16], index: 1, kind: input, shape index: {}]   ;;  %s399_s2 = inlined_call_operand.hbm [shape: f32[1,16], index: 2, kind: input, shape index: {}]   ;;  %s400_s3 = inlined_call_operand.hbm [shape: f32[16,16], index: 3, kind: output, shape index: {}]  }
   0x1   :  { %9 = vsyncpa [#allocation6], 0 }
   0x2   :  { %10 = vsyncpa [#allocation4], 0  ;;  %s306_s12 = smov [#allocation5]   ;;  %s307_s14 = smov [#allocation2]  }
   0x3   :  { %s28_s13 = sshll.u32 %s306_s12, 4  ;;  %s16_s15 = sshll.u32 %s307_s14, 4  ;;  %s29_s13 = int_to_ptr.vmem [resolvable:$true] %s28_s13  ;;  %s336_s15 = int_to_ptr.vmem [resolvable:$true] %s16_s15 }
   0x4   :  { %s212_s18 = scalar_lea.hbm %s398_s1, 256 }
   0x5   :  { %p213_p0 = scmp.ne.s32.totalorder %s398_s1, %s212_s18  ;;  %p216_p1 = scmp.lt.u32.totalorder %s212_s18, %s398_s1 }
   0x7   :  { %p218_p2 = pnand %p216_p1, %p213_p0 }
   0x9   :  { %221 = shalt.err (!%p218_p2)
}
   0xa   :  { %s222_s23 = scalar_lea.vmem %s29_s13, 256  ;;  %p227_p4 = scmp.lt.s32.totalorder %s29_s13, %s29_s13 }
   0xb   :  { %p223_p3 = scmp.ne.s32.totalorder %s29_s13, %s222_s23  ;;  %p228_p5 = scmp.lt.s32.totalorder %s222_s23, %s222_s23 }
   0xd   :  { %p229_p6 = por %p228_p5, %p227_p4 }
   0xf   :  { %p230_p7 = pnand %p229_p6, %p223_p3 }
  0x11   :  { %233 = shalt.err (!%p230_p7)
}
  0x12   :  { %s308_s24 = smov 64   ;;  %s309_s25 = smov 4  }
  0x13   :  { %34 = dma.hbm_to_vmem [thread:$0]  %s398_s1, 256, %s29_s13, [#allocation6], %s308_s24, %s308_s24, %s309_s25  }
  0x14   :  { %s234_s30 = scalar_lea.hbm %s397_s0, 128 }
  0x15   :  { %p235_p8 = scmp.ne.s32.totalorder %s397_s0, %s234_s30  ;;  %p238_p9 = scmp.lt.u32.totalorder %s234_s30, %s397_s0 }
  0x17   :  { %p240_p10 = pnand %p238_p9, %p235_p8 }
  0x19   :  { %243 = shalt.err (!%p240_p10)
}
  0x1a   :  { %s244_s8 = scalar_lea.vmem %s336_s15, 128  ;;  %p249_p12 = scmp.lt.s32.totalorder %s336_s15, %s336_s15 }
  0x1b   :  { %p245_p11 = scmp.ne.s32.totalorder %s336_s15, %s244_s8  ;;  %p250_p13 = scmp.lt.s32.totalorder %s244_s8, %s244_s8 }
  0x1d   :  { %p251_p0 = por %p250_p13, %p249_p12 }
  0x1f   :  { %p252_p1 = pnand %p251_p0, %p245_p11 }
  0x21   :  { %255 = shalt.err (!%p252_p1)
}
  0x22   :  { %22 = dma.hbm_to_vmem [thread:$0]  %s397_s0, 128, %s336_s15, [#allocation3], %s308_s24, %s308_s24, %s309_s25  }
  0x23   :  { %s310_s10 = smov [#allocation7]   ;;  %s256_s14 = scalar_lea.hbm %s399_s2, 16 }
  0x24   :  { %s41_s11 = sshll.u32 %s310_s10, 4  ;;  %p257_p2 = scmp.ne.s32.totalorder %s399_s2, %s256_s14  ;;  %s42_s11 = int_to_ptr.vmem [resolvable:$true] %s41_s11 }
  0x25   :  { %p260_p3 = scmp.lt.u32.totalorder %s256_s14, %s399_s2 }
  0x27   :  { %p262_p4 = pnand %p260_p3, %p257_p2 }
  0x29   :  { %265 = shalt.err (!%p262_p4)
}
  0x2a   :  { %s266_s20 = scalar_lea.vmem %s42_s11, 16  ;;  %s270_s0 = scalar_lea.vmem %s42_s11, 32 }
  0x2b   :  { %p267_p5 = scmp.ne.s32.totalorder %s42_s11, %s266_s20  ;;  %p271_p6 = scmp.lt.s32.totalorder %s42_s11, %s42_s11 }
  0x2c   :  { %p272_p7 = scmp.lt.s32.totalorder %s270_s0, %s266_s20 }
  0x2e   :  { %p273_p8 = por %p272_p7, %p271_p6 }
  0x30   :  { %p274_p9 = pnand %p273_p8, %p267_p5 }
  0x32   :  { %277 = shalt.err (!%p274_p9)
}
  0x33   :  { %44 = dma.hbm_to_vmem [thread:$0]  %s399_s2, 16, %s42_s11, [#allocation6]  }
  0x34   :  { %300 = dma.done.wait [#allocation3], 128  }
  0x35   :  { %301 = vsyncadd [#allocation3], 4294967168 }
  0x36   :  { %302 = dma.done.wait [#allocation6], 272  }
  0x37   :  { %303 = vsyncadd [#allocation6], 4294967024  ;;  %v311_v0 = vmov 0.0   ;;  %vm312_vm0 = vmmov 0   ;;  %v201_v1 = vld [vmem:[#allocation5] sm:$0xff]   ;;  %v202_v2 = vld [vmem:[#allocation5 + $0x8] sm:$0xff]  }
  0x38   :  { %183 = vmatprep.subr.bf16.mxu0 %v311_v0  ;;  %187 = vmatprep.mubr.msk.bf16.mxu0 %vm312_vm0, %v311_v0  ;;  %v203_v3 = vld [vmem:[#allocation2] sm:$0xff]   ;;  %vm85_vm1 = vcmask 261120   ;;  %v175_v4 = vld [vmem:[#allocation7] ss:$0 sm:$0xff]  ;;  %vm130_vm2 = vcmask 130048   ;;  %s313_s2 = smov [#allocation8]  }
  0x39   :  { %184 = vmatpush3.bf16.msra.mxu0 %v201_v1  ;;  %s162_s22 = sshll.u32 %s313_s2, 4  ;;  %s163_s22 = int_to_ptr.vmem [resolvable:$true] %s162_s22 }
  0x3a   :  { %185 = vmatprep.subr.bf16.mxu0 %v311_v0  ;;  %s278_s23 = scalar_lea.vmem %s163_s22, 256  ;;  %p283_p11 = scmp.lt.s32.totalorder %s163_s22, %s163_s22 }
  0x3b   :  { %p279_p10 = scmp.ne.s32.totalorder %s163_s22, %s278_s23  ;;  %p284_p12 = scmp.lt.s32.totalorder %s278_s23, %s278_s23 }
  0x3d   :  { %186 = vmatpush3.bf16.msra.mxu0 %v202_v2  ;;  %p285_p13 = por %p284_p12, %p283_p11 }
  0x3f   :  { %p286_p0 = pnand %p285_p13, %p279_p10 }
  0x40   :  { %188 = vmatmul.mubr.msk.bf16.vlgmr.msra.gmra.mrb[0].mxu0 %vm85_vm1, %v203_v3 }
 0x113   :  { %v123_v5 = vpop.f32.mrb[0].mxu0 }
 0x114   :  { %v124_v6 = vadd.f32 %v175_v4, %v123_v5  ;;  %v189_v7 = vpop.f32.mrb[1].mxu0 }
 0x115   :  { %v126_v8 = vpop.f32.mrb[2].mxu0 }
 0x116   :  { %v127_v9 = vadd.f32 %v175_v4, %v126_v8  ;;  %v190_v10 = vpop.f32.mrb[3].mxu0  ;;  %v131_v11 = vsel %vm130_vm2, %v124_v6, -inf }
 0x117   :  { %132 = vmax.xlane.f32.xlu0 %v131_v11 }
 0x118   :  { %v134_v12 = vsel %vm130_vm2, %v127_v9, -inf }
 0x11b   :  { %135 = vmax.xlane.f32.xlu0 %v134_v12 }
 0x1a4   :  { %v133_v13 = vpop.xlane.xlu0 %132 }
 0x1a5   :  { %v137_v14 = vsub.f32 %v124_v6, %v133_v13 }
 0x1a7   :  { %v139_v15 = vmul.f32 1.442695, %v137_v14 }
 0x1a8   :  { %v136_v16 = vpop.xlane.xlu0 %135 }
 0x1a9   :  { %204 = vpow2.f32 %v139_v15  ;;  %v138_v17 = vsub.f32 %v127_v9, %v136_v16 }
 0x1ab   :  { %v141_v18 = vmul.f32 1.442695, %v138_v17 }
 0x1ad   :  { %206 = vpow2.f32 %v141_v18 }
 0x1b3   :  { %v205_v19 = vpop.eup %204 }
 0x1b4   :  { %v143_v20 = vsel %vm130_vm2, %v205_v19, 0.0 }
 0x1b5   :  { %144 = vadd.xlane.f32.xlu1 %v143_v20 }
 0x1b7   :  { %v207_v21 = vpop.eup %206 }
 0x1b8   :  { %v146_v22 = vsel %vm130_vm2, %v207_v21, 0.0 }
 0x1b9   :  { %147 = vadd.xlane.f32.xlu1 %v146_v22 }
 0x242   :  { %v145_v23 = vpop.xlane.xlu1 %144 }
 0x243   :  { %208 = vlog2.f32 %v145_v23 }
 0x246   :  { %v148_v24 = vpop.xlane.xlu1 %147 }
 0x247   :  { %210 = vlog2.f32 %v148_v24 }
 0x24d   :  { %v209_v25 = vpop.eup %208 }
 0x24e   :  { %v150_v26 = vmul.f32 0.6931472, %v209_v25 }
 0x250   :  { %v153_v27 = vsub.f32 %v137_v14, %v150_v26 }
 0x251   :  { %v211_v28 = vpop.eup %210 }
 0x252   :  { %155 = vst.msk [vmem:[#allocation8] sm:$0xff] %vm130_vm2, %v153_v27  ;;  %v152_v29 = vmul.f32 0.6931472, %v211_v28 }
 0x254   :  { %v154_v30 = vsub.f32 %v138_v17, %v152_v29 }
 0x256   :  { %156 = vst.msk [vmem:[#allocation8 + $0x8] sm:$0xff] %vm130_vm2, %v154_v30 }
 0x257   :  { %289 = shalt.err (!%p286_p0)
}
 0x258   :  { %s290_s26 = scalar_lea.hbm %s400_s3, 256 }
 0x259   :  { %p291_p1 = scmp.ne.s32.totalorder %s400_s3, %s290_s26  ;;  %p294_p2 = scmp.lt.u32.totalorder %s290_s26, %s400_s3 }
 0x25b   :  { %p296_p3 = pnand %p294_p2, %p291_p1 }
 0x25d   :  { %299 = shalt.err (!%p296_p3)
}
 0x25e   :  { %s314_s4 = smov 128   ;;  %s315_s5 = smov 8  }
 0x25f   :  { %168 = dma.vmem_to_hbm [thread:$0]  %s163_s22, 256, %s400_s3, [#allocation4], %s314_s4, %s314_s4, %s315_s5  }
 0x260   :  { %304 = dma.done.wait [#allocation4], 256  }
 0x261   :  { %305 = vsyncadd [#allocation4], 4294967040 }
 0x262   :  { %172 = vsyncpa [#allocation3], 1 }
 0x263   :  { %173 = vsyncpa [#allocation6], 1 }
 0x264   :  { %174 = vsyncpa [#allocation4], 1 }

// kernel: conformer_ctc_forward.20
= control target key start
LH: loop header
LB: loop body
LE: loop exit
PB: predicated region body
PF: predicated region fallthrough
CT: control target
= control target key end

     0   :  { %14 = vsyncpa [#allocation3], 0  ;;  %s976_s0 = inlined_call_operand.hbm [shape: bf16[16,32], index: 0, kind: input, shape index: {}]   ;;  %s977_s1 = inlined_call_operand.hbm [shape: f32[1,32], index: 1, kind: input, shape index: {}]   ;;  %s978_s2 = inlined_call_operand.hbm [shape: f32[1,32], index: 2, kind: input, shape index: {}]   ;;  %s979_s3 = inlined_call_operand.hbm [shape: bf16[32,64], index: 3, kind: input, shape index: {}]   ;;  %s980_s4 = inlined_call_operand.hbm [shape: f32[1,64], index: 4, kind: input, shape index: {}]   ;;  %s981_s5 = inlined_call_operand.hbm [shape: bf16[64,32], index: 5, kind: input, shape index: {}]   ;;  %s982_s6 = inlined_call_operand.hbm [shape: f32[1,32], index: 6, kind: input, shape index: {}]   ;;  %s983_s7 = inlined_call_operand.hbm [shape: f32[1,32], index: 7, kind: input, shape index: {}]   ;;  %s984_s8 = inlined_call_operand.hbm [shape: f32[1,32], index: 8, kind: input, shape index: {}]   ;;  %s985_s9 = inlined_call_operand.hbm [shape: bf16[16,32], index: 9, kind: output, shape index: {}]  }
   0x1   :  { %15 = vsyncpa [#allocation6], 0 }
   0x2   :  { %16 = vsyncpa [#allocation9], 0 }
   0x3   :  { %17 = vsyncpa [#allocation12], 0 }
   0x4   :  { %18 = vsyncpa [#allocation15], 0 }
   0x5   :  { %19 = vsyncpa [#allocation4], 0  ;;  %s761_s30 = smov [#allocation5]   ;;  %s529_s13 = scalar_lea.hbm %s977_s1, 16 }
   0x6   :  { %s38_s10 = sshll.u32 %s761_s30, 4  ;;  %p530_p0 = scmp.ne.s32.totalorder %s977_s1, %s529_s13  ;;  %s39_s10 = int_to_ptr.vmem [resolvable:$true] %s38_s10 }
   0x7   :  { %p533_p1 = scmp.lt.u32.totalorder %s529_s13, %s977_s1 }
   0x9   :  { %p535_p2 = pnand %p533_p1, %p530_p0 }
   0xb   :  { %538 = shalt.err (!%p535_p2)
}
   0xc   :  { %s539_s18 = scalar_lea.vmem %s39_s10, 16  ;;  %s543_s19 = scalar_lea.vmem %s39_s10, 32 }
   0xd   :  { %p540_p3 = scmp.ne.s32.totalorder %s39_s10, %s539_s18  ;;  %p544_p4 = scmp.lt.s32.totalorder %s39_s10, %s39_s10 }
   0xe   :  { %p545_p5 = scmp.lt.s32.totalorder %s543_s19, %s539_s18 }
  0x10   :  { %p546_p6 = por %p545_p5, %p544_p4 }
  0x12   :  { %p547_p7 = pnand %p546_p6, %p540_p3 }
  0x14   :  { %550 = shalt.err (!%p547_p7)
}
  0x15   :  { %41 = dma.hbm_to_vmem [thread:$0]  %s977_s1, 16, %s39_s10, [#allocation6]  }
  0x16   :  { %s762_s22 = smov [#allocation8]   ;;  %s763_s24 = smov [#allocation11]  }
  0x17   :  { %s57_s23 = sshll.u32 %s762_s22, 4  ;;  %s79_s25 = sshll.u32 %s763_s24, 4  ;;  %s58_s23 = int_to_ptr.vmem [resolvable:$true] %s57_s23  ;;  %s80_s25 = int_to_ptr.vmem [resolvable:$true] %s79_s25 }
  0x18   :  { %s551_s28 = scalar_lea.hbm %s979_s3, 256 }
  0x19   :  { %p552_p8 = scmp.ne.s32.totalorder %s979_s3, %s551_s28  ;;  %p555_p9 = scmp.lt.u32.totalorder %s551_s28, %s979_s3 }
  0x1b   :  { %p557_p10 = pnand %p555_p9, %p552_p8 }
  0x1d   :  { %560 = shalt.err (!%p557_p10)
}
  0x1e   :  { %s561_s1 = scalar_lea.vmem %s58_s23, 256  ;;  %p566_p12 = scmp.lt.s32.totalorder %s58_s23, %s58_s23 }
  0x1f   :  { %p562_p11 = scmp.ne.s32.totalorder %s58_s23, %s561_s1  ;;  %p567_p13 = scmp.lt.s32.totalorder %s561_s1, %s561_s1 }
  0x21   :  { %p568_p0 = por %p567_p13, %p566_p12 }
  0x23   :  { %p569_p1 = pnand %p568_p0, %p562_p11 }
  0x25   :  { %572 = shalt.err (!%p569_p1)
}
  0x26   :  { %s764_s10 = smov 64   ;;  %s765_s13 = smov 4  }
  0x27   :  { %63 = dma.hbm_to_vmem [thread:$0]  %s979_s3, 256, %s58_s23, [#allocation9], %s764_s10, %s764_s10, %s765_s13  }
  0x28   :  { %s573_s18 = scalar_lea.hbm %s981_s5, 512 }
  0x29   :  { %p574_p2 = scmp.ne.s32.totalorder %s981_s5, %s573_s18  ;;  %p577_p3 = scmp.lt.u32.totalorder %s573_s18, %s981_s5 }
  0x2b   :  { %p579_p4 = pnand %p577_p3, %p574_p2 }
  0x2d   :  { %582 = shalt.err (!%p579_p4)
}
  0x2e   :  { %s583_s24 = scalar_lea.vmem %s80_s25, 512  ;;  %p588_p6 = scmp.lt.s32.totalorder %s80_s25, %s80_s25 }
  0x2f   :  { %p584_p5 = scmp.ne.s32.totalorder %s80_s25, %s583_s24  ;;  %p589_p7 = scmp.lt.s32.totalorder %s583_s24, %s583_s24 }
  0x31   :  { %p590_p8 = por %p589_p7, %p588_p6 }
  0x33   :  { %p591_p9 = pnand %p590_p8, %p584_p5 }
  0x35   :  { %594 = shalt.err (!%p591_p9)
}
  0x36   :  { %85 = dma.hbm_to_vmem [thread:$0]  %s981_s5, 512, %s80_s25, [#allocation12], %s764_s10, %s764_s10, %s765_s13  }
  0x37   :  { %s766_s26 = smov [#allocation14]   ;;  %s767_s28 = smov [#allocation2]  }
  0x38   :  { %s102_s27 = sshll.u32 %s766_s26, 4  ;;  %s25_s29 = sshll.u32 %s767_s28, 4  ;;  %s103_s27 = int_to_ptr.vmem [resolvable:$true] %s102_s27  ;;  %s26_s29 = int_to_ptr.vmem [resolvable:$true] %s25_s29 }
  0x39   :  { %s595_s12 = scalar_lea.hbm %s983_s7, 16 }
  0x3a   :  { %p596_p10 = scmp.ne.s32.totalorder %s983_s7, %s595_s12  ;;  %p599_p11 = scmp.lt.u32.totalorder %s595_s12, %s983_s7 }
  0x3c   :  { %p601_p12 = pnand %p599_p11, %p596_p10 }
  0x3e   :  { %604 = shalt.err (!%p601_p12)
}
  0x3f   :  { %s605_s5 = scalar_lea.vmem %s103_s27, 16  ;;  %s609_s25 = scalar_lea.vmem %s103_s27, 32 }
  0x40   :  { %p606_p13 = scmp.ne.s32.totalorder %s103_s27, %s605_s5  ;;  %p610_p0 = scmp.lt.s32.totalorder %s103_s27, %s103_s27 }
  0x41   :  { %p611_p1 = scmp.lt.s32.totalorder %s609_s25, %s605_s5 }
  0x43   :  { %p612_p2 = por %p611_p1, %p610_p0 }
  0x45   :  { %p613_p3 = pnand %p612_p2, %p606_p13 }
  0x47   :  { %616 = shalt.err (!%p613_p3)
}
  0x48   :  { %105 = dma.hbm_to_vmem [thread:$0]  %s983_s7, 16, %s103_s27, [#allocation15]  }
  0x49   :  { %s617_s21 = scalar_lea.hbm %s976_s0, 128 }
  0x4a   :  { %p618_p4 = scmp.ne.s32.totalorder %s976_s0, %s617_s21  ;;  %p621_p5 = scmp.lt.u32.totalorder %s617_s21, %s976_s0 }
  0x4c   :  { %p623_p6 = pnand %p621_p5, %p618_p4 }
  0x4e   :  { %626 = shalt.err (!%p623_p6)
}
  0x4f   :  { %s627_s26 = scalar_lea.vmem %s26_s29, 128  ;;  %p632_p8 = scmp.lt.s32.totalorder %s26_s29, %s26_s29 }
  0x50   :  { %p628_p7 = scmp.ne.s32.totalorder %s26_s29, %s627_s26  ;;  %p633_p9 = scmp.lt.s32.totalorder %s627_s26, %s627_s26 }
  0x52   :  { %p634_p10 = por %p633_p9, %p632_p8 }
  0x54   :  { %p635_p11 = pnand %p634_p10, %p628_p7 }
  0x56   :  { %638 = shalt.err (!%p635_p11)
}
  0x57   :  { %31 = dma.hbm_to_vmem [thread:$0]  %s976_s0, 128, %s26_s29, [#allocation3], %s764_s10, %s764_s10, %s765_s13  }
  0x58   :  { %s768_s28 = smov [#allocation7]   ;;  %s769_s11 = smov [#allocation10]  }
  0x59   :  { %s48_s30 = sshll.u32 %s768_s28, 4  ;;  %s70_s12 = sshll.u32 %s769_s11, 4  ;;  %s49_s30 = int_to_ptr.vmem [resolvable:$true] %s48_s30  ;;  %s71_s12 = int_to_ptr.vmem [resolvable:$true] %s70_s12 }
  0x5a   :  { %s639_s15 = scalar_lea.hbm %s978_s2, 16 }
  0x5b   :  { %p640_p12 = scmp.ne.s32.totalorder %s978_s2, %s639_s15  ;;  %p643_p13 = scmp.lt.u32.totalorder %s639_s15, %s978_s2 }
  0x5d   :  { %p645_p0 = pnand %p643_p13, %p640_p12 }
  0x5f   :  { %648 = shalt.err (!%p645_p0)
}
  0x60   :  { %s649_s0 = scalar_lea.vmem %s49_s30, 16  ;;  %s653_s29 = scalar_lea.vmem %s49_s30, 32 }
  0x61   :  { %p650_p1 = scmp.ne.s32.totalorder %s49_s30, %s649_s0  ;;  %p654_p2 = scmp.lt.s32.totalorder %s49_s30, %s49_s30 }
  0x62   :  { %p655_p3 = scmp.lt.s32.totalorder %s653_s29, %s649_s0 }
  0x64   :  { %p656_p4 = por %p655_p3, %p654_p2 }
  0x66   :  { %p657_p5 = pnand %p656_p4, %p650_p1 }
  0x68   :  { %660 = shalt.err (!%p657_p5)
}
  0x69   :  { %51 = dma.hbm_to_vmem [thread:$0]  %s978_s2, 16, %s49_s30, [#allocation6]  }
  0x6a   :  { %s661_s22 = scalar_lea.hbm %s980_s4, 16 }
  0x6b   :  { %p662_p6 = scmp.ne.s32.totalorder %s980_s4, %s661_s22  ;;  %p665_p7 = scmp.lt.u32.totalorder %s661_s22, %s980_s4 }
  0x6d   :  { %p667_p8 = pnand %p665_p7, %p662_p6 }
  0x6f   :  { %670 = shalt.err (!%p667_p8)
}
  0x70   :  { %s671_s7 = scalar_lea.vmem %s71_s12, 16  ;;  %s675_s27 = scalar_lea.vmem %s71_s12, 32 }
  0x71   :  { %p672_p9 = scmp.ne.s32.totalorder %s71_s12, %s671_s7  ;;  %p676_p10 = scmp.lt.s32.totalorder %s71_s12, %s71_s12 }
  0x72   :  { %p677_p11 = scmp.lt.s32.totalorder %s675_s27, %s671_s7 }
  0x74   :  { %p678_p12 = por %p677_p11, %p676_p10 }
  0x76   :  { %p679_p13 = pnand %p678_p12, %p672_p9 }
  0x78   :  { %682 = shalt.err (!%p679_p13)
}
  0x79   :  { %73 = dma.hbm_to_vmem [thread:$0]  %s980_s4, 16, %s71_s12, [#allocation9]  }
  0x7a   :  { %s770_s30 = smov [#allocation13]   ;;  %s771_s1 = smov [#allocation16]  }
  0x7b   :  { %s92_s11 = sshll.u32 %s770_s30, 4  ;;  %s112_s14 = sshll.u32 %s771_s1, 4  ;;  %s93_s11 = int_to_ptr.vmem [resolvable:$true] %s92_s11  ;;  %s113_s14 = int_to_ptr.vmem [resolvable:$true] %s112_s14 }
  0x7c   :  { %s683_s5 = scalar_lea.hbm %s982_s6, 16 }
  0x7d   :  { %p684_p0 = scmp.ne.s32.totalorder %s982_s6, %s683_s5  ;;  %p687_p1 = scmp.lt.u32.totalorder %s683_s5, %s982_s6 }
  0x7f   :  { %p689_p2 = pnand %p687_p1, %p684_p0 }
  0x81   :  { %692 = shalt.err (!%p689_p2)
}
  0x82   :  { %s693_s4 = scalar_lea.vmem %s93_s11, 16  ;;  %s697_s12 = scalar_lea.vmem %s93_s11, 32 }
  0x83   :  { %p694_p3 = scmp.ne.s32.totalorder %s93_s11, %s693_s4  ;;  %p698_p4 = scmp.lt.s32.totalorder %s93_s11, %s93_s11 }
  0x84   :  { %p699_p5 = scmp.lt.s32.totalorder %s697_s12, %s693_s4 }
  0x86   :  { %p700_p6 = por %p699_p5, %p698_p4 }
  0x88   :  { %p701_p7 = pnand %p700_p6, %p694_p3 }
  0x8a   :  { %704 = shalt.err (!%p701_p7)
}
  0x8b   :  { %95 = dma.hbm_to_vmem [thread:$0]  %s982_s6, 16, %s93_s11, [#allocation12]  }
  0x8c   :  { %s705_s22 = scalar_lea.hbm %s984_s8, 16 }
  0x8d   :  { %p706_p8 = scmp.ne.s32.totalorder %s984_s8, %s705_s22  ;;  %p709_p9 = scmp.lt.u32.totalorder %s705_s22, %s984_s8 }
  0x8f   :  { %p711_p10 = pnand %p709_p9, %p706_p8 }
  0x91   :  { %714 = shalt.err (!%p711_p10)
}
  0x92   :  { %s715_s7 = scalar_lea.vmem %s113_s14, 16  ;;  %s719_s27 = scalar_lea.vmem %s113_s14, 32 }
  0x93   :  { %p716_p11 = scmp.ne.s32.totalorder %s113_s14, %s715_s7  ;;  %p720_p12 = scmp.lt.s32.totalorder %s113_s14, %s113_s14 }
  0x94   :  { %p721_p13 = scmp.lt.s32.totalorder %s719_s27, %s715_s7 }
  0x96   :  { %p722_p0 = por %p721_p13, %p720_p12 }
  0x98   :  { %p723_p1 = pnand %p722_p0, %p716_p11 }
  0x9a   :  { %726 = shalt.err (!%p723_p1)
}
  0x9b   :  { %115 = dma.hbm_to_vmem [thread:$0]  %s984_s8, 16, %s113_s14, [#allocation15]  }
  0x9c   :  { %749 = dma.done.wait [#allocation3], 128  }
  0x9d   :  { %750 = vsyncadd [#allocation3], 4294967168 }
  0x9e   :  { %751 = dma.done.wait [#allocation6], 32  }
  0x9f   :  { %752 = vsyncadd [#allocation6], 4294967264 }
  0xa0   :  { %753 = dma.done.wait [#allocation9], 272  }
  0xa1   :  { %754 = vsyncadd [#allocation9], 4294967024 }
  0xa2   :  { %755 = dma.done.wait [#allocation12], 528  }
  0xa3   :  { %756 = vsyncadd [#allocation12], 4294966768 }
  0xa4   :  { %757 = dma.done.wait [#allocation15], 32  }
  0xa5   :  { %758 = vsyncadd [#allocation15], 4294967264  ;;  %v462_v0 = vld [vmem:[#allocation2] sm:$0xff]   ;;  %vm150_vm0 = vcmask 261120   ;;  %v507_v15 = vld [vmem:[#allocation8] sm:$0xff]   ;;  %v772_v16 = vmov 0.0  }
  0xa6   :  { %v942_v1 = vunpack.c.l.bf16 %v462_v0  ;;  %v944_v2 = vunpack.c.h.bf16 %v462_v0  ;;  %473 = vmatprep.subr.bf16.mxu0 %v772_v16  ;;  %481 = vmatprep.subr.bf16.mxu1 %v772_v16  ;;  %v508_v17 = vld [vmem:[#allocation8 + $0x8] sm:$0xff]   ;;  %vm773_vm1 = vmmov 0   ;;  %v441_v26 = vld [vmem:[#allocation5] ss:$0 sm:$0xff]  ;;  %v442_v30 = vld [vmem:[#allocation7] ss:$0 sm:$0xff] }
  0xa7   :  { %474 = vmatpush3.bf16.msra.mxu0 %v507_v15  ;;  %477 = vmatprep.mubr.msk.bf16.mxu0 %vm773_vm1, %v772_v16  ;;  %v509_v35 = vld [vmem:[#allocation11] sm:$0xff]   ;;  %v510_v36 = vld [vmem:[#allocation11 + $0x8] sm:$0xff]   ;;  %v511_v37 = vld [vmem:[#allocation11 + $0x10] sm:$0xff]   ;;  %vm316_vm2 = vcmask 523264   ;;  %vm417_vm3 = vcmask 257024   ;;  %s774_s8 = smov [#allocation17]  }
  0xa8   :  { %v151_v3 = vsel %vm150_vm0, %v942_v1, 0.0  ;;  %v154_v4 = vsel %vm150_vm0, %v944_v2, 0.0  ;;  %475 = vmatprep.subr.bf16.mxu0 %v772_v16  ;;  %489 = vmatprep.mubr.msk.bf16.mxu1 %vm773_vm1, %v772_v16  ;;  %v512_v38 = vld [vmem:[#allocation11 + $0x18] sm:$0xff]   ;;  %v449_v57 = vld [vmem:[#allocation13] ss:$0 sm:$0xff]  ;;  %s425_s28 = sshll.u32 %s774_s8, 4  ;;  %s426_s28 = int_to_ptr.vmem [resolvable:$true] %s425_s28 }
  0xa9   :  { %152 = vadd.xlane.f32.xlu0 %v151_v3  ;;  %482 = vmatpush3.bf16.msra.mxu1 %v509_v35  ;;  %v443_v39 = vld [vmem:[#allocation10] ss:$0 sm:$0xff]  ;;  %s727_s30 = scalar_lea.vmem %s426_s28, 128  ;;  %p732_p3 = scmp.lt.s32.totalorder %s426_s28, %s426_s28 }
  0xaa   :  { %483 = vmatprep.subr.bf16.mxu1 %v772_v16  ;;  %p728_p2 = scmp.ne.s32.totalorder %s426_s28, %s727_s30  ;;  %p733_p4 = scmp.lt.s32.totalorder %s727_s30, %s727_s30 }
  0xab   :  { %476 = vmatpush3.bf16.msra.mxu0 %v508_v17 }
  0xac   :  { %p734_p5 = por %p733_p4, %p732_p3 }
  0xad   :  { %155 = vadd.xlane.f32.xlu0 %v154_v4  ;;  %484 = vmatpush3.bf16.msra.mxu1 %v510_v36 }
  0xae   :  { %485 = vmatprep.subr.bf16.mxu1 %v772_v16  ;;  %p735_p6 = pnand %p734_p5, %p728_p2 }
  0xb1   :  { %486 = vmatpush3.bf16.msra.mxu1 %v511_v37 }
  0xb2   :  { %487 = vmatprep.subr.bf16.mxu1 %v772_v16 }
  0xb5   :  { %488 = vmatpush3.bf16.msra.mxu1 %v512_v38 }
 0x136   :  { %v153_v5 = vpop.xlane.xlu0 %152 }
 0x137   :  { %v158_v6 = vmul.f32 0.03125, %v153_v5 }
 0x139   :  { %v160_v7 = vsub.f32 %v942_v1, %v158_v6 }
 0x13a   :  { %v156_v8 = vpop.xlane.xlu0 %155 }
 0x13b   :  { %v159_v9 = vmul.f32 0.03125, %v156_v8  ;;  %v162_v10 = vmul.f32 %v160_v7, %v160_v7 }
 0x13d   :  { %v161_v11 = vsub.f32 %v944_v2, %v159_v9  ;;  %v164_v12 = vsel %vm150_vm0, %v162_v10, 0.0 }
 0x13e   :  { %165 = vadd.xlane.f32.xlu1 %v164_v12 }
 0x13f   :  { %v163_v13 = vmul.f32 %v161_v11, %v161_v11 }
 0x141   :  { %v167_v14 = vsel %vm150_vm0, %v163_v13, 0.0 }
 0x142   :  { %168 = vadd.xlane.f32.xlu1 %v167_v14 }
 0x1cb   :  { %v166_v18 = vpop.xlane.xlu1 %165 }
 0x1cc   :  { %v170_v19 = vmul.f32 0.03125, %v166_v18 }
 0x1ce   :  { %v172_v20 = vadd.f32 1e-05, %v170_v19 }
 0x1cf   :  { %v169_v21 = vpop.xlane.xlu1 %168 }
 0x1d0   :  { %513 = vrsqrt.f32 %v172_v20  ;;  %v171_v22 = vmul.f32 0.03125, %v169_v21 }
 0x1d2   :  { %v173_v23 = vadd.f32 1e-05, %v171_v22 }
 0x1d4   :  { %515 = vrsqrt.f32 %v173_v23  ;;  %v455_v23 = vld [vmem:[#allocation14] ss:$0 sm:$0xff] }
 0x1da   :  { %v514_v24 = vpop.eup %513 }
 0x1db   :  { %v176_v25 = vmul.f32 %v514_v24, %v160_v7 }
 0x1dd   :  { %v184_v29 = vmul.f32 %v441_v26, %v176_v25 }
 0x1de   :  { %v516_v27 = vpop.eup %515 }
 0x1df   :  { %v177_v28 = vmul.f32 %v516_v27, %v161_v11  ;;  %v192_v32 = vadd.f32 %v442_v30, %v184_v29 }
 0x1e1   :  { %v185_v31 = vmul.f32 %v441_v26, %v177_v28  ;;  %v456_v26 = vld [vmem:[#allocation16] ss:$0 sm:$0xff] }
 0x1e3   :  { %v193_v33 = vadd.f32 %v442_v30, %v185_v31 }
 0x1e5   :  { %v194_v34 = vpack.c.bf16 %v193_v33, %v192_v32 }
 0x1e7   :  { %478 = vmatmul.mubr.msk.bf16.vlgmr.msra.gmra.mrb[0].mxu0 %vm150_vm0, %v194_v34 }
 0x2ba   :  { %v255_v40 = vpop.f32.mrb[0].mxu0 }
 0x2bb   :  { %v256_v41 = vadd.f32 %v443_v39, %v255_v40  ;;  %v479_v42 = vpop.f32.mrb[1].mxu0 }
 0x2bc   :  { %v258_v43 = vpop.f32.mrb[2].mxu0 }
 0x2bd   :  { %v447_v44 = vmul.f32 -1.442695, %v256_v41  ;;  %v259_v45 = vadd.f32 %v443_v39, %v258_v43  ;;  %v480_v46 = vpop.f32.mrb[3].mxu0 }
 0x2bf   :  { %517 = vpow2.f32 %v447_v44  ;;  %v448_v47 = vmul.f32 -1.442695, %v259_v45 }
 0x2c1   :  { %519 = vpow2.f32 %v448_v47 }
 0x2c9   :  { %v518_v48 = vpop.eup %517 }
 0x2ca   :  { %v268_v49 = vadd.f32 1.0, %v518_v48 }
 0x2cb   :  { %v520_v50 = vpop.eup %519 }
 0x2cc   :  { %521 = vrcp.f32 %v268_v49  ;;  %v269_v51 = vadd.f32 1.0, %v520_v50 }
 0x2ce   :  { %523 = vrcp.f32 %v269_v51 }
 0x2d6   :  { %v522_v52 = vpop.eup %521 }
 0x2d7   :  { %v274_v54 = vmul.f32 %v522_v52, %v256_v41 }
 0x2d8   :  { %v524_v53 = vpop.eup %523 }
 0x2d9   :  { %v275_v55 = vmul.f32 %v524_v53, %v259_v45 }
 0x2db   :  { %v276_v56 = vpack.c.bf16 %v275_v55, %v274_v54 }
 0x2dd   :  { %490 = vmatmul.mubr.msk.bf16.vlgmr.msra.gmra.mrb[0].mxu1 %vm316_vm2, %v276_v56 }
 0x3b0   :  { %v354_v58 = vpop.f32.mrb[0].mxu1 }
 0x3b1   :  { %v355_v59 = vadd.f32 %v449_v57, %v354_v58  ;;  %v491_v60 = vpop.f32.mrb[1].mxu1 }
 0x3b2   :  { %v357_v61 = vpop.f32.mrb[2].mxu1 }
 0x3b3   :  { %v361_v62 = vmul.f32 0.5, %v355_v59  ;;  %v358_v63 = vadd.f32 %v449_v57, %v357_v61  ;;  %v492_v0 = vpop.f32.mrb[3].mxu1 }
 0x3b5   :  { %v362_v3 = vmul.f32 0.5, %v358_v63  ;;  %v363_v4 = vadd.f32 %v942_v1, %v361_v62 }
 0x3b7   :  { %v367_v5 = vsel %vm150_vm0, %v363_v4, 0.0  ;;  %v364_v6 = vadd.f32 %v944_v2, %v362_v3 }
 0x3b8   :  { %368 = vadd.xlane.f32.xlu0 %v367_v5 }
 0x3b9   :  { %v370_v7 = vsel %vm150_vm0, %v364_v6, 0.0 }
 0x3ba   :  { %371 = vadd.xlane.f32.xlu1 %v370_v7 }
 0x445   :  { %v369_v8 = vpop.xlane.xlu0 %368 }
 0x446   :  { %v373_v9 = vmul.f32 0.03125, %v369_v8 }
 0x447   :  { %v372_v10 = vpop.xlane.xlu1 %371 }
 0x448   :  { %v375_v11 = vsub.f32 %v363_v4, %v373_v9  ;;  %v374_v12 = vmul.f32 0.03125, %v372_v10 }
 0x44a   :  { %v376_v13 = vsub.f32 %v364_v6, %v374_v12  ;;  %v377_v14 = vmul.f32 %v375_v11, %v375_v11 }
 0x44c   :  { %v379_v15 = vsel %vm150_vm0, %v377_v14, 0.0  ;;  %v378_v16 = vmul.f32 %v376_v13, %v376_v13 }
 0x44d   :  { %380 = vadd.xlane.f32.xlu0 %v379_v15 }
 0x44e   :  { %v382_v1 = vsel %vm150_vm0, %v378_v16, 0.0 }
 0x44f   :  { %383 = vadd.xlane.f32.xlu1 %v382_v1 }
 0x4da   :  { %v381_v17 = vpop.xlane.xlu0 %380 }
 0x4db   :  { %v385_v2 = vmul.f32 0.03125, %v381_v17 }
 0x4dc   :  { %v384_v18 = vpop.xlane.xlu1 %383 }
 0x4dd   :  { %v387_v19 = vadd.f32 1e-05, %v385_v2  ;;  %v386_v20 = vmul.f32 0.03125, %v384_v18 }
 0x4df   :  { %525 = vrsqrt.f32 %v387_v19  ;;  %v388_v21 = vadd.f32 1e-05, %v386_v20 }
 0x4e1   :  { %527 = vrsqrt.f32 %v388_v21 }
 0x4e9   :  { %v526_v22 = vpop.eup %525 }
 0x4ea   :  { %v391_v24 = vmul.f32 %v526_v22, %v375_v11 }
 0x4eb   :  { %v528_v25 = vpop.eup %527 }
 0x4ec   :  { %v392_v27 = vmul.f32 %v528_v25, %v376_v13  ;;  %v399_v28 = vmul.f32 %v455_v23, %v391_v24 }
 0x4ee   :  { %v400_v29 = vmul.f32 %v455_v23, %v392_v27  ;;  %v407_v30 = vadd.f32 %v456_v26, %v399_v28 }
 0x4f0   :  { %v408_v31 = vadd.f32 %v456_v26, %v400_v29  ;;  %v459_v32 = vpack.c.bf16 %v407_v30, %v407_v30 }
 0x4f2   :  { %v460_v33 = vpack.c.bf16 %v408_v31, %v408_v31  ;;  %418 = vst.msk [vmem:[#allocation17] sm:$0xf] %vm417_vm3, %v459_v32 }
 0x4f4   :  { %419 = vst.msk [vmem:[#allocation17 + $0x4] sm:$0xf] %vm417_vm3, %v460_v33 }
 0x4f5   :  { %738 = shalt.err (!%p735_p6)
}
 0x4f6   :  { %s739_s14 = scalar_lea.hbm %s985_s9, 128 }
 0x4f7   :  { %p740_p7 = scmp.ne.s32.totalorder %s985_s9, %s739_s14  ;;  %p743_p8 = scmp.lt.u32.totalorder %s739_s14, %s985_s9 }
 0x4f9   :  { %p745_p9 = pnand %p743_p8, %p740_p7 }
 0x4fb   :  { %748 = shalt.err (!%p745_p9)
}
 0x4fc   :  { %431 = dma.vmem_to_hbm [thread:$0]  %s426_s28, 128, %s985_s9, [#allocation4], %s764_s10, %s764_s10, %s765_s13  }
 0x4fd   :  { %759 = dma.done.wait [#allocation4], 128  }
 0x4fe   :  { %760 = vsyncadd [#allocation4], 4294967168 }
 0x4ff   :  { %435 = vsyncpa [#allocation3], 1 }
 0x500   :  { %436 = vsyncpa [#allocation6], 1 }
 0x501   :  { %437 = vsyncpa [#allocation9], 1 }
 0x502   :  { %438 = vsyncpa [#allocation12], 1 }
 0x503   :  { %439 = vsyncpa [#allocation15], 1 }
 0x504   :  { %440 = vsyncpa [#allocation4], 1 }

</bundles_post_ra>
